<compile_context>
chip_gen: v7x
topology: tpu7x:2x2x1
jax: 0.10.0
libtpu: 0.0.40
codegen_flags: <defaults>
</compile_context>

<pallas_src>
import jax
import jax.numpy as jnp
from jax.experimental import pallas as pl
from jax.experimental.pallas import tpu as pltpu


_TAPS = tuple((dy, dx) for dy in range(3) for dx in range(3))


# ---------------------------------------------------------------------------
# Kernel
# ---------------------------------------------------------------------------

def _basic_block_kernel(xc_ref, xp_ref, xn_ref, w1_ref, b1_ref, w2_ref, b2_ref,
                        o_ref, xpad, hpad):
    """Fused BasicBlock forward for one (batch, row-tile) grid step.

    xc_ref: (1, TH, W, Cin)   current row tile of the input (also the residual)
    xp_ref: (1, 2,  W, Cin)   the two rows above the tile (ignored when i == 0)
    xn_ref: (1, 2,  W, Cin)   the two rows below the tile (ignored when i == last)
    w1_ref: (9, Cin,  Cmid)   conv1 weights (BN1 scale folded), tap-major, bf16
    b1_ref: (1, Cmid)         folded BN1 bias (f32)
    w2_ref: (9, Cmid, Cout)   conv2 weights (BN2 scale folded), tap-major, bf16
    b2_ref: (1, Cout)         folded BN2 bias (f32)
    o_ref : (1, TH, W, Cout)
    xpad  : VMEM (TH+4, W+2, Cin)   input rows + 2-row / 1-col zero halo
    hpad  : VMEM (TH+2, W+2, Cmid)  conv1 output (+1 halo row each side) + 1-col halo
    """
    i = pl.program_id(1)
    n_h = pl.num_programs(1)
    _, TH, W, Cin = xc_ref.shape
    Cmid = w1_ref.shape[2]
    Cout = w2_ref.shape[2]
    Hh = TH + 2          # conv1 rows produced per tile (one halo row each side)

    # ---- stage the input tile; only the halo is (conditionally) zeroed ----
    zc = jnp.zeros((TH + 4, 1, Cin), jnp.float32)
    xpad[:, 0:1, :] = zc                       # left zero column
    xpad[:, W + 1:W + 2, :] = zc               # right zero column
    xpad[2:TH + 2, 1:W + 1, :] = xc_ref[0].astype(jnp.float32)

    @pl.when(i > 0)
    def _():
        xpad[0:2, 1:W + 1, :] = xp_ref[0].astype(jnp.float32)

    @pl.when(i == 0)
    def _():
        xpad[0:2, 1:W + 1, :] = jnp.zeros((2, W, Cin), jnp.float32)

    @pl.when(i < n_h - 1)
    def _():
        xpad[TH + 2:TH + 4, 1:W + 1, :] = xn_ref[0].astype(jnp.float32)

    @pl.when(i == n_h - 1)
    def _():
        xpad[TH + 2:TH + 4, 1:W + 1, :] = jnp.zeros((2, W, Cin), jnp.float32)

    # ---- conv1 + bn1 + relu: 9 per-tap bf16 matmuls, f32 accumulation ----
    acc1 = jnp.zeros((Hh * W, Cmid), jnp.float32)
    for tap, (dy, dx) in enumerate(_TAPS):
        lhs = xpad[dy:dy + Hh, dx:dx + W, :].reshape(Hh * W, Cin)
        acc1 = acc1 + jnp.dot(lhs.astype(jnp.bfloat16), w1_ref[tap],
                              preferred_element_type=jnp.float32)
    h = jnp.maximum(acc1 + b1_ref[...], 0.0)

    # ---- stage conv1 output with a zero column halo; its top/bottom halo row
    # is conv2's zero padding when this tile touches the image border ----
    zc2 = jnp.zeros((TH + 2, 1, Cmid), jnp.float32)
    hpad[:, 0:1, :] = zc2
    hpad[:, W + 1:W + 2, :] = zc2
    hpad[:, 1:W + 1, :] = h.reshape(Hh, W, Cmid)

    @pl.when(i == 0)
    def _():
        hpad[0:1, 1:W + 1, :] = jnp.zeros((1, W, Cmid), jnp.float32)

    @pl.when(i == n_h - 1)
    def _():
        hpad[TH + 1:TH + 2, 1:W + 1, :] = jnp.zeros((1, W, Cmid), jnp.float32)

    # ---- conv2 + bn2 + residual + relu: 9 per-tap bf16 matmuls ----
    acc2 = jnp.zeros((TH * W, Cout), jnp.float32)
    for tap, (dy, dx) in enumerate(_TAPS):
        lhs = hpad[dy:dy + TH, dx:dx + W, :].reshape(TH * W, Cmid)
        acc2 = acc2 + jnp.dot(lhs.astype(jnp.bfloat16), w2_ref[tap],
                              preferred_element_type=jnp.float32)
    out = (acc2 + b2_ref[...]).reshape(TH, W, Cout)
    out = out + xc_ref[0].astype(jnp.float32)            # identity residual
    o_ref[0] = jnp.maximum(out, 0.0).astype(o_ref.dtype)


# ---------------------------------------------------------------------------
# Wrapper
# ---------------------------------------------------------------------------

def _fold_bn_into_conv(w_hwio, gamma, beta, mean, var, eps=1e-5):
    """Fold eval-mode BN into the preceding bias-free conv.

    Returns (tap-major (9, Cin, Cout) bf16 weights with the BN scale folded in,
    f32 bias of shape (1, Cout))."""
    scale = gamma / jnp.sqrt(var + eps)               # (Cout,)
    w = w_hwio * scale                                # scale per output channel
    bias = beta - mean * scale
    kh, kw, cin, cout = w_hwio.shape
    return (w.reshape(kh * kw, cin, cout).astype(jnp.bfloat16),
            bias.reshape(1, cout).astype(jnp.float32))


def _pick_row_tile(H, W, Cin, Cmid, Cout, budget_bytes=24 << 20):
    """Largest row tile TH dividing H whose per-step VMEM footprint fits."""
    def fits(th):
        xpad = (th + 4) * (W + 2) * Cin * 4            # f32 staging scratch
        hpad = (th + 2) * (W + 2) * Cmid * 4           # f32 staging scratch
        accs = (th + 2) * W * Cmid * 4 + th * W * Cout * 4
        io = 2 * (th * W * Cin + 4 * W * Cin + th * W * Cout) * 4   # dbl-buffered blocks
        return xpad + hpad + accs + io <= budget_bytes

    for th in sorted((d for d in range(1, H + 1) if H % d == 0), reverse=True):
        if th != H and th % 2:
            continue            # halo BlockSpecs index H in 2-row units
        if fits(th):
            return th
    return 2 if H % 2 == 0 else H


@jax.jit
def basic_block_forward_nhwc(x_nhwc, params):
    """BasicBlock.forward (stride=1, downsample=None). NHWC in / NHWC out."""
    N, H, W, Cin = x_nhwc.shape

    w1, b1 = _fold_bn_into_conv(params["w1"], params["g1"], params["b1"],
                                params["m1"], params["v1"])
    w2, b2 = _fold_bn_into_conv(params["w2"], params["g2"], params["b2"],
                                params["m2"], params["v2"])
    Cmid = w1.shape[2]
    Cout = w2.shape[2]
    assert Cout == Cin, "identity residual requires inplanes == planes"

    TH = _pick_row_tile(H, W, Cin, Cmid, Cout)
    n_h = pl.cdiv(H, TH)
    assert n_h == 1 or TH % 2 == 0, "row tile must be even when H is tiled"
    half = TH // 2                       # row tile measured in 2-row halo blocks
    n_hblk2 = (H + 1) // 2               # number of 2-row blocks along H

    return pl.pallas_call(
        _basic_block_kernel,
        out_shape=jax.ShapeDtypeStruct((N, H, W, Cout), x_nhwc.dtype),
        grid_spec=pltpu.PrefetchScalarGridSpec(
            num_scalar_prefetch=0,
            grid=(N, n_h),
            in_specs=[
                # current row tile (also used as the residual)
                pl.BlockSpec((1, TH, W, Cin), lambda n, i: (n, i, 0, 0)),
                # two rows above (clamped at the top; masked out when i == 0)
                pl.BlockSpec((1, 2, W, Cin),
                             lambda n, i: (n, jnp.maximum(i * half - 1, 0), 0, 0)),
                # two rows below (clamped at the bottom; masked when i == last)
                pl.BlockSpec((1, 2, W, Cin),
                             lambda n, i: (n, jnp.minimum(i * half + half,
                                                          n_hblk2 - 1), 0, 0)),
                # BN-folded bf16 weights / f32 biases (constant index maps)
                pl.BlockSpec((9, Cin, Cmid), lambda n, i: (0, 0, 0)),
                pl.BlockSpec((1, Cmid), lambda n, i: (0, 0)),
                pl.BlockSpec((9, Cmid, Cout), lambda n, i: (0, 0, 0)),
                pl.BlockSpec((1, Cout), lambda n, i: (0, 0)),
            ],
            out_specs=pl.BlockSpec((1, TH, W, Cout), lambda n, i: (n, i, 0, 0)),
            scratch_shapes=[
                pltpu.VMEM((TH + 4, W + 2, Cin), jnp.float32),    # padded x tile
                pltpu.VMEM((TH + 2, W + 2, Cmid), jnp.float32),   # padded conv1 out
            ],
        ),
        compiler_params=pltpu.CompilerParams(
            dimension_semantics=("parallel", "arbitrary"),
            vmem_limit_bytes=48 * 1024 * 1024,
        ),
    )(x_nhwc, x_nhwc, x_nhwc, w1, b1, w2, b2)


@jax.jit
def basic_block_forward(x_nchw, params):
    """PyTorch-layout wrapper: NCHW in / NCHW out (one transpose each way).
    Prefer basic_block_forward_nhwc when the surrounding model is NHWC."""
    x = jnp.transpose(x_nchw, (0, 2, 3, 1))           # NCHW -> NHWC
    y = basic_block_forward_nhwc(x, params)
    return jnp.transpose(y, (0, 3, 1, 2))             # NHWC -> NCHW


# ---------------------------------------------------------------------------
# Pure-JAX reference (correctness check)
# ---------------------------------------------------------------------------

def _ref_forward(x_nchw, params):
    x = jnp.transpose(x_nchw, (0, 2, 3, 1))
    dn = ("NHWC", "HWIO", "NHWC")

    def conv(inp, w):
        return jax.lax.conv_general_dilated(
            inp, w, (1, 1), "SAME", dimension_numbers=dn,
            precision=jax.lax.Precision.HIGHEST)

    def bn(inp, g, b, m, v, eps=1e-5):
        return (inp - m) / jnp.sqrt(v + eps) * g + b

    h = jax.nn.relu(bn(conv(x, params["w1"]), params["g1"], params["b1"],
                       params["m1"], params["v1"]))
    o = bn(conv(h, params["w2"]), params["g2"], params["b2"],
           params["m2"], params["v2"])
    o = jax.nn.relu(o + x)
    return jnp.transpose(o, (0, 3, 1, 2))


# ---------------------------------------------------------------------------
# Main
# ---------------------------------------------------------------------------

if __name__ == "__main__":
    N, C, H, W = 2, 4, 16, 16          # inplanes = planes = 4, stride = 1
    key = jax.random.PRNGKey(0)
    keys = jax.random.split(key, 11)
    (kx, k1, k2, kg1, kb1, km1, kv1, kg2, kb2, km2, kv2) = keys

    x = jax.random.normal(kx, (N, C, H, W), jnp.float32)

    # Conv weights: PyTorch layout (Cout, Cin, 3, 3) -> HWIO for the kernel.
    w1_t = 0.1 * jax.random.normal(k1, (C, C, 3, 3), jnp.float32)
    w2_t = 0.1 * jax.random.normal(k2, (C, C, 3, 3), jnp.float32)
    params = {
        "w1": jnp.transpose(w1_t, (2, 3, 1, 0)),       # (3,3,Cin,Cout)
        "w2": jnp.transpose(w2_t, (2, 3, 1, 0)),
        # Non-trivial (eval-mode) BatchNorm stats to exercise the folding.
        "g1": 1.0 + 0.1 * jax.random.normal(kg1, (C,), jnp.float32),
        "b1": 0.1 * jax.random.normal(kb1, (C,), jnp.float32),
        "m1": 0.1 * jax.random.normal(km1, (C,), jnp.float32),
        "v1": jax.random.uniform(kv1, (C,), jnp.float32, 0.5, 1.5),
        "g2": 1.0 + 0.1 * jax.random.normal(kg2, (C,), jnp.float32),
        "b2": 0.1 * jax.random.normal(kb2, (C,), jnp.float32),
        "m2": 0.1 * jax.random.normal(km2, (C,), jnp.float32),
        "v2": jax.random.uniform(kv2, (C,), jnp.float32, 0.5, 1.5),
    }

    out = jax.block_until_ready(basic_block_forward(x, params))
    ref = jax.block_until_ready(_ref_forward(x, params))

    assert out.shape == (N, C, H, W)
    max_err = float(jnp.max(jnp.abs(out - ref)))
    # bf16 MXU operands (f32 accumulation) -> looser tolerance than pure f32.
    assert jnp.allclose(out, ref, atol=3e-2, rtol=3e-2), f"mismatch: {max_err}"
    print("KERNEL_OK")
</pallas_src>

<mosaic_0001>
module attributes {stable_mosaic.version = 11 : i64} {
  func.func @_basic_block_kernel(%arg0: i32, %arg1: i32, %arg2: memref<1x16x16x4xf32, #tpu.memory_space<vmem>>, %arg3: memref<1x2x16x4xf32, #tpu.memory_space<vmem>>, %arg4: memref<1x2x16x4xf32, #tpu.memory_space<vmem>>, %arg5: memref<9x4x4xbf16, #tpu.memory_space<vmem>>, %arg6: memref<1x4xf32, #tpu.memory_space<vmem>>, %arg7: memref<9x4x4xbf16, #tpu.memory_space<vmem>>, %arg8: memref<1x4xf32, #tpu.memory_space<vmem>>, %arg9: memref<1x16x16x4xf32, #tpu.memory_space<vmem>>, %arg10: memref<20x18x4xf32, #tpu.memory_space<vmem>>, %arg11: memref<18x18x4xf32, #tpu.memory_space<vmem>>) attributes {dimension_semantics = [#tpu.dimension_semantics<parallel>, #tpu.dimension_semantics<arbitrary>], iteration_bounds = array<i64: 2, 1>, scalar_prefetch = 0 : i64, scratch_operands = 2 : i64, tpu.core_type = #tpu.core_type<tc>, window_params = [{transform_indices = @transform_0, window_bounds = array<i64: 1, 16, 16, 4>}, {transform_indices = @transform_1, window_bounds = array<i64: 1, 2, 16, 4>}, {transform_indices = @transform_2, window_bounds = array<i64: 1, 2, 16, 4>}, {pipeline_mode = #tpu.pipeline_mode<synchronous>, transform_indices = @transform_3, window_bounds = array<i64: 9, 4, 4>}, {pipeline_mode = #tpu.pipeline_mode<synchronous>, transform_indices = @transform_4, window_bounds = array<i64: 1, 4>}, {pipeline_mode = #tpu.pipeline_mode<synchronous>, transform_indices = @transform_5, window_bounds = array<i64: 9, 4, 4>}, {pipeline_mode = #tpu.pipeline_mode<synchronous>, transform_indices = @transform_6, window_bounds = array<i64: 1, 4>}, {transform_indices = @transform_7, window_bounds = array<i64: 1, 16, 16, 4>}]} {
    %cst = arith.constant 0.000000e+00 : f32
    %0 = vector.broadcast %cst : f32 to vector<20x1x4xf32>
    %c0 = arith.constant 0 : index
    %c0_0 = arith.constant 0 : index
    %c0_1 = arith.constant 0 : index
    %1 = vector.load %arg10[%c0, %c0_0, %c0_1] : memref<20x18x4xf32, #tpu.memory_space<vmem>>, vector<20x1x4xf32>
    tpu.vector_store %arg10[%c0, %c0_0, %c0_1], %0 {strides = array<i32>} : memref<20x18x4xf32, #tpu.memory_space<vmem>>, vector<20x1x4xf32>,
    %c0_2 = arith.constant 0 : index
    %c17 = arith.constant 17 : index
    %c0_3 = arith.constant 0 : index
    %2 = vector.load %arg10[%c0_2, %c17, %c0_3] : memref<20x18x4xf32, #tpu.memory_space<vmem>>, vector<20x1x4xf32>
    tpu.vector_store %arg10[%c0_2, %c17, %c0_3], %0 {strides = array<i32>} : memref<20x18x4xf32, #tpu.memory_space<vmem>>, vector<20x1x4xf32>,
    %c0_4 = arith.constant 0 : index
    %c0_5 = arith.constant 0 : index
    %c0_6 = arith.constant 0 : index
    %c0_7 = arith.constant 0 : index
    %3 = vector.load %arg2[%c0_4, %c0_5, %c0_6, %c0_7] : memref<1x16x16x4xf32, #tpu.memory_space<vmem>>, vector<1x16x16x4xf32>
    %4 = vector.shape_cast %3 : vector<1x16x16x4xf32> to vector<16x16x4xf32>
    %c2 = arith.constant 2 : index
    %c1 = arith.constant 1 : index
    %c0_8 = arith.constant 0 : index
    %5 = vector.load %arg10[%c2, %c1, %c0_8] : memref<20x18x4xf32, #tpu.memory_space<vmem>>, vector<16x16x4xf32>
    tpu.vector_store %arg10[%c2, %c1, %c0_8], %4 {strides = array<i32>} : memref<20x18x4xf32, #tpu.memory_space<vmem>>, vector<16x16x4xf32>,
    %c0_i32 = arith.constant 0 : i32
    %6 = arith.cmpi sgt, %arg1, %c0_i32 : i32
    %7 = arith.extui %6 : i1 to i32
    %c0_i32_9 = arith.constant 0 : i32
    %8 = arith.cmpi ne, %7, %c0_i32_9 : i32
    scf.if %8 {
      %c0_166 = arith.constant 0 : index
      %c0_167 = arith.constant 0 : index
      %c0_168 = arith.constant 0 : index
      %c0_169 = arith.constant 0 : index
      %174 = vector.load %arg3[%c0_166, %c0_167, %c0_168, %c0_169] : memref<1x2x16x4xf32, #tpu.memory_space<vmem>>, vector<1x2x16x4xf32>
      %175 = vector.shape_cast %174 : vector<1x2x16x4xf32> to vector<2x16x4xf32>
      %c0_170 = arith.constant 0 : index
      %c1_171 = arith.constant 1 : index
      %c0_172 = arith.constant 0 : index
      %176 = vector.load %arg10[%c0_170, %c1_171, %c0_172] : memref<20x18x4xf32, #tpu.memory_space<vmem>>, vector<2x16x4xf32>
      tpu.vector_store %arg10[%c0_170, %c1_171, %c0_172], %175 {strides = array<i32>} : memref<20x18x4xf32, #tpu.memory_space<vmem>>, vector<2x16x4xf32>,
    } else {
    }
    %c0_i32_10 = arith.constant 0 : i32
    %9 = arith.cmpi eq, %arg1, %c0_i32_10 : i32
    %10 = arith.extui %9 : i1 to i32
    %c0_i32_11 = arith.constant 0 : i32
    %11 = arith.cmpi ne, %10, %c0_i32_11 : i32
    scf.if %11 {
      %cst_166 = arith.constant 0.000000e+00 : f32
      %174 = vector.broadcast %cst_166 : f32 to vector<2x16x4xf32>
      %c0_167 = arith.constant 0 : index
      %c1_168 = arith.constant 1 : index
      %c0_169 = arith.constant 0 : index
      %175 = vector.load %arg10[%c0_167, %c1_168, %c0_169] : memref<20x18x4xf32, #tpu.memory_space<vmem>>, vector<2x16x4xf32>
      tpu.vector_store %arg10[%c0_167, %c1_168, %c0_169], %174 {strides = array<i32>} : memref<20x18x4xf32, #tpu.memory_space<vmem>>, vector<2x16x4xf32>,
    } else {
    }
    %c0_i32_12 = arith.constant 0 : i32
    %12 = arith.cmpi slt, %arg1, %c0_i32_12 : i32
    %13 = arith.extui %12 : i1 to i32
    %c0_i32_13 = arith.constant 0 : i32
    %14 = arith.cmpi ne, %13, %c0_i32_13 : i32
    scf.if %14 {
      %c0_166 = arith.constant 0 : index
      %c0_167 = arith.constant 0 : index
      %c0_168 = arith.constant 0 : index
      %c0_169 = arith.constant 0 : index
      %174 = vector.load %arg4[%c0_166, %c0_167, %c0_168, %c0_169] : memref<1x2x16x4xf32, #tpu.memory_space<vmem>>, vector<1x2x16x4xf32>
      %175 = vector.shape_cast %174 : vector<1x2x16x4xf32> to vector<2x16x4xf32>
      %c18 = arith.constant 18 : index
      %c1_170 = arith.constant 1 : index
      %c0_171 = arith.constant 0 : index
      %176 = vector.load %arg10[%c18, %c1_170, %c0_171] : memref<20x18x4xf32, #tpu.memory_space<vmem>>, vector<2x16x4xf32>
      tpu.vector_store %arg10[%c18, %c1_170, %c0_171], %175 {strides = array<i32>} : memref<20x18x4xf32, #tpu.memory_space<vmem>>, vector<2x16x4xf32>,
    } else {
    }
    %c0_i32_14 = arith.constant 0 : i32
    %15 = arith.cmpi eq, %arg1, %c0_i32_14 : i32
    %16 = arith.extui %15 : i1 to i32
    %c0_i32_15 = arith.constant 0 : i32
    %17 = arith.cmpi ne, %16, %c0_i32_15 : i32
    scf.if %17 {
      %cst_166 = arith.constant 0.000000e+00 : f32
      %174 = vector.broadcast %cst_166 : f32 to vector<2x16x4xf32>
      %c18 = arith.constant 18 : index
      %c1_167 = arith.constant 1 : index
      %c0_168 = arith.constant 0 : index
      %175 = vector.load %arg10[%c18, %c1_167, %c0_168] : memref<20x18x4xf32, #tpu.memory_space<vmem>>, vector<2x16x4xf32>
      tpu.vector_store %arg10[%c18, %c1_167, %c0_168], %174 {strides = array<i32>} : memref<20x18x4xf32, #tpu.memory_space<vmem>>, vector<2x16x4xf32>,
    } else {
    }
    %cst_16 = arith.constant 0.000000e+00 : f32
    %18 = vector.broadcast %cst_16 : f32 to vector<288x4xf32>
    %c0_17 = arith.constant 0 : index
    %c0_18 = arith.constant 0 : index
    %c0_19 = arith.constant 0 : index
    %19 = vector.load %arg10[%c0_17, %c0_18, %c0_19] : memref<20x18x4xf32, #tpu.memory_space<vmem>>, vector<18x16x4xf32>
    %20 = vector.shape_cast %19 : vector<18x16x4xf32> to vector<288x4xf32>
    %21 = arith.truncf %20 : vector<288x4xf32> to vector<288x4xbf16>
    %c0_20 = arith.constant 0 : index
    %c0_21 = arith.constant 0 : index
    %c0_22 = arith.constant 0 : index
    %22 = vector.load %arg5[%c0_20, %c0_21, %c0_22] : memref<9x4x4xbf16, #tpu.memory_space<vmem>>, vector<1x4x4xbf16>
    %23 = vector.shape_cast %22 : vector<1x4x4xbf16> to vector<4x4xbf16>
    %cst_23 = arith.constant dense<0.000000e+00> : vector<288x4xf32>
    %24 = tpu.matmul %21, %23, %cst_23 {dimension_numbers = #tpu.dot_dimension_numbers<[1], [0], [0], [1], [0, 0, 1, 1], [], []>} : vector<288x4xbf16>, vector<4x4xbf16>, vector<288x4xf32> -> vector<288x4xf32>
    %25 = arith.addf %18, %24 : vector<288x4xf32>
    %c0_24 = arith.constant 0 : index
    %c1_25 = arith.constant 1 : index
    %c0_26 = arith.constant 0 : index
    %26 = vector.load %arg10[%c0_24, %c1_25, %c0_26] : memref<20x18x4xf32, #tpu.memory_space<vmem>>, vector<18x16x4xf32>
    %27 = vector.shape_cast %26 : vector<18x16x4xf32> to vector<288x4xf32>
    %28 = arith.truncf %27 : vector<288x4xf32> to vector<288x4xbf16>
    %c1_27 = arith.constant 1 : index
    %c0_28 = arith.constant 0 : index
    %c0_29 = arith.constant 0 : index
    %29 = vector.load %arg5[%c1_27, %c0_28, %c0_29] : memref<9x4x4xbf16, #tpu.memory_space<vmem>>, vector<1x4x4xbf16>
    %30 = vector.shape_cast %29 : vector<1x4x4xbf16> to vector<4x4xbf16>
    %cst_30 = arith.constant dense<0.000000e+00> : vector<288x4xf32>
    %31 = tpu.matmul %28, %30, %cst_30 {dimension_numbers = #tpu.dot_dimension_numbers<[1], [0], [0], [1], [0, 0, 1, 1], [], []>} : vector<288x4xbf16>, vector<4x4xbf16>, vector<288x4xf32> -> vector<288x4xf32>
    %32 = arith.addf %25, %31 : vector<288x4xf32>
    %c0_31 = arith.constant 0 : index
    %c2_32 = arith.constant 2 : index
    %c0_33 = arith.constant 0 : index
    %33 = vector.load %arg10[%c0_31, %c2_32, %c0_33] : memref<20x18x4xf32, #tpu.memory_space<vmem>>, vector<18x16x4xf32>
    %34 = vector.shape_cast %33 : vector<18x16x4xf32> to vector<288x4xf32>
    %35 = arith.truncf %34 : vector<288x4xf32> to vector<288x4xbf16>
    %c2_34 = arith.constant 2 : index
    %c0_35 = arith.constant 0 : index
    %c0_36 = arith.constant 0 : index
    %36 = vector.load %arg5[%c2_34, %c0_35, %c0_36] : memref<9x4x4xbf16, #tpu.memory_space<vmem>>, vector<1x4x4xbf16>
    %37 = vector.shape_cast %36 : vector<1x4x4xbf16> to vector<4x4xbf16>
    %cst_37 = arith.constant dense<0.000000e+00> : vector<288x4xf32>
    %38 = tpu.matmul %35, %37, %cst_37 {dimension_numbers = #tpu.dot_dimension_numbers<[1], [0], [0], [1], [0, 0, 1, 1], [], []>} : vector<288x4xbf16>, vector<4x4xbf16>, vector<288x4xf32> -> vector<288x4xf32>
    %39 = arith.addf %32, %38 : vector<288x4xf32>
    %c1_38 = arith.constant 1 : index
    %c0_39 = arith.constant 0 : index
    %c0_40 = arith.constant 0 : index
    %40 = vector.load %arg10[%c1_38, %c0_39, %c0_40] : memref<20x18x4xf32, #tpu.memory_space<vmem>>, vector<18x16x4xf32>
    %41 = vector.shape_cast %40 : vector<18x16x4xf32> to vector<288x4xf32>
    %42 = arith.truncf %41 : vector<288x4xf32> to vector<288x4xbf16>
    %c3 = arith.constant 3 : index
    %c0_41 = arith.constant 0 : index
    %c0_42 = arith.constant 0 : index
    %43 = vector.load %arg5[%c3, %c0_41, %c0_42] : memref<9x4x4xbf16, #tpu.memory_space<vmem>>, vector<1x4x4xbf16>
    %44 = vector.shape_cast %43 : vector<1x4x4xbf16> to vector<4x4xbf16>
    %cst_43 = arith.constant dense<0.000000e+00> : vector<288x4xf32>
    %45 = tpu.matmul %42, %44, %cst_43 {dimension_numbers = #tpu.dot_dimension_numbers<[1], [0], [0], [1], [0, 0, 1, 1], [], []>} : vector<288x4xbf16>, vector<4x4xbf16>, vector<288x4xf32> -> vector<288x4xf32>
    %46 = arith.addf %39, %45 : vector<288x4xf32>
    %c1_44 = arith.constant 1 : index
    %c1_45 = arith.constant 1 : index
    %c0_46 = arith.constant 0 : index
    %47 = vector.load %arg10[%c1_44, %c1_45, %c0_46] : memref<20x18x4xf32, #tpu.memory_space<vmem>>, vector<18x16x4xf32>
    %48 = vector.shape_cast %47 : vector<18x16x4xf32> to vector<288x4xf32>
    %49 = arith.truncf %48 : vector<288x4xf32> to vector<288x4xbf16>
    %c4 = arith.constant 4 : index
    %c0_47 = arith.constant 0 : index
    %c0_48 = arith.constant 0 : index
    %50 = vector.load %arg5[%c4, %c0_47, %c0_48] : memref<9x4x4xbf16, #tpu.memory_space<vmem>>, vector<1x4x4xbf16>
    %51 = vector.shape_cast %50 : vector<1x4x4xbf16> to vector<4x4xbf16>
    %cst_49 = arith.constant dense<0.000000e+00> : vector<288x4xf32>
    %52 = tpu.matmul %49, %51, %cst_49 {dimension_numbers = #tpu.dot_dimension_numbers<[1], [0], [0], [1], [0, 0, 1, 1], [], []>} : vector<288x4xbf16>, vector<4x4xbf16>, vector<288x4xf32> -> vector<288x4xf32>
    %53 = arith.addf %46, %52 : vector<288x4xf32>
    %c1_50 = arith.constant 1 : index
    %c2_51 = arith.constant 2 : index
    %c0_52 = arith.constant 0 : index
    %54 = vector.load %arg10[%c1_50, %c2_51, %c0_52] : memref<20x18x4xf32, #tpu.memory_space<vmem>>, vector<18x16x4xf32>
    %55 = vector.shape_cast %54 : vector<18x16x4xf32> to vector<288x4xf32>
    %56 = arith.truncf %55 : vector<288x4xf32> to vector<288x4xbf16>
    %c5 = arith.constant 5 : index
    %c0_53 = arith.constant 0 : index
    %c0_54 = arith.constant 0 : index
    %57 = vector.load %arg5[%c5, %c0_53, %c0_54] : memref<9x4x4xbf16, #tpu.memory_space<vmem>>, vector<1x4x4xbf16>
    %58 = vector.shape_cast %57 : vector<1x4x4xbf16> to vector<4x4xbf16>
    %cst_55 = arith.constant dense<0.000000e+00> : vector<288x4xf32>
    %59 = tpu.matmul %56, %58, %cst_55 {dimension_numbers = #tpu.dot_dimension_numbers<[1], [0], [0], [1], [0, 0, 1, 1], [], []>} : vector<288x4xbf16>, vector<4x4xbf16>, vector<288x4xf32> -> vector<288x4xf32>
    %60 = arith.addf %53, %59 : vector<288x4xf32>
    %c2_56 = arith.constant 2 : index
    %c0_57 = arith.constant 0 : index
    %c0_58 = arith.constant 0 : index
    %61 = vector.load %arg10[%c2_56, %c0_57, %c0_58] : memref<20x18x4xf32, #tpu.memory_space<vmem>>, vector<18x16x4xf32>
    %62 = vector.shape_cast %61 : vector<18x16x4xf32> to vector<288x4xf32>
    %63 = arith.truncf %62 : vector<288x4xf32> to vector<288x4xbf16>
    %c6 = arith.constant 6 : index
    %c0_59 = arith.constant 0 : index
    %c0_60 = arith.constant 0 : index
    %64 = vector.load %arg5[%c6, %c0_59, %c0_60] : memref<9x4x4xbf16, #tpu.memory_space<vmem>>, vector<1x4x4xbf16>
    %65 = vector.shape_cast %64 : vector<1x4x4xbf16> to vector<4x4xbf16>
    %cst_61 = arith.constant dense<0.000000e+00> : vector<288x4xf32>
    %66 = tpu.matmul %63, %65, %cst_61 {dimension_numbers = #tpu.dot_dimension_numbers<[1], [0], [0], [1], [0, 0, 1, 1], [], []>} : vector<288x4xbf16>, vector<4x4xbf16>, vector<288x4xf32> -> vector<288x4xf32>
    %67 = arith.addf %60, %66 : vector<288x4xf32>
    %c2_62 = arith.constant 2 : index
    %c1_63 = arith.constant 1 : index
    %c0_64 = arith.constant 0 : index
    %68 = vector.load %arg10[%c2_62, %c1_63, %c0_64] : memref<20x18x4xf32, #tpu.memory_space<vmem>>, vector<18x16x4xf32>
    %69 = vector.shape_cast %68 : vector<18x16x4xf32> to vector<288x4xf32>
    %70 = arith.truncf %69 : vector<288x4xf32> to vector<288x4xbf16>
    %c7 = arith.constant 7 : index
    %c0_65 = arith.constant 0 : index
    %c0_66 = arith.constant 0 : index
    %71 = vector.load %arg5[%c7, %c0_65, %c0_66] : memref<9x4x4xbf16, #tpu.memory_space<vmem>>, vector<1x4x4xbf16>
    %72 = vector.shape_cast %71 : vector<1x4x4xbf16> to vector<4x4xbf16>
    %cst_67 = arith.constant dense<0.000000e+00> : vector<288x4xf32>
    %73 = tpu.matmul %70, %72, %cst_67 {dimension_numbers = #tpu.dot_dimension_numbers<[1], [0], [0], [1], [0, 0, 1, 1], [], []>} : vector<288x4xbf16>, vector<4x4xbf16>, vector<288x4xf32> -> vector<288x4xf32>
    %74 = arith.addf %67, %73 : vector<288x4xf32>
    %c2_68 = arith.constant 2 : index
    %c2_69 = arith.constant 2 : index
    %c0_70 = arith.constant 0 : index
    %75 = vector.load %arg10[%c2_68, %c2_69, %c0_70] : memref<20x18x4xf32, #tpu.memory_space<vmem>>, vector<18x16x4xf32>
    %76 = vector.shape_cast %75 : vector<18x16x4xf32> to vector<288x4xf32>
    %77 = arith.truncf %76 : vector<288x4xf32> to vector<288x4xbf16>
    %c8 = arith.constant 8 : index
    %c0_71 = arith.constant 0 : index
    %c0_72 = arith.constant 0 : index
    %78 = vector.load %arg5[%c8, %c0_71, %c0_72] : memref<9x4x4xbf16, #tpu.memory_space<vmem>>, vector<1x4x4xbf16>
    %79 = vector.shape_cast %78 : vector<1x4x4xbf16> to vector<4x4xbf16>
    %cst_73 = arith.constant dense<0.000000e+00> : vector<288x4xf32>
    %80 = tpu.matmul %77, %79, %cst_73 {dimension_numbers = #tpu.dot_dimension_numbers<[1], [0], [0], [1], [0, 0, 1, 1], [], []>} : vector<288x4xbf16>, vector<4x4xbf16>, vector<288x4xf32> -> vector<288x4xf32>
    %81 = arith.addf %74, %80 : vector<288x4xf32>
    %c0_74 = arith.constant 0 : index
    %c0_75 = arith.constant 0 : index
    %82 = vector.load %arg6[%c0_74, %c0_75] : memref<1x4xf32, #tpu.memory_space<vmem>>, vector<1x4xf32>
    %83 = vector.broadcast %82 : vector<1x4xf32> to vector<288x4xf32>
    %84 = arith.addf %81, %83 : vector<288x4xf32>
    %cst_76 = arith.constant 0.000000e+00 : f32
    %85 = vector.broadcast %cst_76 : f32 to vector<288x4xf32>
    %86 = arith.maximumf %84, %85 : vector<288x4xf32>
    %cst_77 = arith.constant 0.000000e+00 : f32
    %87 = vector.broadcast %cst_77 : f32 to vector<18x1x4xf32>
    %c0_78 = arith.constant 0 : index
    %c0_79 = arith.constant 0 : index
    %c0_80 = arith.constant 0 : index
    %88 = vector.load %arg11[%c0_78, %c0_79, %c0_80] : memref<18x18x4xf32, #tpu.memory_space<vmem>>, vector<18x1x4xf32>
    tpu.vector_store %arg11[%c0_78, %c0_79, %c0_80], %87 {strides = array<i32>} : memref<18x18x4xf32, #tpu.memory_space<vmem>>, vector<18x1x4xf32>,
    %c0_81 = arith.constant 0 : index
    %c17_82 = arith.constant 17 : index
    %c0_83 = arith.constant 0 : index
    %89 = vector.load %arg11[%c0_81, %c17_82, %c0_83] : memref<18x18x4xf32, #tpu.memory_space<vmem>>, vector<18x1x4xf32>
    tpu.vector_store %arg11[%c0_81, %c17_82, %c0_83], %87 {strides = array<i32>} : memref<18x18x4xf32, #tpu.memory_space<vmem>>, vector<18x1x4xf32>,
    %90 = vector.shape_cast %86 : vector<288x4xf32> to vector<18x16x4xf32>
    %c0_84 = arith.constant 0 : index
    %c1_85 = arith.constant 1 : index
    %c0_86 = arith.constant 0 : index
    %91 = vector.load %arg11[%c0_84, %c1_85, %c0_86] : memref<18x18x4xf32, #tpu.memory_space<vmem>>, vector<18x16x4xf32>
    tpu.vector_store %arg11[%c0_84, %c1_85, %c0_86], %90 {strides = array<i32>} : memref<18x18x4xf32, #tpu.memory_space<vmem>>, vector<18x16x4xf32>,
    %c0_i32_87 = arith.constant 0 : i32
    %92 = arith.cmpi eq, %arg1, %c0_i32_87 : i32
    %93 = arith.extui %92 : i1 to i32
    %c0_i32_88 = arith.constant 0 : i32
    %94 = arith.cmpi ne, %93, %c0_i32_88 : i32
    scf.if %94 {
      %cst_166 = arith.constant 0.000000e+00 : f32
      %174 = vector.broadcast %cst_166 : f32 to vector<1x16x4xf32>
      %c0_167 = arith.constant 0 : index
      %c1_168 = arith.constant 1 : index
      %c0_169 = arith.constant 0 : index
      %175 = vector.load %arg11[%c0_167, %c1_168, %c0_169] : memref<18x18x4xf32, #tpu.memory_space<vmem>>, vector<1x16x4xf32>
      tpu.vector_store %arg11[%c0_167, %c1_168, %c0_169], %174 {strides = array<i32>} : memref<18x18x4xf32, #tpu.memory_space<vmem>>, vector<1x16x4xf32>,
    } else {
    }
    %c0_i32_89 = arith.constant 0 : i32
    %95 = arith.cmpi eq, %arg1, %c0_i32_89 : i32
    %96 = arith.extui %95 : i1 to i32
    %c0_i32_90 = arith.constant 0 : i32
    %97 = arith.cmpi ne, %96, %c0_i32_90 : i32
    scf.if %97 {
      %cst_166 = arith.constant 0.000000e+00 : f32
      %174 = vector.broadcast %cst_166 : f32 to vector<1x16x4xf32>
      %c17_167 = arith.constant 17 : index
      %c1_168 = arith.constant 1 : index
      %c0_169 = arith.constant 0 : index
      %175 = vector.load %arg11[%c17_167, %c1_168, %c0_169] : memref<18x18x4xf32, #tpu.memory_space<vmem>>, vector<1x16x4xf32>
      tpu.vector_store %arg11[%c17_167, %c1_168, %c0_169], %174 {strides = array<i32>} : memref<18x18x4xf32, #tpu.memory_space<vmem>>, vector<1x16x4xf32>,
    } else {
    }
    %cst_91 = arith.constant 0.000000e+00 : f32
    %98 = vector.broadcast %cst_91 : f32 to vector<256x4xf32>
    %c0_92 = arith.constant 0 : index
    %c0_93 = arith.constant 0 : index
    %c0_94 = arith.constant 0 : index
    %99 = vector.load %arg11[%c0_92, %c0_93, %c0_94] : memref<18x18x4xf32, #tpu.memory_space<vmem>>, vector<16x16x4xf32>
    %100 = vector.shape_cast %99 : vector<16x16x4xf32> to vector<256x4xf32>
    %101 = arith.truncf %100 : vector<256x4xf32> to vector<256x4xbf16>
    %c0_95 = arith.constant 0 : index
    %c0_96 = arith.constant 0 : index
    %c0_97 = arith.constant 0 : index
    %102 = vector.load %arg7[%c0_95, %c0_96, %c0_97] : memref<9x4x4xbf16, #tpu.memory_space<vmem>>, vector<1x4x4xbf16>
    %103 = vector.shape_cast %102 : vector<1x4x4xbf16> to vector<4x4xbf16>
    %cst_98 = arith.constant dense<0.000000e+00> : vector<256x4xf32>
    %104 = tpu.matmul %101, %103, %cst_98 {dimension_numbers = #tpu.dot_dimension_numbers<[1], [0], [0], [1], [0, 0, 1, 1], [], []>} : vector<256x4xbf16>, vector<4x4xbf16>, vector<256x4xf32> -> vector<256x4xf32>
    %105 = arith.addf %98, %104 : vector<256x4xf32>
    %c0_99 = arith.constant 0 : index
    %c1_100 = arith.constant 1 : index
    %c0_101 = arith.constant 0 : index
    %106 = vector.load %arg11[%c0_99, %c1_100, %c0_101] : memref<18x18x4xf32, #tpu.memory_space<vmem>>, vector<16x16x4xf32>
    %107 = vector.shape_cast %106 : vector<16x16x4xf32> to vector<256x4xf32>
    %108 = arith.truncf %107 : vector<256x4xf32> to vector<256x4xbf16>
    %c1_102 = arith.constant 1 : index
    %c0_103 = arith.constant 0 : index
    %c0_104 = arith.constant 0 : index
    %109 = vector.load %arg7[%c1_102, %c0_103, %c0_104] : memref<9x4x4xbf16, #tpu.memory_space<vmem>>, vector<1x4x4xbf16>
    %110 = vector.shape_cast %109 : vector<1x4x4xbf16> to vector<4x4xbf16>
    %cst_105 = arith.constant dense<0.000000e+00> : vector<256x4xf32>
    %111 = tpu.matmul %108, %110, %cst_105 {dimension_numbers = #tpu.dot_dimension_numbers<[1], [0], [0], [1], [0, 0, 1, 1], [], []>} : vector<256x4xbf16>, vector<4x4xbf16>, vector<256x4xf32> -> vector<256x4xf32>
    %112 = arith.addf %105, %111 : vector<256x4xf32>
    %c0_106 = arith.constant 0 : index
    %c2_107 = arith.constant 2 : index
    %c0_108 = arith.constant 0 : index
    %113 = vector.load %arg11[%c0_106, %c2_107, %c0_108] : memref<18x18x4xf32, #tpu.memory_space<vmem>>, vector<16x16x4xf32>
    %114 = vector.shape_cast %113 : vector<16x16x4xf32> to vector<256x4xf32>
    %115 = arith.truncf %114 : vector<256x4xf32> to vector<256x4xbf16>
    %c2_109 = arith.constant 2 : index
    %c0_110 = arith.constant 0 : index
    %c0_111 = arith.constant 0 : index
    %116 = vector.load %arg7[%c2_109, %c0_110, %c0_111] : memref<9x4x4xbf16, #tpu.memory_space<vmem>>, vector<1x4x4xbf16>
    %117 = vector.shape_cast %116 : vector<1x4x4xbf16> to vector<4x4xbf16>
    %cst_112 = arith.constant dense<0.000000e+00> : vector<256x4xf32>
    %118 = tpu.matmul %115, %117, %cst_112 {dimension_numbers = #tpu.dot_dimension_numbers<[1], [0], [0], [1], [0, 0, 1, 1], [], []>} : vector<256x4xbf16>, vector<4x4xbf16>, vector<256x4xf32> -> vector<256x4xf32>
    %119 = arith.addf %112, %118 : vector<256x4xf32>
    %c1_113 = arith.constant 1 : index
    %c0_114 = arith.constant 0 : index
    %c0_115 = arith.constant 0 : index
    %120 = vector.load %arg11[%c1_113, %c0_114, %c0_115] : memref<18x18x4xf32, #tpu.memory_space<vmem>>, vector<16x16x4xf32>
    %121 = vector.shape_cast %120 : vector<16x16x4xf32> to vector<256x4xf32>
    %122 = arith.truncf %121 : vector<256x4xf32> to vector<256x4xbf16>
    %c3_116 = arith.constant 3 : index
    %c0_117 = arith.constant 0 : index
    %c0_118 = arith.constant 0 : index
    %123 = vector.load %arg7[%c3_116, %c0_117, %c0_118] : memref<9x4x4xbf16, #tpu.memory_space<vmem>>, vector<1x4x4xbf16>
    %124 = vector.shape_cast %123 : vector<1x4x4xbf16> to vector<4x4xbf16>
    %cst_119 = arith.constant dense<0.000000e+00> : vector<256x4xf32>
    %125 = tpu.matmul %122, %124, %cst_119 {dimension_numbers = #tpu.dot_dimension_numbers<[1], [0], [0], [1], [0, 0, 1, 1], [], []>} : vector<256x4xbf16>, vector<4x4xbf16>, vector<256x4xf32> -> vector<256x4xf32>
    %126 = arith.addf %119, %125 : vector<256x4xf32>
    %c1_120 = arith.constant 1 : index
    %c1_121 = arith.constant 1 : index
    %c0_122 = arith.constant 0 : index
    %127 = vector.load %arg11[%c1_120, %c1_121, %c0_122] : memref<18x18x4xf32, #tpu.memory_space<vmem>>, vector<16x16x4xf32>
    %128 = vector.shape_cast %127 : vector<16x16x4xf32> to vector<256x4xf32>
    %129 = arith.truncf %128 : vector<256x4xf32> to vector<256x4xbf16>
    %c4_123 = arith.constant 4 : index
    %c0_124 = arith.constant 0 : index
    %c0_125 = arith.constant 0 : index
    %130 = vector.load %arg7[%c4_123, %c0_124, %c0_125] : memref<9x4x4xbf16, #tpu.memory_space<vmem>>, vector<1x4x4xbf16>
    %131 = vector.shape_cast %130 : vector<1x4x4xbf16> to vector<4x4xbf16>
    %cst_126 = arith.constant dense<0.000000e+00> : vector<256x4xf32>
    %132 = tpu.matmul %129, %131, %cst_126 {dimension_numbers = #tpu.dot_dimension_numbers<[1], [0], [0], [1], [0, 0, 1, 1], [], []>} : vector<256x4xbf16>, vector<4x4xbf16>, vector<256x4xf32> -> vector<256x4xf32>
    %133 = arith.addf %126, %132 : vector<256x4xf32>
    %c1_127 = arith.constant 1 : index
    %c2_128 = arith.constant 2 : index
    %c0_129 = arith.constant 0 : index
    %134 = vector.load %arg11[%c1_127, %c2_128, %c0_129] : memref<18x18x4xf32, #tpu.memory_space<vmem>>, vector<16x16x4xf32>
    %135 = vector.shape_cast %134 : vector<16x16x4xf32> to vector<256x4xf32>
    %136 = arith.truncf %135 : vector<256x4xf32> to vector<256x4xbf16>
    %c5_130 = arith.constant 5 : index
    %c0_131 = arith.constant 0 : index
    %c0_132 = arith.constant 0 : index
    %137 = vector.load %arg7[%c5_130, %c0_131, %c0_132] : memref<9x4x4xbf16, #tpu.memory_space<vmem>>, vector<1x4x4xbf16>
    %138 = vector.shape_cast %137 : vector<1x4x4xbf16> to vector<4x4xbf16>
    %cst_133 = arith.constant dense<0.000000e+00> : vector<256x4xf32>
    %139 = tpu.matmul %136, %138, %cst_133 {dimension_numbers = #tpu.dot_dimension_numbers<[1], [0], [0], [1], [0, 0, 1, 1], [], []>} : vector<256x4xbf16>, vector<4x4xbf16>, vector<256x4xf32> -> vector<256x4xf32>
    %140 = arith.addf %133, %139 : vector<256x4xf32>
    %c2_134 = arith.constant 2 : index
    %c0_135 = arith.constant 0 : index
    %c0_136 = arith.constant 0 : index
    %141 = vector.load %arg11[%c2_134, %c0_135, %c0_136] : memref<18x18x4xf32, #tpu.memory_space<vmem>>, vector<16x16x4xf32>
    %142 = vector.shape_cast %141 : vector<16x16x4xf32> to vector<256x4xf32>
    %143 = arith.truncf %142 : vector<256x4xf32> to vector<256x4xbf16>
    %c6_137 = arith.constant 6 : index
    %c0_138 = arith.constant 0 : index
    %c0_139 = arith.constant 0 : index
    %144 = vector.load %arg7[%c6_137, %c0_138, %c0_139] : memref<9x4x4xbf16, #tpu.memory_space<vmem>>, vector<1x4x4xbf16>
    %145 = vector.shape_cast %144 : vector<1x4x4xbf16> to vector<4x4xbf16>
    %cst_140 = arith.constant dense<0.000000e+00> : vector<256x4xf32>
    %146 = tpu.matmul %143, %145, %cst_140 {dimension_numbers = #tpu.dot_dimension_numbers<[1], [0], [0], [1], [0, 0, 1, 1], [], []>} : vector<256x4xbf16>, vector<4x4xbf16>, vector<256x4xf32> -> vector<256x4xf32>
    %147 = arith.addf %140, %146 : vector<256x4xf32>
    %c2_141 = arith.constant 2 : index
    %c1_142 = arith.constant 1 : index
    %c0_143 = arith.constant 0 : index
    %148 = vector.load %arg11[%c2_141, %c1_142, %c0_143] : memref<18x18x4xf32, #tpu.memory_space<vmem>>, vector<16x16x4xf32>
    %149 = vector.shape_cast %148 : vector<16x16x4xf32> to vector<256x4xf32>
    %150 = arith.truncf %149 : vector<256x4xf32> to vector<256x4xbf16>
    %c7_144 = arith.constant 7 : index
    %c0_145 = arith.constant 0 : index
    %c0_146 = arith.constant 0 : index
    %151 = vector.load %arg7[%c7_144, %c0_145, %c0_146] : memref<9x4x4xbf16, #tpu.memory_space<vmem>>, vector<1x4x4xbf16>
    %152 = vector.shape_cast %151 : vector<1x4x4xbf16> to vector<4x4xbf16>
    %cst_147 = arith.constant dense<0.000000e+00> : vector<256x4xf32>
    %153 = tpu.matmul %150, %152, %cst_147 {dimension_numbers = #tpu.dot_dimension_numbers<[1], [0], [0], [1], [0, 0, 1, 1], [], []>} : vector<256x4xbf16>, vector<4x4xbf16>, vector<256x4xf32> -> vector<256x4xf32>
    %154 = arith.addf %147, %153 : vector<256x4xf32>
    %c2_148 = arith.constant 2 : index
    %c2_149 = arith.constant 2 : index
    %c0_150 = arith.constant 0 : index
    %155 = vector.load %arg11[%c2_148, %c2_149, %c0_150] : memref<18x18x4xf32, #tpu.memory_space<vmem>>, vector<16x16x4xf32>
    %156 = vector.shape_cast %155 : vector<16x16x4xf32> to vector<256x4xf32>
    %157 = arith.truncf %156 : vector<256x4xf32> to vector<256x4xbf16>
    %c8_151 = arith.constant 8 : index
    %c0_152 = arith.constant 0 : index
    %c0_153 = arith.constant 0 : index
    %158 = vector.load %arg7[%c8_151, %c0_152, %c0_153] : memref<9x4x4xbf16, #tpu.memory_space<vmem>>, vector<1x4x4xbf16>
    %159 = vector.shape_cast %158 : vector<1x4x4xbf16> to vector<4x4xbf16>
    %cst_154 = arith.constant dense<0.000000e+00> : vector<256x4xf32>
    %160 = tpu.matmul %157, %159, %cst_154 {dimension_numbers = #tpu.dot_dimension_numbers<[1], [0], [0], [1], [0, 0, 1, 1], [], []>} : vector<256x4xbf16>, vector<4x4xbf16>, vector<256x4xf32> -> vector<256x4xf32>
    %161 = arith.addf %154, %160 : vector<256x4xf32>
    %c0_155 = arith.constant 0 : index
    %c0_156 = arith.constant 0 : index
    %162 = vector.load %arg8[%c0_155, %c0_156] : memref<1x4xf32, #tpu.memory_space<vmem>>, vector<1x4xf32>
    %163 = vector.broadcast %162 : vector<1x4xf32> to vector<256x4xf32>
    %164 = arith.addf %161, %163 : vector<256x4xf32>
    %165 = vector.shape_cast %164 : vector<256x4xf32> to vector<16x16x4xf32>
    %c0_157 = arith.constant 0 : index
    %c0_158 = arith.constant 0 : index
    %c0_159 = arith.constant 0 : index
    %c0_160 = arith.constant 0 : index
    %166 = vector.load %arg2[%c0_157, %c0_158, %c0_159, %c0_160] : memref<1x16x16x4xf32, #tpu.memory_space<vmem>>, vector<1x16x16x4xf32>
    %167 = vector.shape_cast %166 : vector<1x16x16x4xf32> to vector<16x16x4xf32>
    %168 = arith.addf %165, %167 : vector<16x16x4xf32>
    %cst_161 = arith.constant 0.000000e+00 : f32
    %169 = vector.broadcast %cst_161 : f32 to vector<16x16x4xf32>
    %170 = arith.maximumf %168, %169 : vector<16x16x4xf32>
    %c0_162 = arith.constant 0 : index
    %c0_163 = arith.constant 0 : index
    %c0_164 = arith.constant 0 : index
    %c0_165 = arith.constant 0 : index
    %171 = vector.load %arg9[%c0_162, %c0_163, %c0_164, %c0_165] : memref<1x16x16x4xf32, #tpu.memory_space<vmem>>, vector<1x16x16x4xf32>
    %172 = vector.shape_cast %171 : vector<1x16x16x4xf32> to vector<16x16x4xf32>
    %173 = vector.shape_cast %170 : vector<16x16x4xf32> to vector<1x16x16x4xf32>
    tpu.vector_store %arg9[%c0_162, %c0_163, %c0_164, %c0_165], %173 {strides = array<i32>} : memref<1x16x16x4xf32, #tpu.memory_space<vmem>>, vector<1x16x16x4xf32>,
    return
  }
  func.func @transform_0(%arg0: i32, %arg1: i32) -> (i32, i32, i32, i32) {
    %c0_i32 = arith.constant 0 : i32
    %c0_i32_0 = arith.constant 0 : i32
    %c0_i32_1 = arith.constant 0 : i32
    return %arg0, %arg1, %c0_i32, %c0_i32_0 : i32, i32, i32, i32
  }
  func.func @transform_1(%arg0: i32, %arg1: i32) -> (i32, i32, i32, i32) {
    %c8_i32 = arith.constant 8 : i32
    %0 = arith.muli %arg1, %c8_i32 : i32
    %c1_i32 = arith.constant 1 : i32
    %1 = arith.subi %0, %c1_i32 : i32
    %c0_i32 = arith.constant 0 : i32
    %2 = arith.maxsi %1, %c0_i32 : i32
    %c0_i32_0 = arith.constant 0 : i32
    %c0_i32_1 = arith.constant 0 : i32
    %c0_i32_2 = arith.constant 0 : i32
    return %arg0, %2, %c0_i32_0, %c0_i32_1 : i32, i32, i32, i32
  }
  func.func @transform_2(%arg0: i32, %arg1: i32) -> (i32, i32, i32, i32) {
    %c8_i32 = arith.constant 8 : i32
    %0 = arith.muli %arg1, %c8_i32 : i32
    %c8_i32_0 = arith.constant 8 : i32
    %1 = arith.addi %0, %c8_i32_0 : i32
    %c7_i32 = arith.constant 7 : i32
    %2 = arith.minsi %1, %c7_i32 : i32
    %c0_i32 = arith.constant 0 : i32
    %c0_i32_1 = arith.constant 0 : i32
    %c0_i32_2 = arith.constant 0 : i32
    return %arg0, %2, %c0_i32, %c0_i32_1 : i32, i32, i32, i32
  }
  func.func @transform_3(%arg0: i32, %arg1: i32) -> (i32, i32, i32) {
    %c0_i32 = arith.constant 0 : i32
    %c0_i32_0 = arith.constant 0 : i32
    %c0_i32_1 = arith.constant 0 : i32
    %c0_i32_2 = arith.constant 0 : i32
    return %c0_i32, %c0_i32_0, %c0_i32_1 : i32, i32, i32
  }
  func.func @transform_4(%arg0: i32, %arg1: i32) -> (i32, i32) {
    %c0_i32 = arith.constant 0 : i32
    %c0_i32_0 = arith.constant 0 : i32
    %c0_i32_1 = arith.constant 0 : i32
    return %c0_i32, %c0_i32_0 : i32, i32
  }
  func.func @transform_5(%arg0: i32, %arg1: i32) -> (i32, i32, i32) {
    %c0_i32 = arith.constant 0 : i32
    %c0_i32_0 = arith.constant 0 : i32
    %c0_i32_1 = arith.constant 0 : i32
    %c0_i32_2 = arith.constant 0 : i32
    return %c0_i32, %c0_i32_0, %c0_i32_1 : i32, i32, i32
  }
  func.func @transform_6(%arg0: i32, %arg1: i32) -> (i32, i32) {
    %c0_i32 = arith.constant 0 : i32
    %c0_i32_0 = arith.constant 0 : i32
    %c0_i32_1 = arith.constant 0 : i32
    return %c0_i32, %c0_i32_0 : i32, i32
  }
  func.func @transform_7(%arg0: i32, %arg1: i32) -> (i32, i32, i32, i32) {
    %c0_i32 = arith.constant 0 : i32
    %c0_i32_0 = arith.constant 0 : i32
    %c0_i32_1 = arith.constant 0 : i32
    return %arg0, %arg1, %c0_i32, %c0_i32_0 : i32, i32, i32, i32
  }
}

</mosaic_0001>

<bundles_post_ra>
// kernel: basic_block_forward_nhwc.1
= control target key start
LH: loop header
LB: loop body
LE: loop exit
PB: predicated region body
PF: predicated region fallthrough
CT: control target
= control target key end

     0   :  { %s8487_s24 = smov 0   ;;  %s8489_s1 = smov 0   ;;  %s9941_s0 = inlined_call_operand.vmem [shape: f32[2,16,16,4], index: 0, kind: input, shape index: {}, may-alias: {0,1,2}]   ;;  %s9942_s1 = inlined_call_operand.vmem [shape: f32[2,16,16,4], index: 1, kind: input, shape index: {}, may-alias: {0,1,2}]   ;;  %s9943_s2 = inlined_call_operand.vmem [shape: f32[2,16,16,4], index: 2, kind: input, shape index: {}, may-alias: {0,1,2}]   ;;  %s9944_s3 = inlined_call_operand.vmem [shape: bf16[9,4,4], index: 3, kind: input, shape index: {}]   ;;  %s9945_s4 = inlined_call_operand.vmem [shape: f32[1,4], index: 4, kind: input, shape index: {}]   ;;  %s9946_s5 = inlined_call_operand.vmem [shape: bf16[9,4,4], index: 5, kind: input, shape index: {}]   ;;  %s9947_s6 = inlined_call_operand.vmem [shape: f32[1,4], index: 6, kind: input, shape index: {}]   ;;  %s9948_s7 = inlined_call_operand.vmem [shape: f32[2,16,16,4], index: 7, kind: output, shape index: {}]  }
   0x1   :  { %s8491_s2 = smov 0  }
   0x2 LB: > { %s29_s25 = sadd.s32 1, %s8440_s1  ;;  %p6520_p0 = scmp.ge.s32.totalorder %s8444_s2, 1  ;;  %s8444_s2 = sphi %s8491_s2, %s17_s2   ;;  %s8440_s1 = sphi %s8489_s1, %s9950_s1   ;;  %s8436_s24 = sphi %s8487_s24, %s9949_s24  }
   0x3   : > { %p31_p1 = scmp.ge.s32.totalorder %s29_s25, 2  ;;  %p327_p2 = scmp.lt.s32.totalorder %s8444_s2, 3 }
   0x5   : > { %s9952_s25 = smov (%p31_p1, %s29_s25), 0  ;;  %p328_p3 = pnand %p6520_p0, %p327_p2 }
   0x6   : > { %v6529_v0 = vld [vmem:[%s9944_s3 + $0x2] sm:$0x3] (!%p328_p3)  ;;  %vm771_vm0 = vcmask (!%p328_p3), 1041408   ;;  %vm532_vm1 = vcmask (!%p328_p3), 31744   ;;  %p398_p4 = scmp.lt.s32.totalorder (!%p328_p3), %s8436_s24, 1  ;;  %v8446_v2 = vmov (!%p328_p3), 0.0  }
   0x7   : > { %331 = sbr.rel (%p328_p3) target bundleno = 1618 (0x652), region = 48  ;;  %8378 = vmatprep.subr.msk.bf16.mxu0 (!%p328_p3), %vm771_vm0, %v6529_v0  ;;  %v8510_v1 = vsel (!%p328_p3), %vm771_vm0, %v6529_v0, 0  ;;  %581 = vst.msk [vmem:[#allocation2 + $0x1] sm:$0xff] (!%p328_p3), %vm532_vm1, %v8446_v2  ;;  %582 = vst.msk [vmem:[#allocation2 + $0x9] sm:$0xff] (!%p328_p3), %vm532_vm1, %v8446_v2  ;;  %v8531_v3 = vld [vmem:[%s9944_s3] sm:$0x3] (!%p328_p3)  ;;  %8379 = vmatprep.subr.msk.bf16.mxu1 (!%p328_p3), %vm771_vm0, %v6529_v0 }
   0x8   : > { %583 = vst.msk [vmem:[#allocation2 + $0x19] sm:$0xff] (!%p328_p3), %vm532_vm1, %v8446_v2  ;;  %584 = vst.msk [vmem:[#allocation2 + $0x21] sm:$0xff] (!%p328_p3), %vm532_vm1, %v8446_v2  ;;  %vm458_vm2 = vcmask (!%p328_p3), 24576   ;;  %7185 = vmatpush3.bf16.msra.mxu0 (!%p328_p3), %v8510_v1  ;;  %7833 = vmatpush3.bf16.msra.mxu1 (!%p328_p3), %v8510_v1  ;;  %v8718_v17 = vld [vmem:[%s9944_s3 + $0x4] sm:$0x3] (!%p328_p3)  ;;  %v1007_v19 = vsel (!%p328_p3), %vm771_vm0, %v8531_v3, 0 }
   0x9   : > { %602 = vst.msk [vmem:[#allocation2 + $0x1b1] sm:$0xff] (!%p328_p3), %vm532_vm1, %v8446_v2  ;;  %603 = vst.msk [vmem:[#allocation2 + $0x1b9] sm:$0xff] (!%p328_p3), %vm532_vm1, %v8446_v2  ;;  %8380 = vmatprep.subr.msk.bf16.mxu0 (!%p328_p3), %vm771_vm0, %v8531_v3 }
   0xa   : > { %604 = vst.msk [vmem:[#allocation2 + $0x1c9] sm:$0xff] (!%p328_p3), %vm532_vm1, %v8446_v2  ;;  %605 = vst.msk [vmem:[#allocation2 + $0x1d1] sm:$0xff] (!%p328_p3), %vm532_vm1, %v8446_v2 }
   0xb   : > { %459 = vst.msk [vmem:[#allocation2] sm:$0x1] (!%p328_p3), %vm458_vm2, %v8446_v2  ;;  %460 = vst.msk [vmem:[#allocation2 + $0x18] sm:$0x1] (!%p328_p3), %vm458_vm2, %v8446_v2 }
   0xc   : > { %461 = vst.msk [vmem:[#allocation2 + $0x30] sm:$0x1] (!%p328_p3), %vm458_vm2, %v8446_v2  ;;  %462 = vst.msk [vmem:[#allocation2 + $0x48] sm:$0x1] (!%p328_p3), %vm458_vm2, %v8446_v2 }
   0xd   : > { %463 = vst.msk [vmem:[#allocation2 + $0x60] sm:$0x1] (!%p328_p3), %vm458_vm2, %v8446_v2  ;;  %464 = vst.msk [vmem:[#allocation2 + $0x78] sm:$0x1] (!%p328_p3), %vm458_vm2, %v8446_v2 }
   0xe   : > { %s9954_s24 = smov (!%p398_p4, %s8436_s24), 1  ;;  %465 = vst.msk [vmem:[#allocation2 + $0x90] sm:$0x1] %vm458_vm2, %v8446_v2  ;;  %466 = vst.msk [vmem:[#allocation2 + $0xa8] sm:$0x1] %vm458_vm2, %v8446_v2  ;;  %v661_v10 = vld [vmem:[#allocation2 + $0x1] sm:$0xff] }
   0xf   : > { %467 = vst.msk [vmem:[#allocation2 + $0xc0] sm:$0x1] %vm458_vm2, %v8446_v2  ;;  %468 = vst.msk [vmem:[#allocation2 + $0xd8] sm:$0x1] %vm458_vm2, %v8446_v2  ;;  %s6855_s30 = sshll.u32 %s9954_s24, 8  ;;  %v662_v11 = vld [vmem:[#allocation2 + $0x9] sm:$0xff] }
  0x10   : > { %469 = vst.msk [vmem:[#allocation2 + $0xf0] sm:$0x1] %vm458_vm2, %v8446_v2  ;;  %470 = vst.msk [vmem:[#allocation2 + $0x108] sm:$0x1] %vm458_vm2, %v8446_v2  ;;  %s8699_s10 = scalar_lea.vmem %s9941_s0, %s6855_s30  ;;  %v663_v12 = vld [vmem:[#allocation2 + $0x19] sm:$0xff]  ;;  %v697_v13 = vpack.c.bf16 %v662_v11, %v661_v10  ;;  %v664_v14 = vld [vmem:[#allocation2 + $0x21] sm:$0xff]  ;;  %s9809_s11 = scalar_lea.vmem %s9948_s7, %s6855_s30 }
  0x11   : > { %471 = vst.msk [vmem:[#allocation2 + $0x120] sm:$0x1] %vm458_vm2, %v8446_v2  ;;  %472 = vst.msk [vmem:[#allocation2 + $0x138] sm:$0x1] %vm458_vm2, %v8446_v2  ;;  %v499_v4 = vld [vmem:[%s8699_s10] sm:$0xff]  ;;  %v500_v5 = vld [vmem:[%s8699_s10 + $0x8] sm:$0xff]  ;;  %v8720_v18 = vpack.c.bf16 %v664_v14, %v663_v12 }
  0x12   : > { %473 = vst.msk [vmem:[#allocation2 + $0x150] sm:$0x1] %vm458_vm2, %v8446_v2  ;;  %474 = vst.msk [vmem:[#allocation2 + $0x168] sm:$0x1] %vm458_vm2, %v8446_v2  ;;  %v501_v6 = vld [vmem:[%s8699_s10 + $0x10] sm:$0xff]  ;;  %v502_v7 = vld [vmem:[%s8699_s10 + $0x18] sm:$0xff]  ;;  %7186 = vmatprep.mubr.msk.bf16.mxu0 %vm532_vm1, %v697_v13 }
  0x13   : > { %475 = vst.msk [vmem:[#allocation2 + $0x180] sm:$0x1] %vm458_vm2, %v8446_v2  ;;  %476 = vst.msk [vmem:[#allocation2 + $0x198] sm:$0x1] %vm458_vm2, %v8446_v2  ;;  %v503_v8 = vld [vmem:[%s8699_s10 + $0x20] sm:$0xff]  ;;  %v504_v9 = vld [vmem:[%s8699_s10 + $0x28] sm:$0xff]  ;;  %7187 = vmatmul.mubr.msk.bf16.vlgmr.msra.gmra.mrb[0].mxu0 %vm532_vm1, %v8720_v18 }
  0x14   : > { %477 = vst.msk [vmem:[#allocation2 + $0x1b0] sm:$0x1] %vm458_vm2, %v8446_v2  ;;  %478 = vst.msk [vmem:[#allocation2 + $0x1c8] sm:$0x1] %vm458_vm2, %v8446_v2  ;;  %v505_v15 = vld [vmem:[%s8699_s10 + $0x30] sm:$0xff]  ;;  %v506_v16 = vld [vmem:[%s8699_s10 + $0x38] sm:$0xff]  ;;  %7223 = vmatpush3.bf16.msra.mxu0 %v1007_v19 }
  0x15   : > { %479 = vst.msk [vmem:[#allocation2 + $0x11] sm:$0x1] %vm458_vm2, %v8446_v2  ;;  %480 = vst.msk [vmem:[#allocation2 + $0x29] sm:$0x1] %vm458_vm2, %v8446_v2  ;;  %v507_v20 = vld [vmem:[%s8699_s10 + $0x40] sm:$0xff]  ;;  %v508_v21 = vld [vmem:[%s8699_s10 + $0x48] sm:$0xff]  ;;  %8381 = vmatprep.subr.msk.bf16.mxu0 %vm771_vm0, %v8718_v17 }
  0x16   : > { %481 = vst.msk [vmem:[#allocation2 + $0x41] sm:$0x1] %vm458_vm2, %v8446_v2  ;;  %482 = vst.msk [vmem:[#allocation2 + $0x59] sm:$0x1] %vm458_vm2, %v8446_v2  ;;  %v509_v22 = vld [vmem:[%s8699_s10 + $0x50] sm:$0xff]  ;;  %v510_v23 = vld [vmem:[%s8699_s10 + $0x58] sm:$0xff] }
  0x17   : > { %483 = vst.msk [vmem:[#allocation2 + $0x71] sm:$0x1] %vm458_vm2, %v8446_v2  ;;  %484 = vst.msk [vmem:[#allocation2 + $0x89] sm:$0x1] %vm458_vm2, %v8446_v2  ;;  %v511_v24 = vld [vmem:[%s8699_s10 + $0x60] sm:$0xff]  ;;  %v512_v25 = vld [vmem:[%s8699_s10 + $0x68] sm:$0xff] }
  0x18   : > { %485 = vst.msk [vmem:[#allocation2 + $0xa1] sm:$0x1] %vm458_vm2, %v8446_v2  ;;  %486 = vst.msk [vmem:[#allocation2 + $0xb9] sm:$0x1] %vm458_vm2, %v8446_v2  ;;  %v513_v26 = vld [vmem:[%s8699_s10 + $0x70] sm:$0xff]  ;;  %v514_v27 = vld [vmem:[%s8699_s10 + $0x78] sm:$0xff] }
  0x19   : > { %487 = vst.msk [vmem:[#allocation2 + $0xd1] sm:$0x1] %vm458_vm2, %v8446_v2  ;;  %488 = vst.msk [vmem:[#allocation2 + $0xe9] sm:$0x1] %vm458_vm2, %v8446_v2  ;;  %v515_v42 = vld [vmem:[%s8699_s10 + $0x80] sm:$0xff]  ;;  %v516_v44 = vld [vmem:[%s8699_s10 + $0x88] sm:$0xff] }
  0x1a   : > { %489 = vst.msk [vmem:[#allocation2 + $0x101] sm:$0x1] %vm458_vm2, %v8446_v2  ;;  %490 = vst.msk [vmem:[#allocation2 + $0x119] sm:$0x1] %vm458_vm2, %v8446_v2  ;;  %v517_v45 = vld [vmem:[%s8699_s10 + $0x90] sm:$0xff]  ;;  %v518_v46 = vld [vmem:[%s8699_s10 + $0x98] sm:$0xff] }
  0x1b   : > { %491 = vst.msk [vmem:[#allocation2 + $0x131] sm:$0x1] %vm458_vm2, %v8446_v2  ;;  %492 = vst.msk [vmem:[#allocation2 + $0x149] sm:$0x1] %vm458_vm2, %v8446_v2  ;;  %v519_v47 = vld [vmem:[%s8699_s10 + $0xa0] sm:$0xff]  ;;  %v520_v48 = vld [vmem:[%s8699_s10 + $0xa8] sm:$0xff] }
  0x1c   : > { %493 = vst.msk [vmem:[#allocation2 + $0x161] sm:$0x1] %vm458_vm2, %v8446_v2  ;;  %494 = vst.msk [vmem:[#allocation2 + $0x179] sm:$0x1] %vm458_vm2, %v8446_v2  ;;  %v521_v49 = vld [vmem:[%s8699_s10 + $0xb0] sm:$0xff]  ;;  %v522_v52 = vld [vmem:[%s8699_s10 + $0xb8] sm:$0xff] }
  0x1d   : > { %495 = vst.msk [vmem:[#allocation2 + $0x191] sm:$0x1] %vm458_vm2, %v8446_v2  ;;  %496 = vst.msk [vmem:[#allocation2 + $0x1a9] sm:$0x1] %vm458_vm2, %v8446_v2  ;;  %v523_v53 = vld [vmem:[%s8699_s10 + $0xc0] sm:$0xff]  ;;  %v524_v54 = vld [vmem:[%s8699_s10 + $0xc8] sm:$0xff] }
  0x1e   : > { %497 = vst.msk [vmem:[#allocation2 + $0x1c1] sm:$0x1] %vm458_vm2, %v8446_v2  ;;  %498 = vst.msk [vmem:[#allocation2 + $0x1d9] sm:$0x1] %vm458_vm2, %v8446_v2  ;;  %v525_v55 = vld [vmem:[%s8699_s10 + $0xd0] sm:$0xff]  ;;  %v526_v56 = vld [vmem:[%s8699_s10 + $0xd8] sm:$0xff] }
  0x1f   : > { %3548 = vst.msk [vmem:[#allocation3] sm:$0x1] %vm458_vm2, %v8446_v2  ;;  %3549 = vst.msk [vmem:[#allocation3 + $0x18] sm:$0x1] %vm458_vm2, %v8446_v2  ;;  %v527_v57 = vld [vmem:[%s8699_s10 + $0xe0] sm:$0xff]  ;;  %v528_v58 = vld [vmem:[%s8699_s10 + $0xe8] sm:$0xff] }
  0x20   : > { %3550 = vst.msk [vmem:[#allocation3 + $0x30] sm:$0x1] %vm458_vm2, %v8446_v2  ;;  %3551 = vst.msk [vmem:[#allocation3 + $0x48] sm:$0x1] %vm458_vm2, %v8446_v2  ;;  %v529_v59 = vld [vmem:[%s8699_s10 + $0xf0] sm:$0xff]  ;;  %v530_v60 = vld [vmem:[%s8699_s10 + $0xf8] sm:$0xff] }
  0x21   : > { %3552 = vst.msk [vmem:[#allocation3 + $0x60] sm:$0x1] %vm458_vm2, %v8446_v2  ;;  %3553 = vst.msk [vmem:[#allocation3 + $0x78] sm:$0x1] %vm458_vm2, %v8446_v2  ;;  %v1297_v14 = vsel %vm771_vm0, %v8718_v17, 0 }
  0x22   : > { %3554 = vst.msk [vmem:[#allocation3 + $0x90] sm:$0x1] %vm458_vm2, %v8446_v2  ;;  %3555 = vst.msk [vmem:[#allocation3 + $0xa8] sm:$0x1] %vm458_vm2, %v8446_v2 }
  0x23   : > { %3556 = vst.msk [vmem:[#allocation3 + $0xc0] sm:$0x1] %vm458_vm2, %v8446_v2  ;;  %3557 = vst.msk [vmem:[#allocation3 + $0xd8] sm:$0x1] %vm458_vm2, %v8446_v2 }
  0x24   : > { %3558 = vst.msk [vmem:[#allocation3 + $0xf0] sm:$0x1] %vm458_vm2, %v8446_v2  ;;  %3559 = vst.msk [vmem:[#allocation3 + $0x108] sm:$0x1] %vm458_vm2, %v8446_v2 }
  0x25   : > { %3560 = vst.msk [vmem:[#allocation3 + $0x120] sm:$0x1] %vm458_vm2, %v8446_v2  ;;  %3561 = vst.msk [vmem:[#allocation3 + $0x138] sm:$0x1] %vm458_vm2, %v8446_v2 }
  0x26   : > { %3562 = vst.msk [vmem:[#allocation3 + $0x150] sm:$0x1] %vm458_vm2, %v8446_v2  ;;  %3563 = vst.msk [vmem:[#allocation3 + $0x168] sm:$0x1] %vm458_vm2, %v8446_v2 }
  0x27   : > { %3564 = vst.msk [vmem:[#allocation3 + $0x180] sm:$0x1] %vm458_vm2, %v8446_v2  ;;  %3565 = vst.msk [vmem:[#allocation3 + $0x198] sm:$0x1] %vm458_vm2, %v8446_v2 }
  0x28   : > { %3566 = vst.msk [vmem:[#allocation3 + $0x11] sm:$0x1] %vm458_vm2, %v8446_v2  ;;  %3567 = vst.msk [vmem:[#allocation3 + $0x29] sm:$0x1] %vm458_vm2, %v8446_v2 }
  0x29   : > { %3568 = vst.msk [vmem:[#allocation3 + $0x41] sm:$0x1] %vm458_vm2, %v8446_v2  ;;  %3569 = vst.msk [vmem:[#allocation3 + $0x59] sm:$0x1] %vm458_vm2, %v8446_v2 }
  0x2a   : > { %3570 = vst.msk [vmem:[#allocation3 + $0x71] sm:$0x1] %vm458_vm2, %v8446_v2  ;;  %3571 = vst.msk [vmem:[#allocation3 + $0x89] sm:$0x1] %vm458_vm2, %v8446_v2 }
  0x2b   : > { %3572 = vst.msk [vmem:[#allocation3 + $0xa1] sm:$0x1] %vm458_vm2, %v8446_v2  ;;  %3573 = vst.msk [vmem:[#allocation3 + $0xb9] sm:$0x1] %vm458_vm2, %v8446_v2 }
  0x2c   : > { %3574 = vst.msk [vmem:[#allocation3 + $0xd1] sm:$0x1] %vm458_vm2, %v8446_v2  ;;  %3575 = vst.msk [vmem:[#allocation3 + $0xe9] sm:$0x1] %vm458_vm2, %v8446_v2 }
  0x2d   : > { %3576 = vst.msk [vmem:[#allocation3 + $0x101] sm:$0x1] %vm458_vm2, %v8446_v2  ;;  %3577 = vst.msk [vmem:[#allocation3 + $0x119] sm:$0x1] %vm458_vm2, %v8446_v2 }
  0x2e   : > { %3578 = vst.msk [vmem:[#allocation3 + $0x131] sm:$0x1] %vm458_vm2, %v8446_v2  ;;  %3579 = vst.msk [vmem:[#allocation3 + $0x149] sm:$0x1] %vm458_vm2, %v8446_v2 }
  0x2f   : > { %3580 = vst.msk [vmem:[#allocation3 + $0x161] sm:$0x1] %vm458_vm2, %v8446_v2  ;;  %3581 = vst.msk [vmem:[#allocation3 + $0x179] sm:$0x1] %vm458_vm2, %v8446_v2 }
  0x30   : > { %3582 = vst.msk [vmem:[#allocation3 + $0x191] sm:$0x1] %vm458_vm2, %v8446_v2  ;;  %3583 = vst.msk [vmem:[#allocation3 + $0x1a9] sm:$0x1] %vm458_vm2, %v8446_v2 }
  0x31   : > { %533 = vst.msk [vmem:[#allocation2 + $0x31] sm:$0xff] %vm532_vm1, %v499_v4  ;;  %534 = vst.msk [vmem:[#allocation2 + $0x39] sm:$0xff] %vm532_vm1, %v500_v5  ;;  %v606_v4 = vld [vmem:[#allocation2] sm:$0xff]  ;;  %v607_v5 = vld [vmem:[#allocation2 + $0x8] sm:$0xff] }
  0x32   : > { %535 = vst.msk [vmem:[#allocation2 + $0x49] sm:$0xff] %vm532_vm1, %v501_v6  ;;  %536 = vst.msk [vmem:[#allocation2 + $0x51] sm:$0xff] %vm532_vm1, %v502_v7  ;;  %v642_v7 = vpack.c.bf16 %v607_v5, %v606_v4  ;;  %v1186_v5 = vld [vmem:[#allocation2 + $0x2] sm:$0xff] }
  0x33   : > { %537 = vst.msk [vmem:[#allocation2 + $0x61] sm:$0xff] %vm532_vm1, %v503_v8  ;;  %538 = vst.msk [vmem:[#allocation2 + $0x69] sm:$0xff] %vm532_vm1, %v504_v9  ;;  %v608_v8 = vld [vmem:[#allocation2 + $0x18] sm:$0xff]  ;;  %v609_v9 = vld [vmem:[#allocation2 + $0x20] sm:$0xff] }
  0x34   : > { %539 = vst.msk [vmem:[#allocation2 + $0x79] sm:$0xff] %vm532_vm1, %v505_v15  ;;  %540 = vst.msk [vmem:[#allocation2 + $0x81] sm:$0xff] %vm532_vm1, %v506_v16  ;;  %v8812_v12 = vpack.c.bf16 %v609_v9, %v608_v8  ;;  %v8821_v15 = vld [vmem:[%s9944_s3 + $0x6] sm:$0x3] }
  0x35   : > { %541 = vst.msk [vmem:[#allocation2 + $0x91] sm:$0xff] %vm532_vm1, %v507_v20  ;;  %542 = vst.msk [vmem:[#allocation2 + $0x99] sm:$0xff] %vm532_vm1, %v508_v21 }
  0x36   : > { %543 = vst.msk [vmem:[#allocation2 + $0xa9] sm:$0xff] %vm532_vm1, %v509_v22  ;;  %544 = vst.msk [vmem:[#allocation2 + $0xb1] sm:$0xff] %vm532_vm1, %v510_v23 }
  0x37   : > { %545 = vst.msk [vmem:[#allocation2 + $0xc1] sm:$0xff] %vm532_vm1, %v511_v24  ;;  %546 = vst.msk [vmem:[#allocation2 + $0xc9] sm:$0xff] %vm532_vm1, %v512_v25 }
  0x38   : > { %547 = vst.msk [vmem:[#allocation2 + $0xd9] sm:$0xff] %vm532_vm1, %v513_v26  ;;  %548 = vst.msk [vmem:[#allocation2 + $0xe1] sm:$0xff] %vm532_vm1, %v514_v27  ;;  %v665_v28 = vld [vmem:[#allocation2 + $0x31] sm:$0xff]  ;;  %v666_v29 = vld [vmem:[#allocation2 + $0x39] sm:$0xff] }
  0x39   : > { %v667_v30 = vld [vmem:[#allocation2 + $0x49] sm:$0xff]  ;;  %v8747_v31 = vpack.c.bf16 %v666_v29, %v665_v28  ;;  %v668_v32 = vld [vmem:[#allocation2 + $0x51] sm:$0xff]  ;;  %549 = vst.msk [vmem:[#allocation2 + $0xf1] sm:$0xff] %vm532_vm1, %v515_v42  ;;  %550 = vst.msk [vmem:[#allocation2 + $0xf9] sm:$0xff] %vm532_vm1, %v516_v44 }
  0x3a   : > { %v669_v33 = vld [vmem:[#allocation2 + $0x61] sm:$0xff]  ;;  %v670_v34 = vld [vmem:[#allocation2 + $0x69] sm:$0xff]  ;;  %v8749_v35 = vpack.c.bf16 %v668_v32, %v667_v30  ;;  %551 = vst.msk [vmem:[#allocation2 + $0x109] sm:$0xff] %vm532_vm1, %v517_v45  ;;  %552 = vst.msk [vmem:[#allocation2 + $0x111] sm:$0xff] %vm532_vm1, %v518_v46 }
  0x3b   : > { %7190 = vmatprep.mubr.msk.bf16.mxu0 %vm532_vm1, %v8747_v31  ;;  %v8753_v36 = vpack.c.bf16 %v670_v34, %v669_v33  ;;  %v671_v37 = vld [vmem:[#allocation2 + $0x79] sm:$0xff]  ;;  %v672_v38 = vld [vmem:[#allocation2 + $0x81] sm:$0xff]  ;;  %553 = vst.msk [vmem:[#allocation2 + $0x121] sm:$0xff] %vm532_vm1, %v519_v47  ;;  %554 = vst.msk [vmem:[#allocation2 + $0x129] sm:$0xff] %vm532_vm1, %v520_v48 }
  0x3c   : > { %7191 = vmatmul.mubr.msk.bf16.gmra.mrb[4].mxu0 %vm532_vm1, %v8749_v35  ;;  %v673_v39 = vld [vmem:[#allocation2 + $0x91] sm:$0xff]  ;;  %v674_v40 = vld [vmem:[#allocation2 + $0x99] sm:$0xff]  ;;  %v8759_v41 = vpack.c.bf16 %v672_v38, %v671_v37  ;;  %555 = vst.msk [vmem:[#allocation2 + $0x139] sm:$0xff] %vm532_vm1, %v521_v49  ;;  %556 = vst.msk [vmem:[#allocation2 + $0x141] sm:$0xff] %vm532_vm1, %v522_v52 }
  0x3d   : > { %7194 = vmatprep.mubr.msk.bf16.mxu0 %vm532_vm1, %v8753_v36  ;;  %v8762_v43 = vpack.c.bf16 %v674_v40, %v673_v39  ;;  %v675_v50 = vld [vmem:[#allocation2 + $0xa9] sm:$0xff]  ;;  %v676_v51 = vld [vmem:[#allocation2 + $0xb1] sm:$0xff]  ;;  %557 = vst.msk [vmem:[#allocation2 + $0x151] sm:$0xff] %vm532_vm1, %v523_v53  ;;  %558 = vst.msk [vmem:[#allocation2 + $0x159] sm:$0xff] %vm532_vm1, %v524_v54 }
  0x3e   : > { %559 = vst.msk [vmem:[#allocation2 + $0x169] sm:$0xff] %vm532_vm1, %v525_v55  ;;  %560 = vst.msk [vmem:[#allocation2 + $0x171] sm:$0xff] %vm532_vm1, %v526_v56  ;;  %v677_v61 = vld [vmem:[#allocation2 + $0xc1] sm:$0xff]  ;;  %v678_v62 = vld [vmem:[#allocation2 + $0xc9] sm:$0xff]  ;;  %v8799_v63 = vpack.c.bf16 %v676_v51, %v675_v50 }
  0x3f   : > { %561 = vst.msk [vmem:[#allocation2 + $0x181] sm:$0xff] %vm532_vm1, %v527_v57  ;;  %562 = vst.msk [vmem:[#allocation2 + $0x189] sm:$0xff] %vm532_vm1, %v528_v58  ;;  %v8801_v0 = vpack.c.bf16 %v678_v62, %v677_v61  ;;  %v679_v1 = vld [vmem:[#allocation2 + $0xd9] sm:$0xff]  ;;  %v680_v3 = vld [vmem:[#allocation2 + $0xe1] sm:$0xff] }
  0x40   : > { %563 = vst.msk [vmem:[#allocation2 + $0x199] sm:$0xff] %vm532_vm1, %v529_v59  ;;  %564 = vst.msk [vmem:[#allocation2 + $0x1a1] sm:$0xff] %vm532_vm1, %v530_v60  ;;  %v8807_v6 = vpack.c.bf16 %v680_v3, %v679_v1  ;;  %v610_v10 = vld [vmem:[#allocation2 + $0x30] sm:$0xff]  ;;  %v611_v11 = vld [vmem:[#allocation2 + $0x38] sm:$0xff] }
  0x41   : > { %v8814_v13 = vpack.c.bf16 %v611_v11, %v610_v10  ;;  %v612_v16 = vld [vmem:[#allocation2 + $0x48] sm:$0xff]  ;;  %v613_v19 = vld [vmem:[#allocation2 + $0x50] sm:$0xff]  ;;  %v614_v20 = vld [vmem:[#allocation2 + $0x60] sm:$0xff] }
  0x42   : > { %v615_v21 = vld [vmem:[#allocation2 + $0x68] sm:$0xff]  ;;  %v8829_v17 = vpack.c.bf16 %v613_v19, %v612_v16  ;;  %v616_v23 = vld [vmem:[#allocation2 + $0x78] sm:$0xff]  ;;  %v617_v24 = vld [vmem:[#allocation2 + $0x80] sm:$0xff] }
  0x43   : > { %v8831_v22 = vpack.c.bf16 %v615_v21, %v614_v20  ;;  %v618_v25 = vld [vmem:[#allocation2 + $0x90] sm:$0xff]  ;;  %v619_v26 = vld [vmem:[#allocation2 + $0x98] sm:$0xff]  ;;  %v8837_v27 = vpack.c.bf16 %v617_v24, %v616_v23  ;;  %v620_v29 = vld [vmem:[#allocation2 + $0xa8] sm:$0xff]  ;;  %v1624_v21 = vsel %vm771_vm0, %v8821_v15, 0 }
  0x44   : > { %7195 = vmatmul.mubr.msk.bf16.gmra.mrb[8].mxu0 %vm532_vm1, %v8759_v41  ;;  %v8839_v28 = vpack.c.bf16 %v619_v26, %v618_v25  ;;  %v621_v30 = vld [vmem:[#allocation2 + $0xb0] sm:$0xff]  ;;  %v622_v32 = vld [vmem:[#allocation2 + $0xc0] sm:$0xff]  ;;  %v623_v33 = vld [vmem:[#allocation2 + $0xc8] sm:$0xff] }
  0x45   : > { %7198 = vmatprep.mubr.msk.bf16.mxu0 %vm532_vm1, %v8762_v43  ;;  %v8845_v34 = vpack.c.bf16 %v621_v30, %v620_v29  ;;  %v8847_v37 = vpack.c.bf16 %v623_v33, %v622_v32  ;;  %v624_v38 = vld [vmem:[#allocation2 + $0xd8] sm:$0xff]  ;;  %v625_v39 = vld [vmem:[#allocation2 + $0xe0] sm:$0xff]  ;;  %v626_v40 = vld [vmem:[#allocation2 + $0xf0] sm:$0xff] }
  0x46   : > { %v627_v42 = vld [vmem:[#allocation2 + $0xf8] sm:$0xff]  ;;  %v8853_v44 = vpack.c.bf16 %v625_v39, %v624_v38  ;;  %v628_v46 = vld [vmem:[#allocation2 + $0x108] sm:$0xff]  ;;  %v629_v47 = vld [vmem:[#allocation2 + $0x110] sm:$0xff] }
  0x47   : > { %v8855_v45 = vpack.c.bf16 %v627_v42, %v626_v40  ;;  %v630_v48 = vld [vmem:[#allocation2 + $0x120] sm:$0xff]  ;;  %v631_v49 = vld [vmem:[#allocation2 + $0x128] sm:$0xff]  ;;  %v8861_v50 = vpack.c.bf16 %v629_v47, %v628_v46  ;;  %v632_v52 = vld [vmem:[#allocation2 + $0x138] sm:$0xff] }
  0x48   : > { %v8863_v51 = vpack.c.bf16 %v631_v49, %v630_v48  ;;  %v633_v53 = vld [vmem:[#allocation2 + $0x140] sm:$0xff]  ;;  %v634_v54 = vld [vmem:[#allocation2 + $0x150] sm:$0xff]  ;;  %v635_v55 = vld [vmem:[#allocation2 + $0x158] sm:$0xff] }
  0x49   : > { %v8869_v56 = vpack.c.bf16 %v633_v53, %v632_v52  ;;  %v8871_v57 = vpack.c.bf16 %v635_v55, %v634_v54  ;;  %v636_v58 = vld [vmem:[#allocation2 + $0x168] sm:$0xff]  ;;  %v637_v59 = vld [vmem:[#allocation2 + $0x170] sm:$0xff]  ;;  %v638_v60 = vld [vmem:[#allocation2 + $0x180] sm:$0xff] }
  0x4a   : > { %v639_v61 = vld [vmem:[#allocation2 + $0x188] sm:$0xff]  ;;  %v8877_v62 = vpack.c.bf16 %v637_v59, %v636_v58  ;;  %v640_v3 = vld [vmem:[#allocation2 + $0x198] sm:$0xff]  ;;  %v641_v4 = vld [vmem:[#allocation2 + $0x1a0] sm:$0xff] }
  0x4b   : > { %v8879_v1 = vpack.c.bf16 %v639_v61, %v638_v60  ;;  %v8885_v8 = vpack.c.bf16 %v641_v4, %v640_v3  ;;  %v1188_v10 = vld [vmem:[#allocation2 + $0x1a] sm:$0xff]  ;;  %v1189_v11 = vld [vmem:[#allocation2 + $0x22] sm:$0xff]  ;;  %v1192_v24 = vld [vmem:[#allocation2 + $0x4a] sm:$0xff] }
  0x4c   : > { %7199 = vmatmul.mubr.msk.bf16.gmra.mrb[12].mxu0 %vm532_vm1, %v8799_v63  ;;  %v1191_v16 = vld [vmem:[#allocation2 + $0x3a] sm:$0xff]  ;;  %v8890_v19 = vpack.c.bf16 %v1189_v11, %v1188_v10  ;;  %v8899_v23 = vld [vmem:[%s9944_s3 + $0x8] sm:$0x3]  ;;  %v1193_v25 = vld [vmem:[#allocation2 + $0x52] sm:$0xff] }
  0x4d   : > { %7202 = vmatprep.mubr.msk.bf16.mxu0 %vm532_vm1, %v8801_v0  ;;  %v1194_v26 = vld [vmem:[#allocation2 + $0x62] sm:$0xff]  ;;  %v1195_v29 = vld [vmem:[#allocation2 + $0x6a] sm:$0xff]  ;;  %v1196_v32 = vld [vmem:[#allocation2 + $0x7a] sm:$0xff] }
  0x4e   : > { %v8909_v30 = vpack.c.bf16 %v1195_v29, %v1194_v26  ;;  %v1197_v33 = vld [vmem:[#allocation2 + $0x82] sm:$0xff]  ;;  %v1198_v38 = vld [vmem:[#allocation2 + $0x92] sm:$0xff]  ;;  %v1199_v39 = vld [vmem:[#allocation2 + $0x9a] sm:$0xff] }
  0x4f   : > { %v8915_v40 = vpack.c.bf16 %v1197_v33, %v1196_v32  ;;  %v8917_v42 = vpack.c.bf16 %v1199_v39, %v1198_v38  ;;  %v1200_v46 = vld [vmem:[#allocation2 + $0xaa] sm:$0xff]  ;;  %v1201_v47 = vld [vmem:[#allocation2 + $0xb2] sm:$0xff]  ;;  %v1202_v48 = vld [vmem:[#allocation2 + $0xc2] sm:$0xff] }
  0x50   : > { %v1203_v49 = vld [vmem:[#allocation2 + $0xca] sm:$0xff]  ;;  %v8923_v52 = vpack.c.bf16 %v1201_v47, %v1200_v46  ;;  %v1204_v54 = vld [vmem:[#allocation2 + $0xda] sm:$0xff]  ;;  %v1205_v55 = vld [vmem:[#allocation2 + $0xe2] sm:$0xff] }
  0x51   : > { %v8925_v53 = vpack.c.bf16 %v1203_v49, %v1202_v48  ;;  %v1206_v58 = vld [vmem:[#allocation2 + $0xf2] sm:$0xff]  ;;  %v1207_v59 = vld [vmem:[#allocation2 + $0xfa] sm:$0xff]  ;;  %v8931_v60 = vpack.c.bf16 %v1205_v55, %v1204_v54  ;;  %v1208_v3 = vld [vmem:[#allocation2 + $0x10a] sm:$0xff] }
  0x52   : > { %v8933_v61 = vpack.c.bf16 %v1207_v59, %v1206_v58  ;;  %v1209_v4 = vld [vmem:[#allocation2 + $0x112] sm:$0xff]  ;;  %v1212_v11 = vld [vmem:[#allocation2 + $0x13a] sm:$0xff]  ;;  %v1216_v33 = vld [vmem:[#allocation2 + $0x16a] sm:$0xff] }
  0x53   : > { %v1859_v38 = vld [vmem:[#allocation2 + $0x109] sm:$0xff]  ;;  %v1860_v39 = vld [vmem:[#allocation2 + $0x111] sm:$0xff]  ;;  %v1861_v48 = vld [vmem:[#allocation2 + $0x121] sm:$0xff] }
  0x54   : > { %7203 = vmatmul.mubr.msk.bf16.gmra.mrb[16].mxu0 %vm532_vm1, %v8807_v6  ;;  %v1217_v46 = vld [vmem:[#allocation2 + $0x172] sm:$0xff]  ;;  %v8959_v47 = vpack.c.bf16 %v1860_v39, %v1859_v38  ;;  %v1862_v49 = vld [vmem:[#allocation2 + $0x129] sm:$0xff] }
  0x55   : > { %7224 = vmatprep.mubr.msk.bf16.mxu0 %vm532_vm1, %v642_v7  ;;  %v1187_v7 = vld [vmem:[#allocation2 + $0xa] sm:$0xff]  ;;  %v1218_v54 = vld [vmem:[#allocation2 + $0x182] sm:$0xff]  ;;  %v8961_v58 = vpack.c.bf16 %v1862_v49, %v1861_v48  ;;  %v8965_v59 = vpack.c.bf16 %v1217_v46, %v1216_v33 }
  0x56   : > { %v1222_v9 = vpack.c.bf16 %v1187_v7, %v1186_v5  ;;  %v1210_v5 = vld [vmem:[#allocation2 + $0x122] sm:$0xff]  ;;  %v1211_v7 = vld [vmem:[#allocation2 + $0x12a] sm:$0xff] }
  0x57   : > { %v8941_v10 = vpack.c.bf16 %v1211_v7, %v1210_v5  ;;  %v1219_v55 = vld [vmem:[#allocation2 + $0x18a] sm:$0xff]  ;;  %v1863_v5 = vld [vmem:[#allocation2 + $0x139] sm:$0xff]  ;;  %v1864_v7 = vld [vmem:[#allocation2 + $0x141] sm:$0xff] }
  0x58   : > { %v1867_v33 = vld [vmem:[#allocation2 + $0x169] sm:$0xff]  ;;  %v1868_v38 = vld [vmem:[#allocation2 + $0x171] sm:$0xff]  ;;  %v1869_v46 = vld [vmem:[#allocation2 + $0x181] sm:$0xff] }
  0x59   : > { %v8989_v39 = vpack.c.bf16 %v1868_v38, %v1867_v33  ;;  %v1870_v48 = vld [vmem:[#allocation2 + $0x189] sm:$0xff]  ;;  %v2826_v33 = vld [vmem:[#allocation2 + $0x99] sm:$0xff] }
  0x5a   : > { %v8991_v49 = vpack.c.bf16 %v1870_v48, %v1869_v46  ;;  %v6700_v48 = vld [vmem:[%s9946_s5 + $0x2] sm:$0x3] }
  0x5b   : > { %8388 = vmatprep.subr.msk.bf16.mxu1 %vm771_vm0, %v6700_v48 }
  0x5c   : > { %7225 = vmatmul.mubr.msk.bf16.vlgmr.msra.gmra.mrb[0].mxu0 %vm532_vm1, %v8812_v12 }
  0x5d   : > { %7261 = vmatpush3.bf16.msra.mxu0 %v1297_v14  ;;  %7228 = vmatprep.mubr.msk.bf16.mxu0 %vm532_vm1, %v8814_v13  ;;  %v1190_v14 = vld [vmem:[#allocation2 + $0x32] sm:$0xff] }
  0x5e   : > { %8382 = vmatprep.subr.msk.bf16.mxu0 %vm771_vm0, %v8821_v15  ;;  %v8892_v20 = vpack.c.bf16 %v1191_v16, %v1190_v14  ;;  %v8907_v15 = vpack.c.bf16 %v1193_v25, %v1192_v24  ;;  %v1213_v14 = vld [vmem:[#allocation2 + $0x142] sm:$0xff]  ;;  %v1857_v16 = vld [vmem:[#allocation2 + $0xf1] sm:$0xff]  ;;  %v1215_v25 = vld [vmem:[#allocation2 + $0x15a] sm:$0xff] }
  0x5f   : > { %v1214_v24 = vld [vmem:[#allocation2 + $0x152] sm:$0xff]  ;;  %v8949_v29 = vpack.c.bf16 %v1213_v14, %v1212_v11  ;;  %v1221_v11 = vld [vmem:[#allocation2 + $0x1a2] sm:$0xff]  ;;  %v8975_v14 = vpack.c.bf16 %v1864_v7, %v1863_v5 }
  0x60   : > { %v8953_v32 = vpack.c.bf16 %v1215_v25, %v1214_v24  ;;  %v1548_v7 = vld [vmem:[#allocation2 + $0x1b8] sm:$0xff] }
  0x64   : > { %7229 = vmatmul.mubr.msk.bf16.gmra.mrb[4].mxu0 %vm532_vm1, %v8829_v17 }
  0x65   : > { %7232 = vmatprep.mubr.msk.bf16.mxu0 %vm532_vm1, %v8831_v22 }
  0x6c   : > { %7233 = vmatmul.mubr.msk.bf16.gmra.mrb[8].mxu0 %vm532_vm1, %v8837_v27 }
  0x6d   : > { %7236 = vmatprep.mubr.msk.bf16.mxu0 %vm532_vm1, %v8839_v28 }
  0x74   : > { %7237 = vmatmul.mubr.msk.bf16.gmra.mrb[12].mxu0 %vm532_vm1, %v8845_v34 }
  0x75   : > { %7240 = vmatprep.mubr.msk.bf16.mxu0 %vm532_vm1, %v8847_v37 }
  0x7c   : > { %7241 = vmatmul.mubr.msk.bf16.gmra.mrb[16].mxu0 %vm532_vm1, %v8853_v44 }
  0x7d   : > { %7244 = vmatprep.mubr.msk.bf16.mxu0 %vm532_vm1, %v8855_v45 }
  0x84   : > { %7245 = vmatmul.mubr.msk.bf16.gmra.mrb[20].mxu0 %vm532_vm1, %v8861_v50 }
  0x85   : > { %7248 = vmatprep.mubr.msk.bf16.mxu0 %vm532_vm1, %v8863_v51 }
  0x8c   : > { %7249 = vmatmul.mubr.msk.bf16.gmra.mrb[24].mxu0 %vm532_vm1, %v8869_v56 }
  0x8d   : > { %7252 = vmatprep.mubr.msk.bf16.mxu0 %vm532_vm1, %v8871_v57 }
  0x94   : > { %7253 = vmatmul.mubr.msk.bf16.gmra.mrb[28].mxu0 %vm532_vm1, %v8877_v62 }
  0x95   : > { %7256 = vmatprep.mubr.msk.bf16.mxu0 %vm532_vm1, %v8879_v1 }
  0x9c   : > { %7257 = vmatmul.mubr.msk.bf16.gmra.mrb[32].mxu0 %vm532_vm1, %v8885_v8 }
  0x9d   : > { %7262 = vmatprep.mubr.msk.bf16.mxu0 %vm532_vm1, %v1222_v9  ;;  %v8939_v9 = vpack.c.bf16 %v1209_v4, %v1208_v3  ;;  %v8969_v3 = vpack.c.bf16 %v1219_v55, %v1218_v54  ;;  %v1220_v4 = vld [vmem:[#allocation2 + $0x19a] sm:$0xff]  ;;  %v1950_v54 = vsel %vm771_vm0, %v8899_v23, 0  ;;  %v6623_v55 = vld [vmem:[%s9944_s3 + $0xa] sm:$0x3] }
  0x9e   : > { %v8981_v25 = vpack.c.bf16 %v1221_v11, %v1220_v4  ;;  %v1872_v4 = vld [vmem:[#allocation2 + $0x1a1] sm:$0xff] }
  0xa4   : > { %7263 = vmatmul.mubr.msk.bf16.vlgmr.msra.gmra.mrb[0].mxu0 %vm532_vm1, %v8890_v19 }
  0xa5   : > { %7299 = vmatpush3.bf16.msra.mxu0 %v1624_v21  ;;  %7266 = vmatprep.mubr.msk.bf16.mxu0 %vm532_vm1, %v8892_v20  ;;  %v1858_v21 = vld [vmem:[#allocation2 + $0xf9] sm:$0xff] }
  0xa6   : > { %8383 = vmatprep.subr.msk.bf16.mxu0 %vm771_vm0, %v8899_v23  ;;  %v8947_v26 = vpack.c.bf16 %v1858_v21, %v1857_v16  ;;  %v1865_v16 = vld [vmem:[#allocation2 + $0x151] sm:$0xff]  ;;  %v1866_v21 = vld [vmem:[#allocation2 + $0x159] sm:$0xff] }
  0xa7   : > { %v8977_v24 = vpack.c.bf16 %v1866_v21, %v1865_v16  ;;  %v1547_v23 = vld [vmem:[#allocation2 + $0x1b0] sm:$0xff]  ;;  %v2276_v16 = vsel %vm771_vm0, %v6623_v55, 0  ;;  %v6642_v21 = vld [vmem:[%s9944_s3 + $0xc] sm:$0x3] }
  0xa8   : > { %7206 = vmatprep.mubr.msk.bf16.mxu1 %vm532_vm1, %v8947_v26  ;;  %v9039_v11 = vpack.c.bf16 %v1548_v7, %v1547_v23  ;;  %v2830_v23 = vld [vmem:[#allocation2 + $0xc9] sm:$0xff] }
  0xa9   : > { %7207 = vmatmul.mubr.msk.bf16.vlgmr.msra.gmra.mrb[0].mxu1 %vm532_vm1, %v8959_v47 }
  0xaa   : > { %7210 = vmatprep.mubr.msk.bf16.mxu1 %vm532_vm1, %v8961_v58 }
  0xac   : > { %7267 = vmatmul.mubr.msk.bf16.gmra.mrb[4].mxu0 %vm532_vm1, %v8907_v15 }
  0xad   : > { %7270 = vmatprep.mubr.msk.bf16.mxu0 %vm532_vm1, %v8909_v30 }
  0xb1   : > { %7211 = vmatmul.mubr.msk.bf16.gmra.mrb[4].mxu1 %vm532_vm1, %v8975_v14 }
  0xb2   : > { %7214 = vmatprep.mubr.msk.bf16.mxu1 %vm532_vm1, %v8977_v24 }
  0xb4   : > { %7271 = vmatmul.mubr.msk.bf16.gmra.mrb[8].mxu0 %vm532_vm1, %v8915_v40 }
  0xb5   : > { %7274 = vmatprep.mubr.msk.bf16.mxu0 %vm532_vm1, %v8917_v42 }
  0xb9   : > { %7215 = vmatmul.mubr.msk.bf16.gmra.mrb[8].mxu1 %vm532_vm1, %v8989_v39 }
  0xba   : > { %7218 = vmatprep.mubr.msk.bf16.mxu1 %vm532_vm1, %v8991_v49 }
  0xbc   : > { %7275 = vmatmul.mubr.msk.bf16.gmra.mrb[12].mxu0 %vm532_vm1, %v8923_v52 }
  0xbd   : > { %7278 = vmatprep.mubr.msk.bf16.mxu0 %vm532_vm1, %v8925_v53 }
  0xc4   : > { %7279 = vmatmul.mubr.msk.bf16.gmra.mrb[16].mxu0 %vm532_vm1, %v8931_v60 }
  0xc5   : > { %7282 = vmatprep.mubr.msk.bf16.mxu0 %vm532_vm1, %v8933_v61 }
  0xcc   : > { %7283 = vmatmul.mubr.msk.bf16.gmra.mrb[20].mxu0 %vm532_vm1, %v8939_v9 }
  0xcd   : > { %7286 = vmatprep.mubr.msk.bf16.mxu0 %vm532_vm1, %v8941_v10 }
  0xd4   : > { %7287 = vmatmul.mubr.msk.bf16.gmra.mrb[24].mxu0 %vm532_vm1, %v8949_v29 }
  0xd5   : > { %7290 = vmatprep.mubr.msk.bf16.mxu0 %vm532_vm1, %v8953_v32 }
  0xdc   : > { %7291 = vmatmul.mubr.msk.bf16.gmra.mrb[28].mxu0 %vm532_vm1, %v8965_v59 }
  0xdd   : > { %7294 = vmatprep.mubr.msk.bf16.mxu0 %vm532_vm1, %v8969_v3 }
  0xe4   : > { %7295 = vmatmul.mubr.msk.bf16.gmra.mrb[32].mxu0 %vm532_vm1, %v8981_v25 }
  0xe5   : > { %7300 = vmatprep.mubr.msk.bf16.mxu0 %vm532_vm1, %v8812_v12  ;;  %v1871_v12 = vld [vmem:[#allocation2 + $0x199] sm:$0xff] }
  0xe6   : > { %v9006_v5 = vpack.c.bf16 %v1872_v4, %v1871_v12  ;;  %v3776_v12 = vsel %vm771_vm0, %v6700_v48, 0  ;;  %v2829_v4 = vld [vmem:[#allocation2 + $0xc1] sm:$0xff] }
  0xe7   : > { %7527 = vmatpush3.bf16.msra.mxu1 %v3776_v12 }
  0xe8   : > { %7219 = vmatmul.mubr.msk.bf16.gmra.mrb[12].mxu1 %vm532_vm1, %v9006_v5 }
  0xec   : > { %7301 = vmatmul.mubr.msk.bf16.vlgmr.msra.gmra.mrb[0].mxu0 %vm532_vm1, %v8814_v13 }
  0xed   : > { %7337 = vmatpush3.bf16.msra.mxu0 %v1950_v54  ;;  %7304 = vmatprep.mubr.msk.bf16.mxu0 %vm532_vm1, %v8829_v17  ;;  %v2827_v54 = vld [vmem:[#allocation2 + $0xa9] sm:$0xff] }
  0xee   : > { %8384 = vmatprep.subr.msk.bf16.mxu0 %vm771_vm0, %v6623_v55  ;;  %v2828_v55 = vld [vmem:[#allocation2 + $0xb1] sm:$0xff] }
  0xef   : > { %v2858_v7 = vpack.c.bf16 %v2828_v55, %v2827_v54 }
  0xf4   : > { %7305 = vmatmul.mubr.msk.bf16.gmra.mrb[4].mxu0 %vm532_vm1, %v8831_v22 }
  0xf5   : > { %7308 = vmatprep.mubr.msk.bf16.mxu0 %vm532_vm1, %v8837_v27 }
  0xfc   : > { %7309 = vmatmul.mubr.msk.bf16.gmra.mrb[8].mxu0 %vm532_vm1, %v8839_v28 }
  0xfd   : > { %7312 = vmatprep.mubr.msk.bf16.mxu0 %vm532_vm1, %v8845_v34 }
 0x104   : > { %7313 = vmatmul.mubr.msk.bf16.gmra.mrb[12].mxu0 %vm532_vm1, %v8847_v37 }
 0x105   : > { %7316 = vmatprep.mubr.msk.bf16.mxu0 %vm532_vm1, %v8853_v44 }
 0x10c   : > { %7317 = vmatmul.mubr.msk.bf16.gmra.mrb[16].mxu0 %vm532_vm1, %v8855_v45 }
 0x10d   : > { %7320 = vmatprep.mubr.msk.bf16.mxu0 %vm532_vm1, %v8861_v50 }
 0x114   : > { %7321 = vmatmul.mubr.msk.bf16.gmra.mrb[20].mxu0 %vm532_vm1, %v8863_v51 }
 0x115   : > { %7324 = vmatprep.mubr.msk.bf16.mxu0 %vm532_vm1, %v8869_v56 }
 0x11c   : > { %7325 = vmatmul.mubr.msk.bf16.gmra.mrb[24].mxu0 %vm532_vm1, %v8871_v57 }
 0x11d   : > { %7328 = vmatprep.mubr.msk.bf16.mxu0 %vm532_vm1, %v8877_v62 }
 0x124   : > { %7329 = vmatmul.mubr.msk.bf16.gmra.mrb[28].mxu0 %vm532_vm1, %v8879_v1 }
 0x125   : > { %7332 = vmatprep.mubr.msk.bf16.mxu0 %vm532_vm1, %v8885_v8 }
 0x12c   : > { %7333 = vmatmul.mubr.msk.bf16.gmra.mrb[32].mxu0 %vm532_vm1, %v9039_v11 }
 0x12d   : > { %7338 = vmatprep.mubr.msk.bf16.mxu0 %vm532_vm1, %v8720_v18  ;;  %v1873_v18 = vld [vmem:[#allocation2 + $0x1b1] sm:$0xff] }
 0x134   : > { %7339 = vmatmul.mubr.msk.bf16.vlgmr.msra.gmra.mrb[0].mxu0 %vm532_vm1, %v8747_v31  ;;  %v1874_v31 = vld [vmem:[#allocation2 + $0x1b9] sm:$0xff] }
 0x135   : > { %7375 = vmatpush3.bf16.msra.mxu0 %v2276_v16  ;;  %7342 = vmatprep.mubr.msk.bf16.mxu0 %vm532_vm1, %v8749_v35  ;;  %v9082_v35 = vpack.c.bf16 %v1874_v31, %v1873_v18  ;;  %v2831_v16 = vld [vmem:[#allocation2 + $0xd9] sm:$0xff] }
 0x136   : > { %8385 = vmatprep.subr.msk.bf16.mxu0 %vm771_vm0, %v6642_v21 }
 0x13c   : > { %7343 = vmatmul.mubr.msk.bf16.gmra.mrb[4].mxu0 %vm532_vm1, %v8753_v36  ;;  %v2602_v36 = vsel %vm771_vm0, %v6642_v21, 0  ;;  %v2832_v21 = vld [vmem:[#allocation2 + $0xe1] sm:$0xff] }
 0x13d   : > { %7346 = vmatprep.mubr.msk.bf16.mxu0 %vm532_vm1, %v8759_v41  ;;  %v6661_v41 = vld [vmem:[%s9944_s3 + $0xe] sm:$0x3]  ;;  %v2860_v18 = vpack.c.bf16 %v2832_v21, %v2831_v16 }
 0x144   : > { %7347 = vmatmul.mubr.msk.bf16.gmra.mrb[8].mxu0 %vm532_vm1, %v8762_v43  ;;  %v2199_v43 = vld [vmem:[#allocation2 + $0x1b2] sm:$0xff] }
 0x145   : > { %7350 = vmatprep.mubr.msk.bf16.mxu0 %vm532_vm1, %v8799_v63  ;;  %v2200_v63 = vld [vmem:[#allocation2 + $0x1ba] sm:$0xff] }
 0x14c   : > { %7351 = vmatmul.mubr.msk.bf16.gmra.mrb[12].mxu0 %vm532_vm1, %v8801_v0  ;;  %v9125_v0 = vpack.c.bf16 %v2200_v63, %v2199_v43 }
 0x14d   : > { %7354 = vmatprep.mubr.msk.bf16.mxu0 %vm532_vm1, %v8807_v6  ;;  %v2928_v6 = vsel %vm771_vm0, %v6661_v41, 0 }
 0x154   : > { %7355 = vmatmul.mubr.msk.bf16.gmra.mrb[16].mxu0 %vm532_vm1, %v8947_v26 }
 0x155   : > { %7358 = vmatprep.mubr.msk.bf16.mxu0 %vm532_vm1, %v8959_v47 }
 0x15c   : > { %7359 = vmatmul.mubr.msk.bf16.gmra.mrb[20].mxu0 %vm532_vm1, %v8961_v58 }
 0x15d   : > { %7362 = vmatprep.mubr.msk.bf16.mxu0 %vm532_vm1, %v8975_v14 }
 0x164   : > { %7363 = vmatmul.mubr.msk.bf16.gmra.mrb[24].mxu0 %vm532_vm1, %v8977_v24 }
 0x165   : > { %7366 = vmatprep.mubr.msk.bf16.mxu0 %vm532_vm1, %v8989_v39 }
 0x16c   : > { %7367 = vmatmul.mubr.msk.bf16.gmra.mrb[28].mxu0 %vm532_vm1, %v8991_v49 }
 0x16d   : > { %7370 = vmatprep.mubr.msk.bf16.mxu0 %vm532_vm1, %v9006_v5 }
 0x174   : > { %7371 = vmatmul.mubr.msk.bf16.gmra.mrb[32].mxu0 %vm532_vm1, %v9082_v35 }
 0x175   : > { %7376 = vmatprep.mubr.msk.bf16.mxu0 %vm532_vm1, %v8890_v19  ;;  %v6680_v19 = vld [vmem:[%s9944_s3 + $0x10] sm:$0x3] }
 0x17c   : > { %7377 = vmatmul.mubr.msk.bf16.vlgmr.msra.gmra.mrb[0].mxu0 %vm532_vm1, %v8892_v20 }
 0x17d   : > { %7413 = vmatpush3.bf16.msra.mxu0 %v2602_v36  ;;  %7380 = vmatprep.mubr.msk.bf16.mxu0 %vm532_vm1, %v8907_v15 }
 0x17e   : > { %8386 = vmatprep.subr.msk.bf16.mxu0 %vm771_vm0, %v6661_v41 }
 0x184   : > { %7381 = vmatmul.mubr.msk.bf16.gmra.mrb[4].mxu0 %vm532_vm1, %v8909_v30 }
 0x185   : > { %7384 = vmatprep.mubr.msk.bf16.mxu0 %vm532_vm1, %v8915_v40 }
 0x18c   : > { %7385 = vmatmul.mubr.msk.bf16.gmra.mrb[8].mxu0 %vm532_vm1, %v8917_v42 }
 0x18d   : > { %7388 = vmatprep.mubr.msk.bf16.mxu0 %vm532_vm1, %v8923_v52 }
 0x194   : > { %7389 = vmatmul.mubr.msk.bf16.gmra.mrb[12].mxu0 %vm532_vm1, %v8925_v53 }
 0x195   : > { %7392 = vmatprep.mubr.msk.bf16.mxu0 %vm532_vm1, %v8931_v60 }
 0x19c   : > { %7393 = vmatmul.mubr.msk.bf16.gmra.mrb[16].mxu0 %vm532_vm1, %v8933_v61 }
 0x19d   : > { %7396 = vmatprep.mubr.msk.bf16.mxu0 %vm532_vm1, %v8939_v9 }
 0x1a4   : > { %7397 = vmatmul.mubr.msk.bf16.gmra.mrb[20].mxu0 %vm532_vm1, %v8941_v10 }
 0x1a5   : > { %7400 = vmatprep.mubr.msk.bf16.mxu0 %vm532_vm1, %v8949_v29 }
 0x1ac   : > { %7401 = vmatmul.mubr.msk.bf16.gmra.mrb[24].mxu0 %vm532_vm1, %v8953_v32 }
 0x1ad   : > { %7404 = vmatprep.mubr.msk.bf16.mxu0 %vm532_vm1, %v8965_v59 }
 0x1b4   : > { %7405 = vmatmul.mubr.msk.bf16.gmra.mrb[28].mxu0 %vm532_vm1, %v8969_v3 }
 0x1b5   : > { %7408 = vmatprep.mubr.msk.bf16.mxu0 %vm532_vm1, %v8981_v25 }
 0x1bc   : > { %7409 = vmatmul.mubr.msk.bf16.gmra.mrb[32].mxu0 %vm532_vm1, %v9125_v0 }
 0x1bd   : > { %7414 = vmatprep.mubr.msk.bf16.mxu0 %vm532_vm1, %v8814_v13  ;;  %v2525_v13 = vld [vmem:[#allocation2 + $0x1c8] sm:$0xff] }
 0x1c4   : > { %7415 = vmatmul.mubr.msk.bf16.vlgmr.msra.gmra.mrb[0].mxu0 %vm532_vm1, %v8829_v17  ;;  %v2526_v17 = vld [vmem:[#allocation2 + $0x1d0] sm:$0xff] }
 0x1c5   : > { %7451 = vmatpush3.bf16.msra.mxu0 %v2928_v6  ;;  %7418 = vmatprep.mubr.msk.bf16.mxu0 %vm532_vm1, %v8831_v22  ;;  %v2817_v22 = vld [vmem:[#allocation2 + $0x31] sm:$0xff] }
 0x1c6   : > { %8387 = vmatprep.subr.msk.bf16.mxu0 %vm771_vm0, %v6680_v19 }
 0x1cc   : > { %7419 = vmatmul.mubr.msk.bf16.gmra.mrb[4].mxu0 %vm532_vm1, %v8837_v27  ;;  %v2818_v27 = vld [vmem:[#allocation2 + $0x39] sm:$0xff] }
 0x1cd   : > { %7422 = vmatprep.mubr.msk.bf16.mxu0 %vm532_vm1, %v8839_v28  ;;  %v2544_v28 = vpack.c.bf16 %v2526_v17, %v2525_v13 }
 0x1d4   : > { %7423 = vmatmul.mubr.msk.bf16.gmra.mrb[8].mxu0 %vm532_vm1, %v8845_v34  ;;  %v2853_v34 = vpack.c.bf16 %v2818_v27, %v2817_v22 }
 0x1d5   : > { %7426 = vmatprep.mubr.msk.bf16.mxu0 %vm532_vm1, %v8847_v37  ;;  %v2819_v37 = vld [vmem:[#allocation2 + $0x49] sm:$0xff] }
 0x1dc   : > { %7427 = vmatmul.mubr.msk.bf16.gmra.mrb[12].mxu0 %vm532_vm1, %v8853_v44  ;;  %v2820_v44 = vld [vmem:[#allocation2 + $0x51] sm:$0xff] }
 0x1dd   : > { %7430 = vmatprep.mubr.msk.bf16.mxu0 %vm532_vm1, %v8855_v45  ;;  %v2821_v45 = vld [vmem:[#allocation2 + $0x61] sm:$0xff] }
 0x1e4   : > { %7431 = vmatmul.mubr.msk.bf16.gmra.mrb[16].mxu0 %vm532_vm1, %v8861_v50  ;;  %v2822_v50 = vld [vmem:[#allocation2 + $0x69] sm:$0xff] }
 0x1e5   : > { %7434 = vmatprep.mubr.msk.bf16.mxu0 %vm532_vm1, %v8863_v51  ;;  %v2854_v51 = vpack.c.bf16 %v2820_v44, %v2819_v37 }
 0x1ec   : > { %7435 = vmatmul.mubr.msk.bf16.gmra.mrb[20].mxu0 %vm532_vm1, %v8869_v56  ;;  %v2855_v56 = vpack.c.bf16 %v2822_v50, %v2821_v45 }
 0x1ed   : > { %7438 = vmatprep.mubr.msk.bf16.mxu0 %vm532_vm1, %v8871_v57  ;;  %v3254_v57 = vsel %vm771_vm0, %v6680_v19, 0 }
 0x1f4   : > { %7439 = vmatmul.mubr.msk.bf16.gmra.mrb[24].mxu0 %vm532_vm1, %v8877_v62  ;;  %v2823_v62 = vld [vmem:[#allocation2 + $0x79] sm:$0xff] }
 0x1f5   : > { %7442 = vmatprep.mubr.msk.bf16.mxu0 %vm532_vm1, %v8879_v1  ;;  %v2824_v1 = vld [vmem:[#allocation2 + $0x81] sm:$0xff] }
 0x1f6   : > { %v2856_v38 = vpack.c.bf16 %v2824_v1, %v2823_v62 }
 0x1fc   : > { %7443 = vmatmul.mubr.msk.bf16.gmra.mrb[28].mxu0 %vm532_vm1, %v8885_v8  ;;  %v2825_v8 = vld [vmem:[#allocation2 + $0x91] sm:$0xff] }
 0x1fd   : > { %7446 = vmatprep.mubr.msk.bf16.mxu0 %vm532_vm1, %v9039_v11  ;;  %v2857_v46 = vpack.c.bf16 %v2826_v33, %v2825_v8  ;;  %v2859_v11 = vpack.c.bf16 %v2830_v23, %v2829_v4 }
 0x204   : > { %7447 = vmatmul.mubr.msk.bf16.gmra.mrb[32].mxu0 %vm532_vm1, %v2544_v28 }
 0x205   : > { %7452 = vmatprep.mubr.msk.bf16.mxu0 %vm532_vm1, %v2853_v34 }
 0x20c   : > { %7453 = vmatmul.mubr.msk.bf16.vlgmr.msra.gmra.mrb[0].mxu0 %vm532_vm1, %v2854_v51 }
 0x20d   : > { %7489 = vmatpush3.bf16.msra.mxu0 %v3254_v57  ;;  %7456 = vmatprep.mubr.msk.bf16.mxu0 %vm532_vm1, %v2855_v56 }
 0x214   : > { %7457 = vmatmul.mubr.msk.bf16.gmra.mrb[4].mxu0 %vm532_vm1, %v2856_v38 }
 0x215   : > { %7460 = vmatprep.mubr.msk.bf16.mxu0 %vm532_vm1, %v2857_v46 }
 0x21c   : > { %7461 = vmatmul.mubr.msk.bf16.gmra.mrb[8].mxu0 %vm532_vm1, %v2858_v7 }
 0x21d   : > { %7464 = vmatprep.mubr.msk.bf16.mxu0 %vm532_vm1, %v2859_v11 }
 0x224   : > { %7465 = vmatmul.mubr.msk.bf16.gmra.mrb[12].mxu0 %vm532_vm1, %v2860_v18 }
 0x225   : > { %7468 = vmatprep.mubr.msk.bf16.mxu0 %vm532_vm1, %v8947_v26  ;;  %v2851_v26 = vld [vmem:[#allocation2 + $0x1c9] sm:$0xff] }
 0x22c   : > { %7469 = vmatmul.mubr.msk.bf16.gmra.mrb[16].mxu0 %vm532_vm1, %v8959_v47  ;;  %v2852_v47 = vld [vmem:[#allocation2 + $0x1d1] sm:$0xff] }
 0x22d   : > { %7472 = vmatprep.mubr.msk.bf16.mxu0 %vm532_vm1, %v8961_v58  ;;  %v2870_v58 = vpack.c.bf16 %v2852_v47, %v2851_v26  ;;  %v9312_v26 = vld [vmem:[%s9946_s5 + $0x4] sm:$0x3] }
 0x234   : > { %7473 = vmatmul.mubr.msk.bf16.gmra.mrb[20].mxu0 %vm532_vm1, %v8975_v14 }
 0x235   : > { %7476 = vmatprep.mubr.msk.bf16.mxu0 %vm532_vm1, %v8977_v24 }
 0x23c   : > { %7477 = vmatmul.mubr.msk.bf16.gmra.mrb[24].mxu0 %vm532_vm1, %v8989_v39 }
 0x23d   : > { %7480 = vmatprep.mubr.msk.bf16.mxu0 %vm532_vm1, %v8991_v49 }
 0x244   : > { %7481 = vmatmul.mubr.msk.bf16.gmra.mrb[28].mxu0 %vm532_vm1, %v9006_v5  ;;  %v9279_v5 = vld [vmem:[%s9945_s4] ss:$0 sm:$0xff] }
 0x245   : > { %7484 = vmatprep.mubr.msk.bf16.mxu0 %vm532_vm1, %v9082_v35 }
 0x24c   : > { %7485 = vmatmul.mubr.msk.bf16.gmra.mrb[32].mxu0 %vm532_vm1, %v2870_v58 }
 0x24d   : > { %7490 = vmatprep.mubr.msk.bf16.mxu0 %vm532_vm1, %v8892_v20  ;;  %v3177_v20 = vld [vmem:[#allocation2 + $0x1ca] sm:$0xff] }
 0x254   : > { %7491 = vmatmul.mubr.msk.bf16.vlgmr.msra.gmra.mrb[0].mxu0 %vm532_vm1, %v8907_v15  ;;  %v3178_v15 = vld [vmem:[#allocation2 + $0x1d2] sm:$0xff] }
 0x255   : > { %7494 = vmatprep.mubr.msk.bf16.mxu0 %vm532_vm1, %v8909_v30  ;;  %v3196_v30 = vpack.c.bf16 %v3178_v15, %v3177_v20 }
 0x25c   : > { %7495 = vmatmul.mubr.msk.bf16.gmra.mrb[4].mxu0 %vm532_vm1, %v8915_v40  ;;  %v9240_v40 = vld [vmem:[%s9946_s5] sm:$0x3] }
 0x25d   : > { %7498 = vmatprep.mubr.msk.bf16.mxu0 %vm532_vm1, %v8917_v42  ;;  %8389 = vmatprep.subr.msk.bf16.mxu1 %vm771_vm0, %v9240_v40  ;;  %v9244_v42 = vpop.f32.mrb[0].mxu1  ;;  %v3988_v11 = vsel %vm771_vm0, %v9240_v40, 0 }
 0x264   : > { %7499 = vmatmul.mubr.msk.bf16.gmra.mrb[8].mxu0 %vm532_vm1, %v8923_v52  ;;  %v9246_v52 = vpop.f32.mrb[1].mxu1 }
 0x265   : > { %7502 = vmatprep.mubr.msk.bf16.mxu0 %vm532_vm1, %v8925_v53  ;;  %v9248_v53 = vpop.f32.mrb[2].mxu1 }
 0x26c   : > { %7503 = vmatmul.mubr.msk.bf16.gmra.mrb[12].mxu0 %vm532_vm1, %v8931_v60  ;;  %v9250_v60 = vpop.f32.mrb[3].mxu1 }
 0x26d   : > { %7506 = vmatprep.mubr.msk.bf16.mxu0 %vm532_vm1, %v8933_v61  ;;  %v9252_v61 = vpop.f32.mrb[4].mxu1 }
 0x274   : > { %7507 = vmatmul.mubr.msk.bf16.gmra.mrb[16].mxu0 %vm532_vm1, %v8939_v9  ;;  %v9254_v9 = vpop.f32.mrb[5].mxu1 }
 0x275   : > { %7510 = vmatprep.mubr.msk.bf16.mxu0 %vm532_vm1, %v8941_v10  ;;  %v9256_v10 = vpop.f32.mrb[6].mxu1 }
 0x27c   : > { %7511 = vmatmul.mubr.msk.bf16.gmra.mrb[20].mxu0 %vm532_vm1, %v8949_v29  ;;  %v9258_v29 = vpop.f32.mrb[7].mxu1 }
 0x27d   : > { %7514 = vmatprep.mubr.msk.bf16.mxu0 %vm532_vm1, %v8953_v32  ;;  %v9260_v32 = vpop.f32.mrb[8].mxu1 }
 0x284   : > { %7515 = vmatmul.mubr.msk.bf16.gmra.mrb[24].mxu0 %vm532_vm1, %v8965_v59  ;;  %v9262_v59 = vpop.f32.mrb[9].mxu1 }
 0x285   : > { %7518 = vmatprep.mubr.msk.bf16.mxu0 %vm532_vm1, %v8969_v3  ;;  %v9264_v3 = vpop.f32.mrb[10].mxu1 }
 0x286   : > { %v9266_v14 = vpop.f32.mrb[11].mxu1 }
 0x287   : > { %v9268_v24 = vpop.f32.mrb[12].mxu1 }
 0x28c   : > { %7519 = vmatmul.mubr.msk.bf16.gmra.mrb[28].mxu0 %vm532_vm1, %v8981_v25  ;;  %v9270_v25 = vpop.f32.mrb[13].mxu1 }
 0x28d   : > { %7522 = vmatprep.mubr.msk.bf16.mxu0 %vm532_vm1, %v9125_v0  ;;  %v9272_v39 = vpop.f32.mrb[14].mxu1 }
 0x28e   : > { %v9274_v49 = vpop.f32.mrb[15].mxu1 }
 0x294   : > { %7523 = vmatmul.mubr.msk.bf16.gmra.mrb[32].mxu0 %vm532_vm1, %v3196_v30 }
 0x327   : > { %v7492_v31 = vpop.f32.mrb[0].mxu0 }
 0x328   : > { %v3478_v35 = vadd.f32 %v7492_v31, %v9279_v5  ;;  %v3290_v36 = vpop.f32.mrb[1].mxu0 }
 0x329   : > { %v3476_v41 = vadd.f32 %v9279_v5, %v3290_v36  ;;  %v7493_v43 = vpop.f32.mrb[2].mxu0 }
 0x32a   : > { %v3514_v63 = vmax.f32 %v3478_v35, 0.0  ;;  %v3479_v0 = vadd.f32 %v7493_v43, %v9279_v5  ;;  %v3293_v6 = vpop.f32.mrb[3].mxu0 }
 0x32b   : > { %v3512_v19 = vmax.f32 %v3476_v41, 0.0  ;;  %v3477_v13 = vadd.f32 %v9279_v5, %v3293_v6 }
 0x32c   : > { %3586 = vst.msk [vmem:[#allocation3 + $0x19] sm:$0xff] %vm532_vm1, %v3514_v63  ;;  %v3515_v17 = vmax.f32 %v3479_v0, 0.0 }
 0x32d   : > { %3584 = vst.msk [vmem:[#allocation3 + $0x1] sm:$0xff] %vm532_vm1, %v3512_v19  ;;  %v3513_v22 = vmax.f32 %v3477_v13, 0.0 }
 0x32e   : > { %3623 = vst.msk [vmem:[#allocation3 + $0x1] sm:$0xff] %vm532_vm1, %v8446_v2  ;;  %3587 = vst.msk [vmem:[#allocation3 + $0x21] sm:$0xff] %vm532_vm1, %v3515_v17 }
 0x32f   : > { %3585 = vst.msk [vmem:[#allocation3 + $0x9] sm:$0xff] %vm532_vm1, %v3513_v22  ;;  %v7496_v27 = vpop.f32.mrb[4].mxu0 }
 0x330   : > { %3624 = vst.msk [vmem:[#allocation3 + $0x9] sm:$0xff] %vm532_vm1, %v8446_v2  ;;  %v3482_v28 = vadd.f32 %v7496_v27, %v9279_v5  ;;  %v3306_v34 = vpop.f32.mrb[5].mxu0 }
 0x331   : > { %v3480_v37 = vadd.f32 %v9279_v5, %v3306_v34  ;;  %v7497_v44 = vpop.f32.mrb[6].mxu0 }
 0x332   : > { %v3518_v45 = vmax.f32 %v3482_v28, 0.0  ;;  %v3483_v50 = vadd.f32 %v7497_v44, %v9279_v5  ;;  %v3309_v51 = vpop.f32.mrb[7].mxu0 }
 0x333   : > { %v3516_v56 = vmax.f32 %v3480_v37, 0.0  ;;  %v3481_v57 = vadd.f32 %v9279_v5, %v3309_v51  ;;  %v3679_v12 = vld [vmem:[#allocation3 + $0x19] sm:$0xff] }
 0x334   : > { %3590 = vst.msk [vmem:[#allocation3 + $0x49] sm:$0xff] %vm532_vm1, %v3518_v45  ;;  %v3519_v62 = vmax.f32 %v3483_v50, 0.0 }
 0x335   : > { %3588 = vst.msk [vmem:[#allocation3 + $0x31] sm:$0xff] %vm532_vm1, %v3516_v56  ;;  %v3517_v1 = vmax.f32 %v3481_v57, 0.0  ;;  %v3677_v8 = vld [vmem:[#allocation3 + $0x1] sm:$0xff] }
 0x336   : > { %3591 = vst.msk [vmem:[#allocation3 + $0x51] sm:$0xff] %vm532_vm1, %v3519_v62  ;;  %v3680_v33 = vld [vmem:[#allocation3 + $0x21] sm:$0xff] }
 0x337   : > { %3589 = vst.msk [vmem:[#allocation3 + $0x39] sm:$0xff] %vm532_vm1, %v3517_v1  ;;  %v7500_v38 = vpop.f32.mrb[8].mxu0  ;;  %v3678_v46 = vld [vmem:[#allocation3 + $0x9] sm:$0xff]  ;;  %v9303_v7 = vpack.c.bf16 %v3680_v33, %v3679_v12 }
 0x338   : > { %v3486_v48 = vadd.f32 %v7500_v38, %v9279_v5  ;;  %v3322_v54 = vpop.f32.mrb[9].mxu0  ;;  %v3709_v55 = vpack.c.bf16 %v3678_v46, %v3677_v8 }
 0x339   : > { %v3484_v4 = vadd.f32 %v9279_v5, %v3322_v54  ;;  %v7501_v23 = vpop.f32.mrb[10].mxu0 }
 0x33a   : > { %v3522_v16 = vmax.f32 %v3486_v48, 0.0  ;;  %v3487_v21 = vadd.f32 %v7501_v23, %v9279_v5  ;;  %v3325_v18 = vpop.f32.mrb[11].mxu0  ;;  %7528 = vmatprep.mubr.msk.bf16.mxu1 %vm532_vm1, %v3709_v55 }
 0x33b   : > { %v3520_v47 = vmax.f32 %v3484_v4, 0.0  ;;  %v3485_v58 = vadd.f32 %v9279_v5, %v3325_v18  ;;  %7529 = vmatmul.mubr.msk.bf16.vlgmr.msra.gmra.mrb[16].mxu1 %vm532_vm1, %v9303_v7  ;;  %v3683_v63 = vld [vmem:[#allocation3 + $0x49] sm:$0xff] }
 0x33c   : > { %3594 = vst.msk [vmem:[#allocation3 + $0x79] sm:$0xff] %vm532_vm1, %v3522_v16  ;;  %v3523_v20 = vmax.f32 %v3487_v21, 0.0  ;;  %7561 = vmatpush3.bf16.msra.mxu1 %v3988_v11  ;;  %v3681_v30 = vld [vmem:[#allocation3 + $0x31] sm:$0xff] }
 0x33d   : > { %3592 = vst.msk [vmem:[#allocation3 + $0x61] sm:$0xff] %vm532_vm1, %v3520_v47  ;;  %v3521_v15 = vmax.f32 %v3485_v58, 0.0  ;;  %8390 = vmatprep.subr.msk.bf16.mxu1 %vm771_vm0, %v9312_v26  ;;  %v3684_v31 = vld [vmem:[#allocation3 + $0x51] sm:$0xff] }
 0x33e   : > { %3595 = vst.msk [vmem:[#allocation3 + $0x81] sm:$0xff] %vm532_vm1, %v3523_v20  ;;  %v3682_v40 = vld [vmem:[#allocation3 + $0x39] sm:$0xff]  ;;  %v9329_v19 = vpack.c.bf16 %v3684_v31, %v3683_v63 }
 0x33f   : > { %3593 = vst.msk [vmem:[#allocation3 + $0x69] sm:$0xff] %vm532_vm1, %v3521_v15  ;;  %v7504_v35 = vpop.f32.mrb[12].mxu0  ;;  %v9323_v36 = vpack.c.bf16 %v3682_v40, %v3681_v30 }
 0x340   : > { %v3490_v41 = vadd.f32 %v7504_v35, %v9279_v5  ;;  %v3338_v43 = vpop.f32.mrb[13].mxu0 }
 0x341   : > { %v3488_v0 = vadd.f32 %v9279_v5, %v3338_v43  ;;  %v7505_v6 = vpop.f32.mrb[14].mxu0  ;;  %7532 = vmatprep.mubr.msk.bf16.mxu1 %vm532_vm1, %v9323_v36 }
 0x342   : > { %v3526_v13 = vmax.f32 %v3490_v41, 0.0  ;;  %v3491_v17 = vadd.f32 %v7505_v6, %v9279_v5  ;;  %v3341_v22 = vpop.f32.mrb[15].mxu0 }
 0x343   : > { %v3524_v27 = vmax.f32 %v3488_v0, 0.0  ;;  %v3489_v28 = vadd.f32 %v9279_v5, %v3341_v22  ;;  %7533 = vmatmul.mubr.msk.bf16.gmra.mrb[20].mxu1 %vm532_vm1, %v9329_v19  ;;  %v3687_v1 = vld [vmem:[#allocation3 + $0x79] sm:$0xff] }
 0x344   : > { %3598 = vst.msk [vmem:[#allocation3 + $0xa9] sm:$0xff] %vm532_vm1, %v3526_v13  ;;  %v3527_v34 = vmax.f32 %v3491_v17, 0.0  ;;  %v3685_v44 = vld [vmem:[#allocation3 + $0x61] sm:$0xff] }
 0x345   : > { %3596 = vst.msk [vmem:[#allocation3 + $0x91] sm:$0xff] %vm532_vm1, %v3524_v27  ;;  %v3525_v37 = vmax.f32 %v3489_v28, 0.0  ;;  %v3688_v50 = vld [vmem:[#allocation3 + $0x81] sm:$0xff] }
 0x346   : > { %3599 = vst.msk [vmem:[#allocation3 + $0xb1] sm:$0xff] %vm532_vm1, %v3527_v34  ;;  %v3686_v45 = vld [vmem:[#allocation3 + $0x69] sm:$0xff]  ;;  %v9345_v38 = vpack.c.bf16 %v3688_v50, %v3687_v1 }
 0x347   : > { %3597 = vst.msk [vmem:[#allocation3 + $0x99] sm:$0xff] %vm532_vm1, %v3525_v37  ;;  %v7508_v51 = vpop.f32.mrb[16].mxu0  ;;  %v9339_v56 = vpack.c.bf16 %v3686_v45, %v3685_v44 }
 0x348   : > { %v3494_v57 = vadd.f32 %v7508_v51, %v9279_v5  ;;  %v3354_v62 = vpop.f32.mrb[17].mxu0 }
 0x349   : > { %v3492_v8 = vadd.f32 %v9279_v5, %v3354_v62  ;;  %v7509_v33 = vpop.f32.mrb[18].mxu0  ;;  %7536 = vmatprep.mubr.msk.bf16.mxu1 %vm532_vm1, %v9339_v56 }
 0x34a   : > { %v3530_v46 = vmax.f32 %v3494_v57, 0.0  ;;  %v3495_v48 = vadd.f32 %v7509_v33, %v9279_v5  ;;  %v3357_v54 = vpop.f32.mrb[19].mxu0 }
 0x34b   : > { %v3528_v55 = vmax.f32 %v3492_v8, 0.0  ;;  %v3493_v12 = vadd.f32 %v9279_v5, %v3357_v54  ;;  %7537 = vmatmul.mubr.msk.bf16.gmra.mrb[24].mxu1 %vm532_vm1, %v9345_v38  ;;  %v3691_v15 = vld [vmem:[#allocation3 + $0xa9] sm:$0xff] }
 0x34c   : > { %3602 = vst.msk [vmem:[#allocation3 + $0xd9] sm:$0xff] %vm532_vm1, %v3530_v46  ;;  %v3531_v4 = vmax.f32 %v3495_v48, 0.0  ;;  %v3689_v11 = vld [vmem:[#allocation3 + $0x91] sm:$0xff] }
 0x34d   : > { %3600 = vst.msk [vmem:[#allocation3 + $0xc1] sm:$0xff] %vm532_vm1, %v3528_v55  ;;  %v3529_v23 = vmax.f32 %v3493_v12, 0.0  ;;  %v3692_v21 = vld [vmem:[#allocation3 + $0xb1] sm:$0xff] }
 0x34e   : > { %3603 = vst.msk [vmem:[#allocation3 + $0xe1] sm:$0xff] %vm532_vm1, %v3531_v4  ;;  %v3690_v16 = vld [vmem:[#allocation3 + $0x99] sm:$0xff]  ;;  %v9361_v31 = vpack.c.bf16 %v3692_v21, %v3691_v15 }
 0x34f   : > { %3601 = vst.msk [vmem:[#allocation3 + $0xc9] sm:$0xff] %vm532_vm1, %v3529_v23  ;;  %v7512_v18 = vpop.f32.mrb[20].mxu0  ;;  %v9355_v47 = vpack.c.bf16 %v3690_v16, %v3689_v11 }
 0x350   : > { %v7834_v58 = vadd.f32 %v7512_v18, %v9244_v42  ;;  %v3370_v20 = vpop.f32.mrb[21].mxu0 }
 0x351   : > { %v7835_v30 = vadd.f32 %v3370_v20, %v9246_v52  ;;  %v7513_v40 = vpop.f32.mrb[22].mxu0  ;;  %7540 = vmatprep.mubr.msk.bf16.mxu1 %vm532_vm1, %v9355_v47 }
 0x352   : > { %v3498_v35 = vadd.f32 %v7834_v58, %v9279_v5  ;;  %v7836_v41 = vadd.f32 %v7513_v40, %v9248_v53  ;;  %v3373_v43 = vpop.f32.mrb[23].mxu0 }
 0x353   : > { %v3496_v63 = vadd.f32 %v7835_v30, %v9279_v5  ;;  %v7837_v0 = vadd.f32 %v3373_v43, %v9250_v60  ;;  %7541 = vmatmul.mubr.msk.bf16.gmra.mrb[28].mxu1 %vm532_vm1, %v9361_v31  ;;  %v3695_v45 = vld [vmem:[#allocation3 + $0xd9] sm:$0xff] }
 0x354   : > { %v3534_v42 = vmax.f32 %v3498_v35, 0.0  ;;  %v3499_v52 = vadd.f32 %v7836_v41, %v9279_v5  ;;  %v3693_v22 = vld [vmem:[#allocation3 + $0xc1] sm:$0xff] }
 0x355   : > { %v3532_v6 = vmax.f32 %v3496_v63, 0.0  ;;  %v3497_v13 = vadd.f32 %v7837_v0, %v9279_v5  ;;  %v3696_v53 = vld [vmem:[#allocation3 + $0xe1] sm:$0xff] }
 0x356   : > { %3606 = vst.msk [vmem:[#allocation3 + $0x109] sm:$0xff] %vm532_vm1, %v3534_v42  ;;  %v3535_v17 = vmax.f32 %v3499_v52, 0.0  ;;  %v3694_v27 = vld [vmem:[#allocation3 + $0xc9] sm:$0xff]  ;;  %v9381_v57 = vpack.c.bf16 %v3696_v53, %v3695_v45 }
 0x357   : > { %3604 = vst.msk [vmem:[#allocation3 + $0xf1] sm:$0xff] %vm532_vm1, %v3532_v6  ;;  %v3533_v28 = vmax.f32 %v3497_v13, 0.0  ;;  %v7516_v34 = vpop.f32.mrb[24].mxu0  ;;  %v9373_v60 = vpack.c.bf16 %v3694_v27, %v3693_v22 }
 0x358   : > { %3607 = vst.msk [vmem:[#allocation3 + $0x111] sm:$0xff] %vm532_vm1, %v3535_v17  ;;  %v7838_v37 = vadd.f32 %v7516_v34, %v9252_v61  ;;  %v3386_v44 = vpop.f32.mrb[25].mxu0 }
 0x359   : > { %3605 = vst.msk [vmem:[#allocation3 + $0xf9] sm:$0xff] %vm532_vm1, %v3533_v28  ;;  %v7839_v50 = vadd.f32 %v3386_v44, %v9254_v9  ;;  %v7517_v51 = vpop.f32.mrb[26].mxu0  ;;  %7544 = vmatprep.mubr.msk.bf16.mxu1 %vm532_vm1, %v9373_v60 }
 0x35a   : > { %v3502_v62 = vadd.f32 %v7838_v37, %v9279_v5  ;;  %v7840_v1 = vadd.f32 %v7517_v51, %v9256_v10  ;;  %v3389_v8 = vpop.f32.mrb[27].mxu0 }
 0x35b   : > { %v3500_v33 = vadd.f32 %v7839_v50, %v9279_v5  ;;  %v7841_v61 = vadd.f32 %v3389_v8, %v9258_v29  ;;  %7545 = vmatmul.mubr.msk.bf16.gmra.mrb[32].mxu1 %vm532_vm1, %v9381_v57 }
 0x35c   : > { %v3538_v46 = vmax.f32 %v3502_v62, 0.0  ;;  %v3503_v9 = vadd.f32 %v7840_v1, %v9279_v5 }
 0x35d   : > { %v3536_v48 = vmax.f32 %v3500_v33, 0.0  ;;  %v3501_v54 = vadd.f32 %v7841_v61, %v9279_v5  ;;  %v3699_v20 = vld [vmem:[#allocation3 + $0x109] sm:$0xff]  ;;  %v3628_v33 = vld [vmem:[#allocation3] sm:$0xff] }
 0x35e   : > { %3610 = vst.msk [vmem:[#allocation3 + $0x139] sm:$0xff] %vm532_vm1, %v3538_v46  ;;  %v3539_v55 = vmax.f32 %v3503_v9, 0.0  ;;  %v3697_v11 = vld [vmem:[#allocation3 + $0xf1] sm:$0xff]  ;;  %v3629_v61 = vld [vmem:[#allocation3 + $0x8] sm:$0xff] }
 0x35f   : > { %3608 = vst.msk [vmem:[#allocation3 + $0x121] sm:$0xff] %vm532_vm1, %v3536_v48  ;;  %v3537_v10 = vmax.f32 %v3501_v54, 0.0  ;;  %v7520_v12 = vpop.f32.mrb[28].mxu0  ;;  %v3700_v4 = vld [vmem:[#allocation3 + $0x111] sm:$0xff] }
 0x360   : > { %3611 = vst.msk [vmem:[#allocation3 + $0x141] sm:$0xff] %vm532_vm1, %v3539_v55  ;;  %v7842_v29 = vadd.f32 %v7520_v12, %v9260_v32  ;;  %v3402_v23 = vpop.f32.mrb[29].mxu0  ;;  %v3698_v16 = vld [vmem:[#allocation3 + $0xf9] sm:$0xff]  ;;  %v9401_v35 = vpack.c.bf16 %v3700_v4, %v3699_v20  ;;  %v3660_v55 = vpack.c.bf16 %v3629_v61, %v3628_v33  ;;  %v3634_v20 = vld [vmem:[#allocation3 + $0x48] sm:$0xff] }
 0x361   : > { %3609 = vst.msk [vmem:[#allocation3 + $0x129] sm:$0xff] %vm532_vm1, %v3537_v10  ;;  %v7843_v21 = vadd.f32 %v3402_v23, %v9262_v59  ;;  %v7521_v18 = vpop.f32.mrb[30].mxu0  ;;  %v9397_v58 = vpack.c.bf16 %v3698_v16, %v3697_v11  ;;  %v3631_v12 = vld [vmem:[#allocation3 + $0x20] sm:$0xff]  ;;  %v3633_v4 = vld [vmem:[#allocation3 + $0x38] sm:$0xff]  ;;  %v4250_v23 = vsel %vm771_vm0, %v9312_v26, 0  ;;  %v3632_v11 = vld [vmem:[#allocation3 + $0x30] sm:$0xff] }
 0x362   : > { %v3506_v15 = vadd.f32 %v7842_v29, %v9279_v5  ;;  %v7844_v30 = vadd.f32 %v7521_v18, %v9264_v3  ;;  %v3405_v40 = vpop.f32.mrb[31].mxu0  ;;  %v3630_v29 = vld [vmem:[#allocation3 + $0x18] sm:$0xff]  ;;  %v9452_v16 = vpack.c.bf16 %v3633_v4, %v3632_v11  ;;  %v3635_v18 = vld [vmem:[#allocation3 + $0x50] sm:$0xff]  ;;  %v3637_v26 = vld [vmem:[#allocation3 + $0x68] sm:$0xff] }
 0x363   : > { %v3504_v32 = vadd.f32 %v7843_v21, %v9279_v5  ;;  %v7845_v41 = vadd.f32 %v3405_v40, %v9266_v14  ;;  %7548 = vmatprep.mubr.msk.bf16.mxu1 %vm532_vm1, %v9397_v58  ;;  %v9457_v21 = vld [vmem:[%s9946_s5 + $0x6] sm:$0x3]  ;;  %v4153_v4 = vld [vmem:[#allocation3 + $0x1a] sm:$0xff] }
 0x364   : > { %v3542_v43 = vmax.f32 %v3506_v15, 0.0  ;;  %v3507_v59 = vadd.f32 %v7844_v30, %v9279_v5  ;;  %7549 = vmatmul.mubr.msk.bf16.gmra.mrb[36].mxu1 %vm532_vm1, %v9401_v35  ;;  %v9465_v15 = vpack.c.bf16 %v3635_v18, %v3634_v20  ;;  %v3636_v30 = vld [vmem:[#allocation3 + $0x60] sm:$0xff] }
 0x365   : > { %v3540_v63 = vmax.f32 %v3504_v32, 0.0  ;;  %v3505_v0 = vadd.f32 %v7845_v41, %v9279_v5  ;;  %v3703_v34 = vld [vmem:[#allocation3 + $0x139] sm:$0xff]  ;;  %v9467_v40 = vpack.c.bf16 %v3637_v26, %v3636_v30  ;;  %v4545_v26 = vsel %vm771_vm0, %v9457_v21, 0  ;;  %v6767_v30 = vld [vmem:[%s9946_s5 + $0x8] sm:$0x3] }
 0x366   : > { %3614 = vst.msk [vmem:[#allocation3 + $0x169] sm:$0xff] %vm532_vm1, %v3542_v43  ;;  %v3543_v3 = vmax.f32 %v3507_v59, 0.0  ;;  %v3701_v17 = vld [vmem:[#allocation3 + $0x121] sm:$0xff]  ;;  %v3641_v41 = vld [vmem:[#allocation3 + $0x98] sm:$0xff] }
 0x367   : > { %3612 = vst.msk [vmem:[#allocation3 + $0x151] sm:$0xff] %vm532_vm1, %v3540_v63  ;;  %v3541_v42 = vmax.f32 %v3505_v0, 0.0  ;;  %v7524_v52 = vpop.f32.mrb[32].mxu0  ;;  %v3704_v14 = vld [vmem:[#allocation3 + $0x141] sm:$0xff]  ;;  %v3638_v43 = vld [vmem:[#allocation3 + $0x78] sm:$0xff]  ;;  %v3640_v63 = vld [vmem:[#allocation3 + $0x90] sm:$0xff] }
 0x368   : > { %3615 = vst.msk [vmem:[#allocation3 + $0x171] sm:$0xff] %vm532_vm1, %v3543_v3  ;;  %v7846_v6 = vadd.f32 %v7524_v52, %v9268_v24  ;;  %v3418_v13 = vpop.f32.mrb[33].mxu0  ;;  %v3702_v22 = vld [vmem:[#allocation3 + $0x129] sm:$0xff]  ;;  %v9421_v50 = vpack.c.bf16 %v3704_v14, %v3703_v34  ;;  %v3639_v32 = vld [vmem:[#allocation3 + $0x80] sm:$0xff]  ;;  %v9475_v0 = vpack.c.bf16 %v3641_v41, %v3640_v63  ;;  %v4158_v41 = vld [vmem:[#allocation3 + $0x52] sm:$0xff] }
 0x369   : > { %3613 = vst.msk [vmem:[#allocation3 + $0x159] sm:$0xff] %vm532_vm1, %v3541_v42  ;;  %v7847_v27 = vadd.f32 %v3418_v13, %v9270_v25  ;;  %v7525_v53 = vpop.f32.mrb[34].mxu0  ;;  %v9417_v28 = vpack.c.bf16 %v3702_v22, %v3701_v17  ;;  %v9473_v59 = vpack.c.bf16 %v3639_v32, %v3638_v43  ;;  %v3643_v3 = vld [vmem:[#allocation3 + $0xb0] sm:$0xff]  ;;  %v3645_v42 = vld [vmem:[#allocation3 + $0xc8] sm:$0xff]  ;;  %v3647_v17 = vld [vmem:[#allocation3 + $0xe0] sm:$0xff] }
 0x36a   : > { %v3510_v37 = vadd.f32 %v7846_v6, %v9279_v5  ;;  %v7848_v44 = vadd.f32 %v7525_v53, %v9272_v39  ;;  %v3421_v45 = vpop.f32.mrb[35].mxu0  ;;  %v3642_v52 = vld [vmem:[#allocation3 + $0xa8] sm:$0xff]  ;;  %v3644_v6 = vld [vmem:[#allocation3 + $0xc0] sm:$0xff]  ;;  %v3649_v22 = vld [vmem:[#allocation3 + $0xf8] sm:$0xff] }
 0x36b   : > { %v3508_v24 = vadd.f32 %v7847_v27, %v9279_v5  ;;  %v7849_v51 = vadd.f32 %v3421_v45, %v9274_v49  ;;  %7552 = vmatprep.mubr.msk.bf16.mxu1 %vm532_vm1, %v9417_v28  ;;  %v9481_v14 = vpack.c.bf16 %v3643_v3, %v3642_v52  ;;  %v9483_v13 = vpack.c.bf16 %v3645_v42, %v3644_v6  ;;  %v3646_v27 = vld [vmem:[#allocation3 + $0xd8] sm:$0xff]  ;;  %v3648_v34 = vld [vmem:[#allocation3 + $0xf0] sm:$0xff]  ;;  %v3653_v45 = vld [vmem:[#allocation3 + $0x128] sm:$0xff] }
 0x36c   : > { %v3546_v62 = vmax.f32 %v3510_v37, 0.0  ;;  %v3511_v25 = vadd.f32 %v7848_v44, %v9279_v5  ;;  %7553 = vmatmul.mubr.msk.bf16.gmra.mrb[40].mxu1 %vm532_vm1, %v9421_v50  ;;  %v9489_v53 = vpack.c.bf16 %v3647_v17, %v3646_v27  ;;  %v9491_v37 = vpack.c.bf16 %v3649_v22, %v3648_v34  ;;  %v3651_v44 = vld [vmem:[#allocation3 + $0x110] sm:$0xff]  ;;  %v4156_v11 = vld [vmem:[#allocation3 + $0x3a] sm:$0xff]  ;;  %v4159_v43 = vld [vmem:[#allocation3 + $0x62] sm:$0xff] }
 0x36d   : > { %v3544_v1 = vmax.f32 %v3508_v24, 0.0  ;;  %v3509_v8 = vadd.f32 %v7849_v51, %v9279_v5  ;;  %v3707_v54 = vld [vmem:[#allocation3 + $0x169] sm:$0xff]  ;;  %v4161_v42 = vld [vmem:[#allocation3 + $0x7a] sm:$0xff]  ;;  %v4163_v6 = vld [vmem:[#allocation3 + $0x92] sm:$0xff] }
 0x36e   : > { %3618 = vst.msk [vmem:[#allocation3 + $0x199] sm:$0xff] %vm532_vm1, %v3546_v62  ;;  %v3547_v39 = vmax.f32 %v3511_v25, 0.0  ;;  %v3705_v9 = vld [vmem:[#allocation3 + $0x151] sm:$0xff]  ;;  %v3650_v24 = vld [vmem:[#allocation3 + $0x108] sm:$0xff]  ;;  %v3652_v62 = vld [vmem:[#allocation3 + $0x120] sm:$0xff] }
 0x36f   : > { %3626 = vst.msk [vmem:[#allocation3 + $0x199] sm:$0xff] %vm532_vm1, %v8446_v2  ;;  %3616 = vst.msk [vmem:[#allocation3 + $0x181] sm:$0xff] %vm532_vm1, %v3544_v1  ;;  %v3545_v49 = vmax.f32 %v3509_v8, 0.0  ;;  %v3708_v46 = vld [vmem:[#allocation3 + $0x171] sm:$0xff]  ;;  %v9497_v51 = vpack.c.bf16 %v3651_v44, %v3650_v24  ;;  %v9499_v25 = vpack.c.bf16 %v3653_v45, %v3652_v62  ;;  %v3655_v1 = vld [vmem:[#allocation3 + $0x140] sm:$0xff] }
 0x370   : > { %3619 = vst.msk [vmem:[#allocation3 + $0x1a1] sm:$0xff] %vm532_vm1, %v3547_v39  ;;  %v3706_v48 = vld [vmem:[#allocation3 + $0x159] sm:$0xff]  ;;  %v9441_v10 = vpack.c.bf16 %v3708_v46, %v3707_v54  ;;  %v3656_v61 = vld [vmem:[#allocation3 + $0x150] sm:$0xff]  ;;  %v4151_v46 = vld [vmem:[#allocation3 + $0x2] sm:$0xff] }
 0x371   : > { %3627 = vst.msk [vmem:[#allocation3 + $0x1a1] sm:$0xff] %vm532_vm1, %v8446_v2  ;;  %3617 = vst.msk [vmem:[#allocation3 + $0x189] sm:$0xff] %vm532_vm1, %v3545_v49  ;;  %v9439_v5 = vpack.c.bf16 %v3706_v48, %v3705_v9  ;;  %v9448_v2 = vpack.c.bf16 %v3631_v12, %v3630_v29  ;;  %v3657_v8 = vld [vmem:[#allocation3 + $0x158] sm:$0xff]  ;;  %v4152_v9 = vld [vmem:[#allocation3 + $0xa] sm:$0xff] }
 0x372   : > { %v3654_v39 = vld [vmem:[#allocation3 + $0x138] sm:$0xff]  ;;  %v9507_v49 = vpack.c.bf16 %v3657_v8, %v3656_v61  ;;  %v3659_v48 = vld [vmem:[#allocation3 + $0x170] sm:$0xff]  ;;  %v3658_v54 = vld [vmem:[#allocation3 + $0x168] sm:$0xff] }
 0x373   : > { %7556 = vmatprep.mubr.msk.bf16.mxu1 %vm532_vm1, %v9439_v5  ;;  %v9505_v33 = vpack.c.bf16 %v3655_v1, %v3654_v39  ;;  %v9513_v12 = vpack.c.bf16 %v3659_v48, %v3658_v54  ;;  %v4154_v29 = vld [vmem:[#allocation3 + $0x22] sm:$0xff]  ;;  %v4157_v32 = vld [vmem:[#allocation3 + $0x4a] sm:$0xff]  ;;  %v4164_v17 = vld [vmem:[#allocation3 + $0x9a] sm:$0xff] }
 0x374   : > { %7557 = vmatmul.mubr.msk.bf16.gmra.mrb[44].mxu1 %vm532_vm1, %v9441_v10  ;;  %v9518_v18 = vpack.c.bf16 %v4154_v29, %v4153_v4  ;;  %v4160_v63 = vld [vmem:[#allocation3 + $0x6a] sm:$0xff]  ;;  %v4162_v52 = vld [vmem:[#allocation3 + $0x82] sm:$0xff]  ;;  %v9542_v27 = vpack.c.bf16 %v4164_v17, %v4163_v6  ;;  %v4166_v44 = vld [vmem:[#allocation3 + $0xb2] sm:$0xff] }
 0x375   : > { %7562 = vmatprep.mubr.msk.bf16.mxu1 %vm532_vm1, %v3660_v55  ;;  %v4183_v55 = vpack.c.bf16 %v4152_v9, %v4151_v46  ;;  %v9534_v3 = vpack.c.bf16 %v4160_v63, %v4159_v43  ;;  %v9540_v22 = vpack.c.bf16 %v4162_v52, %v4161_v42  ;;  %v4165_v34 = vld [vmem:[#allocation3 + $0xaa] sm:$0xff]  ;;  %v4167_v45 = vld [vmem:[#allocation3 + $0xc2] sm:$0xff]  ;;  %v4169_v8 = vld [vmem:[#allocation3 + $0xda] sm:$0xff] }
 0x376   : > { %v4168_v24 = vld [vmem:[#allocation3 + $0xca] sm:$0xff]  ;;  %v9548_v62 = vpack.c.bf16 %v4166_v44, %v4165_v34  ;;  %v4170_v39 = vld [vmem:[#allocation3 + $0xe2] sm:$0xff]  ;;  %v4171_v61 = vld [vmem:[#allocation3 + $0xf2] sm:$0xff]  ;;  %v4839_v34 = vsel %vm771_vm0, %v6767_v30, 0 }
 0x377   : > { %v9550_v1 = vpack.c.bf16 %v4168_v24, %v4167_v45  ;;  %v4172_v46 = vld [vmem:[#allocation3 + $0xfa] sm:$0xff]  ;;  %v9556_v9 = vpack.c.bf16 %v4170_v39, %v4169_v8  ;;  %v4173_v54 = vld [vmem:[#allocation3 + $0x10a] sm:$0xff]  ;;  %v4175_v4 = vld [vmem:[#allocation3 + $0x122] sm:$0xff] }
 0x378   : > { %v9558_v48 = vpack.c.bf16 %v4172_v46, %v4171_v61  ;;  %v4176_v29 = vld [vmem:[#allocation3 + $0x12a] sm:$0xff]  ;;  %v4180_v43 = vld [vmem:[#allocation3 + $0x15a] sm:$0xff]  ;;  %v4182_v6 = vld [vmem:[#allocation3 + $0x172] sm:$0xff] }
 0x379   : > { %v4181_v52 = vld [vmem:[#allocation3 + $0x16a] sm:$0xff]  ;;  %v5632_v39 = vld [vmem:[#allocation3 + $0x99] sm:$0xff] }
 0x37a   : > { %v9580_v17 = vpack.c.bf16 %v4182_v6, %v4181_v52  ;;  %v6784_v44 = vld [vmem:[%s9946_s5 + $0xa] sm:$0x3]  ;;  %v6801_v8 = vld [vmem:[%s9946_s5 + $0xc] sm:$0x3]  ;;  %v5629_v61 = vld [vmem:[#allocation3 + $0x79] sm:$0xff] }
 0x37b   : > { %v5133_v24 = vsel %vm771_vm0, %v6784_v44, 0  ;;  %v5638_v52 = vld [vmem:[#allocation3 + $0xe1] sm:$0xff]  ;;  %v5637_v6 = vld [vmem:[#allocation3 + $0xd9] sm:$0xff] }
 0x37c   : > { %7563 = vmatmul.mubr.msk.bf16.vlgmr.msra.gmra.mrb[16].mxu1 %vm532_vm1, %v9448_v2 }
 0x37d   : > { %7595 = vmatpush3.bf16.msra.mxu1 %v4250_v23  ;;  %7566 = vmatprep.mubr.msk.bf16.mxu1 %vm532_vm1, %v9452_v16  ;;  %v4155_v23 = vld [vmem:[#allocation3 + $0x32] sm:$0xff] }
 0x37e   : > { %8391 = vmatprep.subr.msk.bf16.mxu1 %vm771_vm0, %v9457_v21  ;;  %v9522_v20 = vpack.c.bf16 %v4156_v11, %v4155_v23  ;;  %v9532_v21 = vpack.c.bf16 %v4158_v41, %v4157_v32  ;;  %v9566_v11 = vpack.c.bf16 %v4176_v29, %v4175_v4  ;;  %v4178_v32 = vld [vmem:[#allocation3 + $0x142] sm:$0xff]  ;;  %v4179_v41 = vld [vmem:[#allocation3 + $0x152] sm:$0xff] }
 0x37f   : > { %v9574_v42 = vpack.c.bf16 %v4180_v43, %v4179_v41  ;;  %v5634_v4 = vld [vmem:[#allocation3 + $0xb1] sm:$0xff]  ;;  %v5636_v29 = vld [vmem:[#allocation3 + $0xc9] sm:$0xff]  ;;  %v5635_v41 = vld [vmem:[#allocation3 + $0xc1] sm:$0xff] }
 0x380   : > { %v5661_v43 = vpack.c.bf16 %v5636_v29, %v5635_v41 }
 0x384   : > { %7567 = vmatmul.mubr.msk.bf16.gmra.mrb[20].mxu1 %vm532_vm1, %v9465_v15 }
 0x385   : > { %7570 = vmatprep.mubr.msk.bf16.mxu1 %vm532_vm1, %v9467_v40 }
 0x38c   : > { %7571 = vmatmul.mubr.msk.bf16.gmra.mrb[24].mxu1 %vm532_vm1, %v9473_v59 }
 0x38d   : > { %7574 = vmatprep.mubr.msk.bf16.mxu1 %vm532_vm1, %v9475_v0 }
 0x394   : > { %7575 = vmatmul.mubr.msk.bf16.gmra.mrb[28].mxu1 %vm532_vm1, %v9481_v14 }
 0x395   : > { %7578 = vmatprep.mubr.msk.bf16.mxu1 %vm532_vm1, %v9483_v13 }
 0x39c   : > { %7579 = vmatmul.mubr.msk.bf16.gmra.mrb[32].mxu1 %vm532_vm1, %v9489_v53 }
 0x39d   : > { %7582 = vmatprep.mubr.msk.bf16.mxu1 %vm532_vm1, %v9491_v37 }
 0x3a4   : > { %7583 = vmatmul.mubr.msk.bf16.gmra.mrb[36].mxu1 %vm532_vm1, %v9497_v51 }
 0x3a5   : > { %7586 = vmatprep.mubr.msk.bf16.mxu1 %vm532_vm1, %v9499_v25 }
 0x3ac   : > { %7587 = vmatmul.mubr.msk.bf16.gmra.mrb[40].mxu1 %vm532_vm1, %v9505_v33 }
 0x3ad   : > { %7590 = vmatprep.mubr.msk.bf16.mxu1 %vm532_vm1, %v9507_v49 }
 0x3b4   : > { %7591 = vmatmul.mubr.msk.bf16.gmra.mrb[44].mxu1 %vm532_vm1, %v9513_v12 }
 0x3b5   : > { %7596 = vmatprep.mubr.msk.bf16.mxu1 %vm532_vm1, %v4183_v55  ;;  %v4174_v55 = vld [vmem:[#allocation3 + $0x112] sm:$0xff] }
 0x3b6   : > { %v9564_v23 = vpack.c.bf16 %v4174_v55, %v4173_v54  ;;  %v5631_v54 = vld [vmem:[#allocation3 + $0x91] sm:$0xff] }
 0x3b7   : > { %v5659_v55 = vpack.c.bf16 %v5632_v39, %v5631_v54 }
 0x3bc   : > { %7597 = vmatmul.mubr.msk.bf16.vlgmr.msra.gmra.mrb[16].mxu1 %vm532_vm1, %v9518_v18 }
 0x3bd   : > { %7629 = vmatpush3.bf16.msra.mxu1 %v4545_v26  ;;  %7600 = vmatprep.mubr.msk.bf16.mxu1 %vm532_vm1, %v9522_v20  ;;  %v4177_v26 = vld [vmem:[#allocation3 + $0x13a] sm:$0xff] }
 0x3be   : > { %8392 = vmatprep.subr.msk.bf16.mxu1 %vm771_vm0, %v6767_v30  ;;  %v9572_v63 = vpack.c.bf16 %v4178_v32, %v4177_v26  ;;  %v4476_v30 = vld [vmem:[#allocation3 + $0x180] sm:$0xff]  ;;  %v5633_v26 = vld [vmem:[#allocation3 + $0xa9] sm:$0xff] }
 0x3bf   : > { %v5660_v32 = vpack.c.bf16 %v5634_v4, %v5633_v26 }
 0x3c4   : > { %7601 = vmatmul.mubr.msk.bf16.gmra.mrb[20].mxu1 %vm532_vm1, %v9532_v21 }
 0x3c5   : > { %7604 = vmatprep.mubr.msk.bf16.mxu1 %vm532_vm1, %v9534_v3 }
 0x3cc   : > { %7605 = vmatmul.mubr.msk.bf16.gmra.mrb[24].mxu1 %vm532_vm1, %v9540_v22 }
 0x3cd   : > { %7608 = vmatprep.mubr.msk.bf16.mxu1 %vm532_vm1, %v9542_v27 }
 0x3d4   : > { %7609 = vmatmul.mubr.msk.bf16.gmra.mrb[28].mxu1 %vm532_vm1, %v9548_v62 }
 0x3d5   : > { %7612 = vmatprep.mubr.msk.bf16.mxu1 %vm532_vm1, %v9550_v1 }
 0x3dc   : > { %7613 = vmatmul.mubr.msk.bf16.gmra.mrb[32].mxu1 %vm532_vm1, %v9556_v9 }
 0x3dd   : > { %7616 = vmatprep.mubr.msk.bf16.mxu1 %vm532_vm1, %v9558_v48 }
 0x3e4   : > { %7617 = vmatmul.mubr.msk.bf16.gmra.mrb[36].mxu1 %vm532_vm1, %v9564_v23 }
 0x3e5   : > { %7620 = vmatprep.mubr.msk.bf16.mxu1 %vm532_vm1, %v9566_v11 }
 0x3ec   : > { %7621 = vmatmul.mubr.msk.bf16.gmra.mrb[40].mxu1 %vm532_vm1, %v9572_v63 }
 0x3ed   : > { %7624 = vmatprep.mubr.msk.bf16.mxu1 %vm532_vm1, %v9574_v42 }
 0x3f4   : > { %7625 = vmatmul.mubr.msk.bf16.gmra.mrb[44].mxu1 %vm532_vm1, %v9580_v17 }
 0x3f5   : > { %7630 = vmatprep.mubr.msk.bf16.mxu1 %vm532_vm1, %v9448_v2  ;;  %v4477_v2 = vld [vmem:[#allocation3 + $0x188] sm:$0xff] }
 0x3f6   : > { %v9619_v45 = vpack.c.bf16 %v4477_v2, %v4476_v30 }
 0x3fc   : > { %7631 = vmatmul.mubr.msk.bf16.vlgmr.msra.gmra.mrb[16].mxu1 %vm532_vm1, %v9452_v16 }
 0x3fd   : > { %7663 = vmatpush3.bf16.msra.mxu1 %v4839_v34  ;;  %7634 = vmatprep.mubr.msk.bf16.mxu1 %vm532_vm1, %v9465_v15  ;;  %v5662_v34 = vpack.c.bf16 %v5638_v52, %v5637_v6 }
 0x3fe   : > { %8393 = vmatprep.subr.msk.bf16.mxu1 %vm771_vm0, %v6784_v44  ;;  %v5653_v44 = vld [vmem:[#allocation3 + $0x199] sm:$0xff] }
 0x404   : > { %7635 = vmatmul.mubr.msk.bf16.gmra.mrb[20].mxu1 %vm532_vm1, %v9467_v40 }
 0x405   : > { %7638 = vmatprep.mubr.msk.bf16.mxu1 %vm532_vm1, %v9473_v59 }
 0x40c   : > { %7639 = vmatmul.mubr.msk.bf16.gmra.mrb[24].mxu1 %vm532_vm1, %v9475_v0 }
 0x40d   : > { %7642 = vmatprep.mubr.msk.bf16.mxu1 %vm532_vm1, %v9481_v14 }
 0x414   : > { %7643 = vmatmul.mubr.msk.bf16.gmra.mrb[28].mxu1 %vm532_vm1, %v9483_v13 }
 0x415   : > { %7646 = vmatprep.mubr.msk.bf16.mxu1 %vm532_vm1, %v9489_v53 }
 0x41c   : > { %7647 = vmatmul.mubr.msk.bf16.gmra.mrb[32].mxu1 %vm532_vm1, %v9491_v37 }
 0x41d   : > { %7650 = vmatprep.mubr.msk.bf16.mxu1 %vm532_vm1, %v9497_v51 }
 0x424   : > { %7651 = vmatmul.mubr.msk.bf16.gmra.mrb[36].mxu1 %vm532_vm1, %v9499_v25 }
 0x425   : > { %7654 = vmatprep.mubr.msk.bf16.mxu1 %vm532_vm1, %v9505_v33 }
 0x42c   : > { %7655 = vmatmul.mubr.msk.bf16.gmra.mrb[40].mxu1 %vm532_vm1, %v9507_v49 }
 0x42d   : > { %7658 = vmatprep.mubr.msk.bf16.mxu1 %vm532_vm1, %v9513_v12 }
 0x434   : > { %7659 = vmatmul.mubr.msk.bf16.gmra.mrb[44].mxu1 %vm532_vm1, %v9619_v45 }
 0x435   : > { %7664 = vmatprep.mubr.msk.bf16.mxu1 %vm532_vm1, %v9303_v7  ;;  %v4771_v7 = vld [vmem:[#allocation3 + $0x189] sm:$0xff] }
 0x43c   : > { %7665 = vmatmul.mubr.msk.bf16.vlgmr.msra.gmra.mrb[16].mxu1 %vm532_vm1, %v9323_v36  ;;  %v4770_v36 = vld [vmem:[#allocation3 + $0x181] sm:$0xff] }
 0x43d   : > { %7697 = vmatpush3.bf16.msra.mxu1 %v5133_v24  ;;  %7668 = vmatprep.mubr.msk.bf16.mxu1 %vm532_vm1, %v9329_v19  ;;  %v9658_v19 = vpack.c.bf16 %v4771_v7, %v4770_v36 }
 0x43e   : > { %8394 = vmatprep.subr.msk.bf16.mxu1 %vm771_vm0, %v6801_v8 }
 0x444   : > { %7669 = vmatmul.mubr.msk.bf16.gmra.mrb[20].mxu1 %vm532_vm1, %v9339_v56  ;;  %v5428_v56 = vsel %vm771_vm0, %v6801_v8, 0 }
 0x445   : > { %7672 = vmatprep.mubr.msk.bf16.mxu1 %vm532_vm1, %v9345_v38  ;;  %v6818_v38 = vld [vmem:[%s9946_s5 + $0xe] sm:$0x3] }
 0x44c   : > { %7673 = vmatmul.mubr.msk.bf16.gmra.mrb[24].mxu1 %vm532_vm1, %v9355_v47  ;;  %v5064_v47 = vld [vmem:[#allocation3 + $0x182] sm:$0xff] }
 0x44d   : > { %7676 = vmatprep.mubr.msk.bf16.mxu1 %vm532_vm1, %v9361_v31  ;;  %v5065_v31 = vld [vmem:[#allocation3 + $0x18a] sm:$0xff] }
 0x454   : > { %7677 = vmatmul.mubr.msk.bf16.gmra.mrb[28].mxu1 %vm532_vm1, %v9373_v60  ;;  %v9697_v60 = vpack.c.bf16 %v5065_v31, %v5064_v47  ;;  %v6254_v47 = vld [vmem:[%s8699_s10 + $0x20] sm:$0xff] }
 0x455   : > { %7680 = vmatprep.mubr.msk.bf16.mxu1 %vm532_vm1, %v9381_v57  ;;  %v5722_v57 = vsel %vm771_vm0, %v6818_v38, 0 }
 0x45c   : > { %7681 = vmatmul.mubr.msk.bf16.gmra.mrb[32].mxu1 %vm532_vm1, %v9397_v58 }
 0x45d   : > { %7684 = vmatprep.mubr.msk.bf16.mxu1 %vm532_vm1, %v9401_v35 }
 0x464   : > { %7685 = vmatmul.mubr.msk.bf16.gmra.mrb[36].mxu1 %vm532_vm1, %v9417_v28 }
 0x465   : > { %7688 = vmatprep.mubr.msk.bf16.mxu1 %vm532_vm1, %v9421_v50 }
 0x46c   : > { %7689 = vmatmul.mubr.msk.bf16.gmra.mrb[40].mxu1 %vm532_vm1, %v9439_v5 }
 0x46d   : > { %7692 = vmatprep.mubr.msk.bf16.mxu1 %vm532_vm1, %v9441_v10 }
 0x474   : > { %7693 = vmatmul.mubr.msk.bf16.gmra.mrb[44].mxu1 %vm532_vm1, %v9658_v19 }
 0x475   : > { %7698 = vmatprep.mubr.msk.bf16.mxu1 %vm532_vm1, %v9518_v18  ;;  %v6835_v18 = vld [vmem:[%s9946_s5 + $0x10] sm:$0x3] }
 0x47c   : > { %7699 = vmatmul.mubr.msk.bf16.vlgmr.msra.gmra.mrb[16].mxu1 %vm532_vm1, %v9522_v20 }
 0x47d   : > { %7731 = vmatpush3.bf16.msra.mxu1 %v5428_v56  ;;  %7702 = vmatprep.mubr.msk.bf16.mxu1 %vm532_vm1, %v9532_v21 }
 0x47e   : > { %8395 = vmatprep.subr.msk.bf16.mxu1 %vm771_vm0, %v6818_v38 }
 0x484   : > { %7703 = vmatmul.mubr.msk.bf16.gmra.mrb[20].mxu1 %vm532_vm1, %v9534_v3 }
 0x485   : > { %7706 = vmatprep.mubr.msk.bf16.mxu1 %vm532_vm1, %v9540_v22 }
 0x48c   : > { %7707 = vmatmul.mubr.msk.bf16.gmra.mrb[24].mxu1 %vm532_vm1, %v9542_v27 }
 0x48d   : > { %7710 = vmatprep.mubr.msk.bf16.mxu1 %vm532_vm1, %v9548_v62 }
 0x494   : > { %7711 = vmatmul.mubr.msk.bf16.gmra.mrb[28].mxu1 %vm532_vm1, %v9550_v1 }
 0x495   : > { %7714 = vmatprep.mubr.msk.bf16.mxu1 %vm532_vm1, %v9556_v9 }
 0x49c   : > { %7715 = vmatmul.mubr.msk.bf16.gmra.mrb[32].mxu1 %vm532_vm1, %v9558_v48 }
 0x49d   : > { %7718 = vmatprep.mubr.msk.bf16.mxu1 %vm532_vm1, %v9564_v23 }
 0x4a4   : > { %7719 = vmatmul.mubr.msk.bf16.gmra.mrb[36].mxu1 %vm532_vm1, %v9566_v11 }
 0x4a5   : > { %7722 = vmatprep.mubr.msk.bf16.mxu1 %vm532_vm1, %v9572_v63 }
 0x4ac   : > { %7723 = vmatmul.mubr.msk.bf16.gmra.mrb[40].mxu1 %vm532_vm1, %v9574_v42 }
 0x4ad   : > { %7726 = vmatprep.mubr.msk.bf16.mxu1 %vm532_vm1, %v9580_v17 }
 0x4b4   : > { %7727 = vmatmul.mubr.msk.bf16.gmra.mrb[44].mxu1 %vm532_vm1, %v9697_v60 }
 0x4b5   : > { %7732 = vmatprep.mubr.msk.bf16.mxu1 %vm532_vm1, %v9452_v16  ;;  %v5359_v16 = vld [vmem:[#allocation3 + $0x198] sm:$0xff] }
 0x4bc   : > { %7733 = vmatmul.mubr.msk.bf16.vlgmr.msra.gmra.mrb[16].mxu1 %vm532_vm1, %v9465_v15  ;;  %v5360_v15 = vld [vmem:[#allocation3 + $0x1a0] sm:$0xff] }
 0x4bd   : > { %7765 = vmatpush3.bf16.msra.mxu1 %v5722_v57  ;;  %7736 = vmatprep.mubr.msk.bf16.mxu1 %vm532_vm1, %v9467_v40  ;;  %v5376_v40 = vpack.c.bf16 %v5360_v15, %v5359_v16  ;;  %v6257_v57 = vld [vmem:[%s8699_s10 + $0x38] sm:$0xff] }
 0x4be   : > { %8396 = vmatprep.subr.msk.bf16.mxu1 %vm771_vm0, %v6835_v18 }
 0x4c4   : > { %7737 = vmatmul.mubr.msk.bf16.gmra.mrb[20].mxu1 %vm532_vm1, %v9473_v59  ;;  %v5624_v59 = vld [vmem:[#allocation3 + $0x39] sm:$0xff] }
 0x4c5   : > { %7740 = vmatprep.mubr.msk.bf16.mxu1 %vm532_vm1, %v9475_v0  ;;  %v5623_v0 = vld [vmem:[#allocation3 + $0x31] sm:$0xff] }
 0x4cc   : > { %7741 = vmatmul.mubr.msk.bf16.gmra.mrb[24].mxu1 %vm532_vm1, %v9481_v14  ;;  %v5655_v14 = vpack.c.bf16 %v5624_v59, %v5623_v0 }
 0x4cd   : > { %7744 = vmatprep.mubr.msk.bf16.mxu1 %vm532_vm1, %v9483_v13  ;;  %v5626_v13 = vld [vmem:[#allocation3 + $0x51] sm:$0xff] }
 0x4d4   : > { %7745 = vmatmul.mubr.msk.bf16.gmra.mrb[28].mxu1 %vm532_vm1, %v9489_v53  ;;  %v5628_v53 = vld [vmem:[#allocation3 + $0x69] sm:$0xff] }
 0x4d5   : > { %7748 = vmatprep.mubr.msk.bf16.mxu1 %vm532_vm1, %v9491_v37  ;;  %v5625_v37 = vld [vmem:[#allocation3 + $0x49] sm:$0xff] }
 0x4dc   : > { %7749 = vmatmul.mubr.msk.bf16.gmra.mrb[32].mxu1 %vm532_vm1, %v9497_v51  ;;  %v5656_v51 = vpack.c.bf16 %v5626_v13, %v5625_v37 }
 0x4dd   : > { %7752 = vmatprep.mubr.msk.bf16.mxu1 %vm532_vm1, %v9499_v25  ;;  %v6016_v25 = vsel %vm771_vm0, %v6835_v18, 0 }
 0x4e4   : > { %7753 = vmatmul.mubr.msk.bf16.gmra.mrb[36].mxu1 %vm532_vm1, %v9505_v33  ;;  %v5627_v33 = vld [vmem:[#allocation3 + $0x61] sm:$0xff] }
 0x4e5   : > { %7756 = vmatprep.mubr.msk.bf16.mxu1 %vm532_vm1, %v9507_v49  ;;  %v5657_v49 = vpack.c.bf16 %v5628_v53, %v5627_v33 }
 0x4ec   : > { %7757 = vmatmul.mubr.msk.bf16.gmra.mrb[40].mxu1 %vm532_vm1, %v9513_v12  ;;  %v5630_v12 = vld [vmem:[#allocation3 + $0x81] sm:$0xff] }
 0x4ed   : > { %7760 = vmatprep.mubr.msk.bf16.mxu1 %vm532_vm1, %v9619_v45  ;;  %v5658_v46 = vpack.c.bf16 %v5630_v12, %v5629_v61  ;;  %v6258_v61 = vld [vmem:[%s8699_s10 + $0x40] sm:$0xff] }
 0x4f4   : > { %7761 = vmatmul.mubr.msk.bf16.gmra.mrb[44].mxu1 %vm532_vm1, %v5376_v40  ;;  %v6255_v40 = vld [vmem:[%s8699_s10 + $0x28] sm:$0xff] }
 0x4f5   : > { %7766 = vmatprep.mubr.msk.bf16.mxu1 %vm532_vm1, %v5655_v14 }
 0x4fc   : > { %7767 = vmatmul.mubr.msk.bf16.vlgmr.msra.gmra.mrb[16].mxu1 %vm532_vm1, %v5656_v51 }
 0x4fd   : > { %7799 = vmatpush3.bf16.msra.mxu1 %v6016_v25  ;;  %7770 = vmatprep.mubr.msk.bf16.mxu1 %vm532_vm1, %v5657_v49  ;;  %v6260_v49 = vld [vmem:[%s8699_s10 + $0x50] sm:$0xff] }
 0x504   : > { %7771 = vmatmul.mubr.msk.bf16.gmra.mrb[20].mxu1 %vm532_vm1, %v5658_v46 }
 0x505   : > { %7774 = vmatprep.mubr.msk.bf16.mxu1 %vm532_vm1, %v5659_v55  ;;  %v6261_v55 = vld [vmem:[%s8699_s10 + $0x58] sm:$0xff] }
 0x50c   : > { %7775 = vmatmul.mubr.msk.bf16.gmra.mrb[24].mxu1 %vm532_vm1, %v5660_v32  ;;  %v6259_v32 = vld [vmem:[%s8699_s10 + $0x48] sm:$0xff] }
 0x50d   : > { %7778 = vmatprep.mubr.msk.bf16.mxu1 %vm532_vm1, %v5661_v43 }
 0x514   : > { %7779 = vmatmul.mubr.msk.bf16.gmra.mrb[28].mxu1 %vm532_vm1, %v5662_v34 }
 0x515   : > { %7782 = vmatprep.mubr.msk.bf16.mxu1 %vm532_vm1, %v9397_v58  ;;  %v5654_v58 = vld [vmem:[#allocation3 + $0x1a1] sm:$0xff] }
 0x516   : > { %v5670_v2 = vpack.c.bf16 %v5654_v58, %v5653_v44 }
 0x51c   : > { %7783 = vmatmul.mubr.msk.bf16.gmra.mrb[32].mxu1 %vm532_vm1, %v9401_v35  ;;  %v5947_v35 = vld [vmem:[#allocation3 + $0x19a] sm:$0xff] }
 0x51d   : > { %7786 = vmatprep.mubr.msk.bf16.mxu1 %vm532_vm1, %v9417_v28  ;;  %v5948_v28 = vld [vmem:[#allocation3 + $0x1a2] sm:$0xff] }
 0x524   : > { %7787 = vmatmul.mubr.msk.bf16.gmra.mrb[36].mxu1 %vm532_vm1, %v9421_v50  ;;  %v5964_v50 = vpack.c.bf16 %v5948_v28, %v5947_v35  ;;  %v6264_v28 = vld [vmem:[%s8699_s10 + $0x70] sm:$0xff] }
 0x525   : > { %7790 = vmatprep.mubr.msk.bf16.mxu1 %vm532_vm1, %v9439_v5  ;;  %v9795_v5 = vld [vmem:[%s9947_s6] ss:$0 sm:$0xff] }
 0x52c   : > { %7791 = vmatmul.mubr.msk.bf16.gmra.mrb[40].mxu1 %vm532_vm1, %v9441_v10 }
 0x52d   : > { %7794 = vmatprep.mubr.msk.bf16.mxu1 %vm532_vm1, %v9658_v19  ;;  %v6256_v19 = vld [vmem:[%s8699_s10 + $0x30] sm:$0xff] }
 0x534   : > { %7795 = vmatmul.mubr.msk.bf16.gmra.mrb[44].mxu1 %vm532_vm1, %v5670_v2 }
 0x535   : > { %7800 = vmatprep.mubr.msk.bf16.mxu1 %vm532_vm1, %v9522_v20  ;;  %v6252_v20 = vld [vmem:[%s8699_s10 + $0x10] sm:$0xff] }
 0x53c   : > { %7801 = vmatmul.mubr.msk.bf16.vlgmr.msra.gmra.mrb[16].mxu1 %vm532_vm1, %v9532_v21 }
 0x53d   : > { %7804 = vmatprep.mubr.msk.bf16.mxu1 %vm532_vm1, %v9534_v3 }
 0x544   : > { %7805 = vmatmul.mubr.msk.bf16.gmra.mrb[20].mxu1 %vm532_vm1, %v9540_v22  ;;  %v6250_v22 = vld [vmem:[%s8699_s10] sm:$0xff] }
 0x545   : > { %7808 = vmatprep.mubr.msk.bf16.mxu1 %vm532_vm1, %v9542_v27 }
 0x54c   : > { %7809 = vmatmul.mubr.msk.bf16.gmra.mrb[24].mxu1 %vm532_vm1, %v9548_v62 }
 0x54d   : > { %7812 = vmatprep.mubr.msk.bf16.mxu1 %vm532_vm1, %v9550_v1  ;;  %v6253_v1 = vld [vmem:[%s8699_s10 + $0x18] sm:$0xff] }
 0x554   : > { %7813 = vmatmul.mubr.msk.bf16.gmra.mrb[28].mxu1 %vm532_vm1, %v9556_v9 }
 0x555   : > { %7816 = vmatprep.mubr.msk.bf16.mxu1 %vm532_vm1, %v9558_v48 }
 0x55c   : > { %7817 = vmatmul.mubr.msk.bf16.gmra.mrb[32].mxu1 %vm532_vm1, %v9564_v23 }
 0x55d   : > { %7820 = vmatprep.mubr.msk.bf16.mxu1 %vm532_vm1, %v9566_v11  ;;  %v6251_v11 = vld [vmem:[%s8699_s10 + $0x8] sm:$0xff] }
 0x564   : > { %7821 = vmatmul.mubr.msk.bf16.gmra.mrb[36].mxu1 %vm532_vm1, %v9572_v63 }
 0x565   : > { %7824 = vmatprep.mubr.msk.bf16.mxu1 %vm532_vm1, %v9574_v42 }
 0x56c   : > { %7825 = vmatmul.mubr.msk.bf16.gmra.mrb[40].mxu1 %vm532_vm1, %v9580_v17 }
 0x56d   : > { %7828 = vmatprep.mubr.msk.bf16.mxu1 %vm532_vm1, %v9697_v60 }
 0x574   : > { %7829 = vmatmul.mubr.msk.bf16.gmra.mrb[44].mxu1 %vm532_vm1, %v5964_v50 }
 0x60f   : > { %v7802_v10 = vpop.f32.mrb[16].mxu1 }
 0x610   : > { %v6220_v21 = vadd.f32 %v7802_v10, %v9795_v5  ;;  %v6052_v3 = vpop.f32.mrb[17].mxu1 }
 0x611   : > { %v6218_v27 = vadd.f32 %v9795_v5, %v6052_v3  ;;  %v7803_v62 = vpop.f32.mrb[18].mxu1 }
 0x612   : > { %v6284_v9 = vadd.f32 %v6252_v20, %v6220_v21  ;;  %v6221_v48 = vadd.f32 %v7803_v62, %v9795_v5  ;;  %v6055_v23 = vpop.f32.mrb[19].mxu1  ;;  %v6262_v20 = vld [vmem:[%s8699_s10 + $0x60] sm:$0xff] }
 0x613   : > { %v6282_v63 = vadd.f32 %v6250_v22, %v6218_v27  ;;  %v6219_v42 = vadd.f32 %v9795_v5, %v6055_v23  ;;  %v6265_v22 = vld [vmem:[%s8699_s10 + $0x78] sm:$0xff] }
 0x614   : > { %v6316_v17 = vmax.f32 %v6284_v9, 0.0  ;;  %v6285_v30 = vadd.f32 %v6253_v1, %v6221_v48  ;;  %v6263_v9 = vld [vmem:[%s8699_s10 + $0x68] sm:$0xff] }
 0x615   : > { %v6314_v45 = vmax.f32 %v6282_v63, 0.0  ;;  %v6283_v24 = vadd.f32 %v6251_v11, %v6219_v42 }
 0x616   : > { %6348 = vst.msk [vmem:[%s9809_s11 + $0x10] sm:$0xff] %vm532_vm1, %v6316_v17  ;;  %v6317_v8 = vmax.f32 %v6285_v30, 0.0 }
 0x617   : > { %6346 = vst.msk [vmem:[%s9809_s11] sm:$0xff] %vm532_vm1, %v6314_v45  ;;  %v6315_v7 = vmax.f32 %v6283_v24, 0.0  ;;  %v7806_v36 = vpop.f32.mrb[20].mxu1 }
 0x618   : > { %6349 = vst.msk [vmem:[%s9809_s11 + $0x18] sm:$0xff] %vm532_vm1, %v6317_v8  ;;  %v6224_v56 = vadd.f32 %v7806_v36, %v9795_v5  ;;  %v6068_v38 = vpop.f32.mrb[21].mxu1  ;;  %v6268_v8 = vld [vmem:[%s8699_s10 + $0x90] sm:$0xff] }
 0x619   : > { %6347 = vst.msk [vmem:[%s9809_s11 + $0x8] sm:$0xff] %vm532_vm1, %v6315_v7  ;;  %v6222_v31 = vadd.f32 %v9795_v5, %v6068_v38  ;;  %v7807_v60 = vpop.f32.mrb[22].mxu1 }
 0x61a   : > { %v6288_v18 = vadd.f32 %v6256_v19, %v6224_v56  ;;  %v6225_v16 = vadd.f32 %v7807_v60, %v9795_v5  ;;  %v6071_v15 = vpop.f32.mrb[23].mxu1  ;;  %v6266_v19 = vld [vmem:[%s8699_s10 + $0x80] sm:$0xff] }
 0x61b   : > { %v6286_v59 = vadd.f32 %v6254_v47, %v6222_v31  ;;  %v6223_v0 = vadd.f32 %v9795_v5, %v6071_v15  ;;  %v6269_v47 = vld [vmem:[%s8699_s10 + $0x98] sm:$0xff] }
 0x61c   : > { %v6320_v14 = vmax.f32 %v6288_v18, 0.0  ;;  %v6289_v13 = vadd.f32 %v6257_v57, %v6225_v16  ;;  %v6267_v18 = vld [vmem:[%s8699_s10 + $0x88] sm:$0xff] }
 0x61d   : > { %v6318_v53 = vmax.f32 %v6286_v59, 0.0  ;;  %v6287_v37 = vadd.f32 %v6255_v40, %v6223_v0 }
 0x61e   : > { %6352 = vst.msk [vmem:[%s9809_s11 + $0x30] sm:$0xff] %vm532_vm1, %v6320_v14  ;;  %v6321_v51 = vmax.f32 %v6289_v13, 0.0 }
 0x61f   : > { %6350 = vst.msk [vmem:[%s9809_s11 + $0x20] sm:$0xff] %vm532_vm1, %v6318_v53  ;;  %v6319_v25 = vmax.f32 %v6287_v37, 0.0  ;;  %v7810_v33 = vpop.f32.mrb[24].mxu1 }
 0x620   : > { %6353 = vst.msk [vmem:[%s9809_s11 + $0x38] sm:$0xff] %vm532_vm1, %v6321_v51  ;;  %v6228_v12 = vadd.f32 %v7810_v33, %v9795_v5  ;;  %v6084_v39 = vpop.f32.mrb[25].mxu1  ;;  %v6272_v51 = vld [vmem:[%s8699_s10 + $0xb0] sm:$0xff] }
 0x621   : > { %6351 = vst.msk [vmem:[%s9809_s11 + $0x28] sm:$0xff] %vm532_vm1, %v6319_v25  ;;  %v6226_v46 = vadd.f32 %v9795_v5, %v6084_v39  ;;  %v7811_v54 = vpop.f32.mrb[26].mxu1 }
 0x622   : > { %v6292_v4 = vadd.f32 %v6260_v49, %v6228_v12  ;;  %v6229_v29 = vadd.f32 %v7811_v54, %v9795_v5  ;;  %v6087_v26 = vpop.f32.mrb[27].mxu1  ;;  %v6270_v49 = vld [vmem:[%s8699_s10 + $0xa0] sm:$0xff] }
 0x623   : > { %v6290_v41 = vadd.f32 %v6258_v61, %v6226_v46  ;;  %v6227_v43 = vadd.f32 %v9795_v5, %v6087_v26  ;;  %v6273_v61 = vld [vmem:[%s8699_s10 + $0xb8] sm:$0xff] }
 0x624   : > { %v6324_v52 = vmax.f32 %v6292_v4, 0.0  ;;  %v6293_v6 = vadd.f32 %v6261_v55, %v6229_v29  ;;  %v6271_v4 = vld [vmem:[%s8699_s10 + $0xa8] sm:$0xff] }
 0x625   : > { %v6322_v34 = vmax.f32 %v6290_v41, 0.0  ;;  %v6291_v44 = vadd.f32 %v6259_v32, %v6227_v43 }
 0x626   : > { %6356 = vst.msk [vmem:[%s9809_s11 + $0x50] sm:$0xff] %vm532_vm1, %v6324_v52  ;;  %v6325_v58 = vmax.f32 %v6293_v6, 0.0 }
 0x627   : > { %6354 = vst.msk [vmem:[%s9809_s11 + $0x40] sm:$0xff] %vm532_vm1, %v6322_v34  ;;  %v6323_v2 = vmax.f32 %v6291_v44, 0.0  ;;  %v7814_v35 = vpop.f32.mrb[28].mxu1 }
 0x628   : > { %6357 = vst.msk [vmem:[%s9809_s11 + $0x58] sm:$0xff] %vm532_vm1, %v6325_v58  ;;  %v6232_v50 = vadd.f32 %v7814_v35, %v9795_v5  ;;  %v6100_v10 = vpop.f32.mrb[29].mxu1  ;;  %v6276_v58 = vld [vmem:[%s8699_s10 + $0xd0] sm:$0xff] }
 0x629   : > { %6355 = vst.msk [vmem:[%s9809_s11 + $0x48] sm:$0xff] %vm532_vm1, %v6323_v2  ;;  %v6230_v21 = vadd.f32 %v9795_v5, %v6100_v10  ;;  %v7815_v3 = vpop.f32.mrb[30].mxu1 }
 0x62a   : > { %v6296_v27 = vadd.f32 %v6264_v28, %v6232_v50  ;;  %v6233_v62 = vadd.f32 %v7815_v3, %v9795_v5  ;;  %v6103_v1 = vpop.f32.mrb[31].mxu1  ;;  %v6274_v28 = vld [vmem:[%s8699_s10 + $0xc0] sm:$0xff] }
 0x62b   : > { %v6294_v48 = vadd.f32 %v6262_v20, %v6230_v21  ;;  %v6231_v23 = vadd.f32 %v9795_v5, %v6103_v1  ;;  %v6277_v20 = vld [vmem:[%s8699_s10 + $0xd8] sm:$0xff] }
 0x62c   : > { %v6328_v11 = vmax.f32 %v6296_v27, 0.0  ;;  %v6297_v63 = vadd.f32 %v6265_v22, %v6233_v62  ;;  %v6275_v27 = vld [vmem:[%s8699_s10 + $0xc8] sm:$0xff] }
 0x62d   : > { %v6326_v42 = vmax.f32 %v6294_v48, 0.0  ;;  %v6295_v17 = vadd.f32 %v6263_v9, %v6231_v23 }
 0x62e   : > { %6360 = vst.msk [vmem:[%s9809_s11 + $0x70] sm:$0xff] %vm532_vm1, %v6328_v11  ;;  %v6329_v30 = vmax.f32 %v6297_v63, 0.0 }
 0x62f   : > { %6358 = vst.msk [vmem:[%s9809_s11 + $0x60] sm:$0xff] %vm532_vm1, %v6326_v42  ;;  %v6327_v45 = vmax.f32 %v6295_v17, 0.0  ;;  %v7818_v24 = vpop.f32.mrb[32].mxu1 }
 0x630   : > { %6361 = vst.msk [vmem:[%s9809_s11 + $0x78] sm:$0xff] %vm532_vm1, %v6329_v30  ;;  %v6236_v7 = vadd.f32 %v7818_v24, %v9795_v5  ;;  %v6116_v36 = vpop.f32.mrb[33].mxu1  ;;  %v6280_v30 = vld [vmem:[%s8699_s10 + $0xf0] sm:$0xff] }
 0x631   : > { %6359 = vst.msk [vmem:[%s9809_s11 + $0x68] sm:$0xff] %vm532_vm1, %v6327_v45  ;;  %v6234_v56 = vadd.f32 %v9795_v5, %v6116_v36  ;;  %v7819_v38 = vpop.f32.mrb[34].mxu1 }
 0x632   : > { %v6300_v31 = vadd.f32 %v6268_v8, %v6236_v7  ;;  %v6237_v60 = vadd.f32 %v7819_v38, %v9795_v5  ;;  %v6119_v57 = vpop.f32.mrb[35].mxu1  ;;  %v6278_v8 = vld [vmem:[%s8699_s10 + $0xe0] sm:$0xff] }
 0x633   : > { %v6298_v16 = vadd.f32 %v6266_v19, %v6234_v56  ;;  %v6235_v15 = vadd.f32 %v9795_v5, %v6119_v57  ;;  %v6281_v19 = vld [vmem:[%s8699_s10 + $0xf8] sm:$0xff] }
 0x634   : > { %v6332_v40 = vmax.f32 %v6300_v31, 0.0  ;;  %v6301_v59 = vadd.f32 %v6269_v47, %v6237_v60  ;;  %v6279_v31 = vld [vmem:[%s8699_s10 + $0xe8] sm:$0xff] }
 0x635   : > { %v6330_v0 = vmax.f32 %v6298_v16, 0.0  ;;  %v6299_v14 = vadd.f32 %v6267_v18, %v6235_v15 }
 0x636   : > { %6364 = vst.msk [vmem:[%s9809_s11 + $0x90] sm:$0xff] %vm532_vm1, %v6332_v40  ;;  %v6333_v13 = vmax.f32 %v6301_v59, 0.0 }
 0x637   : > { %6362 = vst.msk [vmem:[%s9809_s11 + $0x80] sm:$0xff] %vm532_vm1, %v6330_v0  ;;  %v6331_v53 = vmax.f32 %v6299_v14, 0.0  ;;  %v7822_v37 = vpop.f32.mrb[36].mxu1 }
 0x638   : > { %6365 = vst.msk [vmem:[%s9809_s11 + $0x98] sm:$0xff] %vm532_vm1, %v6333_v13  ;;  %v6240_v25 = vadd.f32 %v7822_v37, %v9795_v5  ;;  %v6132_v33 = vpop.f32.mrb[37].mxu1 }
 0x639   : > { %6363 = vst.msk [vmem:[%s9809_s11 + $0x88] sm:$0xff] %vm532_vm1, %v6331_v53  ;;  %v6238_v12 = vadd.f32 %v9795_v5, %v6132_v33  ;;  %v7823_v39 = vpop.f32.mrb[38].mxu1 }
 0x63a   : > { %v6304_v46 = vadd.f32 %v6272_v51, %v6240_v25  ;;  %v6241_v54 = vadd.f32 %v7823_v39, %v9795_v5  ;;  %v6135_v55 = vpop.f32.mrb[39].mxu1 }
 0x63b   : > { %v6302_v29 = vadd.f32 %v6270_v49, %v6238_v12  ;;  %v6239_v26 = vadd.f32 %v9795_v5, %v6135_v55 }
 0x63c   : > { %v6336_v32 = vmax.f32 %v6304_v46, 0.0  ;;  %v6305_v41 = vadd.f32 %v6273_v61, %v6241_v54 }
 0x63d   : > { %v6334_v43 = vmax.f32 %v6302_v29, 0.0  ;;  %v6303_v52 = vadd.f32 %v6271_v4, %v6239_v26 }
 0x63e   : > { %6368 = vst.msk [vmem:[%s9809_s11 + $0xb0] sm:$0xff] %vm532_vm1, %v6336_v32  ;;  %v6337_v6 = vmax.f32 %v6305_v41, 0.0 }
 0x63f   : > { %6366 = vst.msk [vmem:[%s9809_s11 + $0xa0] sm:$0xff] %vm532_vm1, %v6334_v43  ;;  %v6335_v34 = vmax.f32 %v6303_v52, 0.0  ;;  %v7826_v44 = vpop.f32.mrb[40].mxu1 }
 0x640   : > { %6369 = vst.msk [vmem:[%s9809_s11 + $0xb8] sm:$0xff] %vm532_vm1, %v6337_v6  ;;  %v6244_v2 = vadd.f32 %v7826_v44, %v9795_v5  ;;  %v6148_v35 = vpop.f32.mrb[41].mxu1 }
 0x641   : > { %6367 = vst.msk [vmem:[%s9809_s11 + $0xa8] sm:$0xff] %vm532_vm1, %v6335_v34  ;;  %v6242_v50 = vadd.f32 %v9795_v5, %v6148_v35  ;;  %v7827_v10 = vpop.f32.mrb[42].mxu1 }
 0x642   : > { %v6308_v21 = vadd.f32 %v6276_v58, %v6244_v2  ;;  %v6245_v3 = vadd.f32 %v7827_v10, %v9795_v5  ;;  %v6151_v22 = vpop.f32.mrb[43].mxu1 }
 0x643   : > { %v6306_v62 = vadd.f32 %v6274_v28, %v6242_v50  ;;  %v6243_v1 = vadd.f32 %v9795_v5, %v6151_v22 }
 0x644   : > { %v6340_v9 = vmax.f32 %v6308_v21, 0.0  ;;  %v6309_v48 = vadd.f32 %v6277_v20, %v6245_v3 }
 0x645   : > { %v6338_v23 = vmax.f32 %v6306_v62, 0.0  ;;  %v6307_v11 = vadd.f32 %v6275_v27, %v6243_v1 }
 0x646   : > { %6372 = vst.msk [vmem:[%s9809_s11 + $0xd0] sm:$0xff] %vm532_vm1, %v6340_v9  ;;  %v6341_v63 = vmax.f32 %v6309_v48, 0.0 }
 0x647   : > { %6370 = vst.msk [vmem:[%s9809_s11 + $0xc0] sm:$0xff] %vm532_vm1, %v6338_v23  ;;  %v6339_v42 = vmax.f32 %v6307_v11, 0.0  ;;  %v7830_v17 = vpop.f32.mrb[44].mxu1 }
 0x648   : > { %6373 = vst.msk [vmem:[%s9809_s11 + $0xd8] sm:$0xff] %vm532_vm1, %v6341_v63  ;;  %v6248_v45 = vadd.f32 %v7830_v17, %v9795_v5  ;;  %v6164_v24 = vpop.f32.mrb[45].mxu1 }
 0x649   : > { %6371 = vst.msk [vmem:[%s9809_s11 + $0xc8] sm:$0xff] %vm532_vm1, %v6339_v42  ;;  %v6246_v7 = vadd.f32 %v9795_v5, %v6164_v24  ;;  %v7831_v36 = vpop.f32.mrb[46].mxu1 }
 0x64a   : > { %v6312_v56 = vadd.f32 %v6280_v30, %v6248_v45  ;;  %v6249_v38 = vadd.f32 %v7831_v36, %v9795_v5  ;;  %v6167_v47 = vpop.f32.mrb[47].mxu1 }
 0x64b   : > { %v6310_v60 = vadd.f32 %v6278_v8, %v6246_v7  ;;  %v6247_v57 = vadd.f32 %v9795_v5, %v6167_v47 }
 0x64c   : > { %v6344_v18 = vmax.f32 %v6312_v56, 0.0  ;;  %v6313_v16 = vadd.f32 %v6281_v19, %v6249_v38 }
 0x64d   : > { %v6342_v15 = vmax.f32 %v6310_v60, 0.0  ;;  %v6311_v40 = vadd.f32 %v6279_v31, %v6247_v57 }
 0x64e   : > { %6376 = vst.msk [vmem:[%s9809_s11 + $0xf0] sm:$0xff] %vm532_vm1, %v6344_v18  ;;  %v6345_v59 = vmax.f32 %v6313_v16, 0.0 }
 0x64f   : > { %6374 = vst.msk [vmem:[%s9809_s11 + $0xe0] sm:$0xff] %vm532_vm1, %v6342_v15  ;;  %v6343_v0 = vmax.f32 %v6311_v40, 0.0 }
 0x650   : > { %6377 = vst.msk [vmem:[%s9809_s11 + $0xf8] sm:$0xff] %vm532_vm1, %v6345_v59 }
 0x651   : > { %6375 = vst.msk [vmem:[%s9809_s11 + $0xe8] sm:$0xff] %vm532_vm1, %v6343_v0 }
 0x652 PF: > { %s17_s2 = sadd.s32 1, %s8444_s2   ;;  %s9949_s24 = smov %s8440_s1 }
 0x653   : > { %p14_p5 = scmp.ge.s32.totalorder %s17_s2, 4   ;;  %s9950_s1 = smov %s9952_s25 }
 0x655   :  { %16 = sbr.rel (!%p14_p5) target bundleno = 2 (0x2), region = 127 }

</bundles_post_ra>
